<compile_context>
chip_gen: v7x
topology: tpu7x:2x2x1
jax: 0.10.0
libtpu: 0.0.40
codegen_flags: <defaults>
</compile_context>

<pallas_src>
import numpy as np
import jax
import jax.numpy as jnp
from jax.experimental import pallas as pl
from jax.experimental.pallas import tpu as pltpu


# ---------------------------------------------------------------------------
# numpy glue: sin-cos 2D positional embedding (MAE recipe) + im2col selector
# ---------------------------------------------------------------------------
def _get_1d_sincos(embed_dim, pos):
    omega = np.arange(embed_dim // 2, dtype=np.float64) / (embed_dim / 2.0)
    omega = 1.0 / (10000.0 ** omega)
    pos = pos.reshape(-1)
    out = np.einsum("m,d->md", pos, omega)
    return np.concatenate([np.sin(out), np.cos(out)], axis=1)


def get_2d_sincos_pos_embed(embed_dim, grid_size):
    grid_h = np.arange(grid_size, dtype=np.float32)
    grid_w = np.arange(grid_size, dtype=np.float32)
    grid = np.meshgrid(grid_w, grid_h)            # w goes first (MAE convention)
    grid = np.stack(grid, axis=0).reshape(2, 1, grid_size, grid_size)
    emb_h = _get_1d_sincos(embed_dim // 2, grid[0])
    emb_w = _get_1d_sincos(embed_dim // 2, grid[1])
    return np.concatenate([emb_h, emb_w], axis=1).astype(np.float32)   # (H*W, C)


def _make_im2col_matrix(H, W, Ho, Wo):
    """0/1 selection matrix G (9*Ho*Wo, H*W), tap-major: G @ img_rows gives the
    im2col patches of a 3x3, stride-2, pad-1 conv (zero padding baked in)."""
    G = np.zeros((9, Ho * Wo, H * W), np.float32)
    for kh in range(3):
        for kw in range(3):
            t = kh * 3 + kw
            for ho in range(Ho):
                for wo in range(Wo):
                    hi = 2 * ho - 1 + kh
                    wi = 2 * wo - 1 + kw
                    if 0 <= hi < H and 0 <= wi < W:
                        G[t, ho * Wo + wo, hi * W + wi] = 1.0
    return G.reshape(9 * Ho * Wo, H * W)


# ---------------------------------------------------------------------------
# in-kernel helpers
# ---------------------------------------------------------------------------
def _ln(x, gamma, beta, eps=1e-5):
    """LayerNorm over the last axis (eps matches nn.LayerNorm)."""
    mu = jnp.mean(x, axis=-1, keepdims=True)
    var = jnp.mean((x - mu) * (x - mu), axis=-1, keepdims=True)
    return (x - mu) * jax.lax.rsqrt(var + eps) * gamma + beta


def _gelu(x):
    # TODO(synk): nn.GELU default is the exact erf form; tanh approximation is
    # used because erf is not guaranteed to lower in Mosaic.
    return jax.nn.gelu(x, approximate=True)


def _op_dtype(a, b):
    if a.dtype == jnp.bfloat16 or b.dtype == jnp.bfloat16:
        return jnp.bfloat16
    return jnp.float32


def _mm(a, b):
    """a @ b, f32 accumulation; bf16 operands if either side is bf16."""
    dt = _op_dtype(a, b)
    return jax.lax.dot_general(a.astype(dt), b.astype(dt),
                               (((1,), (0,)), ((), ())),
                               preferred_element_type=jnp.float32)


def _mm_ta(a, b):
    """a^T @ b without materialising a transpose (contract axis 0 of both)."""
    dt = _op_dtype(a, b)
    return jax.lax.dot_general(a.astype(dt), b.astype(dt),
                               (((0,), (0,)), ((), ())),
                               preferred_element_type=jnp.float32)


def _mm_tb(a, b):
    """a @ b^T without materialising a transpose (contract axis 1 of both)."""
    dt = _op_dtype(a, b)
    return jax.lax.dot_general(a.astype(dt), b.astype(dt),
                               (((1,), (1,)), ((), ())),
                               preferred_element_type=jnp.float32)


# ---------------------------------------------------------------------------
# single fused kernel: whole Basic_Block_v1 forward for one batch element
# ---------------------------------------------------------------------------
def _fused_forward_kernel(
        x_ref, pos_ref,
        sg_ref, sb_ref, w1t_ref, b1_ref, eg_ref, eb_ref, w2_ref, b2_ref,
        ng_ref, nb_ref, cpw_ref, cpb_ref,
        spaw_ref, spab_ref, hmap_ref, hmapT_ref,
        spew_ref, speb_ref, spebo_ref,
        dsw_ref, g_ref, dg_ref, db_ref,
        o_ref):
    C, L = x_ref.shape
    depth = w1t_ref.shape[0]
    K = cpw_ref.shape[0]
    nH = hmap_ref.shape[1]
    n_out = o_ref.shape[1]

    # ---- seq_generate ------------------------------------------------------
    # TODO(synk): MinimumSpanningTree + _C.bfs_forward are custom CUDA tree
    # filter ops with no Pallas equivalent; identity BFS ordering is used, so
    # the gather and the later seq_resize inverse-gather cancel and are skipped.
    # NCHW -> (L, C) transpose + pos-embed add done here in VMEM (no XLA op).
    x = x_ref[...].astype(jnp.float32).T + pos_ref[...]          # (L, C)

    # ---- depth SSD blocks, fully fused (no HBM traffic between blocks) -----
    for d in range(depth):
        # TODO(synk): Mamba2 SSD selective scan unavailable -> identity substitute.
        x_spa = x + _ln(x, sg_ref[d], sb_ref[d])                 # (L, C)
        h = _mm_ta(x_spa, w1t_ref[d]) + b1_ref[d]                # (C, hidden) = x_spa^T @ w1^T
        h = _gelu(h)
        h = _ln(h, eg_ref[d], eb_ref[d])
        # TODO(synk): spectral Mamba2 unavailable -> identity substitute.
        y = _mm_tb(w2_ref[d], h) + b2_ref[d]                     # (L, C) = (h @ w2^T)^T
        x = _gelu(y) + x_spa

    # ---- head ---------------------------------------------------------------
    xn = _ln(x, ng_ref[...], nb_ref[...])                        # final LayerNorm (L, C)

    # Conv1d(C, C, kernel_size=K) over the first K tokens (output length 1).
    # Kept as K small accumulating dots: collapsing to one (1, K*C)@(K*C, C)
    # dot needs a lane-merging reshape of activation data Mosaic may reject.
    center = cpb_ref[...]                                        # (1, C)
    for k in range(K):
        center = center + _mm(xn[k:k + 1, :], cpw_ref[k])

    # TODO(synk): Spa_Attention class body unavailable; stand-in = multi-head
    # cross attention with the single center query (per-head score reduce /
    # broadcast via precomputed 0/1 head maps), residual broadcast over tokens.
    dh = C // nH
    q = _mm(center, spaw_ref[0]) + spab_ref[0:1, :]              # (1, C)
    k_ = _mm(xn, spaw_ref[1]) + spab_ref[1:2, :]                 # (L, C)
    v_ = _mm(xn, spaw_ref[2]) + spab_ref[2:3, :]                 # (L, C)
    s = _mm(k_ * q, hmap_ref[...]) * (1.0 / float(dh) ** 0.5)    # (L, nH)
    s = s - jnp.max(s, axis=0, keepdims=True)
    pw = jnp.exp(s)
    pw = pw / jnp.sum(pw, axis=0, keepdims=True)                 # exact softmax
    ctx = jnp.sum(_mm(pw, hmapT_ref[...]) * v_, axis=0, keepdims=True)   # (1, C)
    x1 = xn + _mm(ctx, spaw_ref[3]) + spab_ref[3:4, :]           # (L, C)

    # TODO(synk): Spe_Attention class body unavailable; stand-in = single-head
    # self-attention over channel tokens (feature dim L) + out proj + residual.
    # dot_general contraction patterns keep everything in (L, C) / (C, L)
    # natural layouts with no explicit transposes.
    q2 = _mm_ta(x1, spew_ref[0]) + speb_ref[0:1, :]              # (C, L)
    k2 = _mm_ta(x1, spew_ref[1]) + speb_ref[1:2, :]              # (C, L)
    v2 = _mm_ta(x1, spew_ref[2]) + speb_ref[2:3, :]              # (C, L)
    s2 = _mm_tb(q2, k2) * (1.0 / float(L) ** 0.5)                # (C, C)
    s2 = s2 - jnp.max(s2, axis=-1, keepdims=True)
    p2 = jnp.exp(s2)
    p2 = p2 / jnp.sum(p2, axis=-1, keepdims=True)
    o2 = _mm(p2, v2)                                             # (C, L)
    ximg = x1 + _mm_tb(spew_ref[3], o2) + spebo_ref[...]         # (L, C) image rows

    # Downsample: 3x3 / stride-2 / pad-1 conv (no bias) via one im2col
    # selection matmul + 9 accumulating taps, then LayerNorm over C.
    # (A single (n_out, 9*C)@(9*C, C) dot would need a lane-merging reshape of
    # the activation patch matrix, so the short tap loop stays.)
    pat = _mm(g_ref[...], ximg)                                  # (9*n_out, C)
    acc = _mm(pat[0:n_out, :], dsw_ref[0])
    for t in range(1, 9):
        acc = acc + _mm(pat[t * n_out:(t + 1) * n_out, :], dsw_ref[t])
    y = _ln(acc, dg_ref[...], db_ref[...])                       # (n_out, C)

    # Emit NCHW layout directly (fuses the wrapper-side final transpose).
    o_ref[...] = y.T.astype(o_ref.dtype)                         # (C, n_out)


# ---------------------------------------------------------------------------
# model forward: one pallas_call for the whole block stack + head
# ---------------------------------------------------------------------------
def basic_block_v1_forward(x, params):
    """x: (B, C, H, W) NCHW -> (B, C, H//2, W//2) NCHW."""
    B, C, H, W = x.shape
    L = H * W
    Ho = Wo = (H + 2 - 3) // 2 + 1
    n_out = Ho * Wo
    p = params

    # Free metadata reshape of NCHW; the (C, L)->(L, C) transpose and the
    # pos-embed add are done inside the kernel.
    x_cl = x.reshape(B, C, L)

    def full(arr):
        zeros = (0,) * arr.ndim
        return pl.BlockSpec(tuple(arr.shape), lambda b: zeros)

    weights = (
        p["pos_embed"],
        p["spa_gamma"], p["spa_beta"], p["w1t"], p["b1"],
        p["spe_gamma"], p["spe_beta"], p["w2"], p["b2"],
        p["norm_gamma"], p["norm_beta"], p["cpw"], p["cpb"],
        p["spa_w"], p["spa_b"], p["hmap"], p["hmapT"],
        p["spe_w"], p["spe_b"], p["spe_bo"],
        p["dsw"], p["G"], p["ds_gamma"], p["ds_beta"],
    )

    out = pl.pallas_call(
        _fused_forward_kernel,
        out_shape=jax.ShapeDtypeStruct((B, C, n_out), jnp.float32),
        grid=(B,),
        in_specs=[pl.BlockSpec((None, C, L), lambda b: (b, 0, 0))]
                 + [full(w) for w in weights],
        out_specs=pl.BlockSpec((None, C, n_out), lambda b: (b, 0, 0)),
        compiler_params=pltpu.CompilerParams(
            dimension_semantics=("parallel",),      # B >= 2 feeds both v7x TCs
            vmem_limit_bytes=32 * 1024 * 1024),
    )(x_cl, *weights)

    return out.reshape(B, C, Ho, Wo)


# ---------------------------------------------------------------------------
# deterministic parameter init (all repacks / transposes hoisted here, once)
# ---------------------------------------------------------------------------
def init_params(key, *, channels, depth, patch_size, hidden_len,
                spa_query_len, num_heads):
    C = channels
    L = patch_size ** 2
    K = spa_query_len
    wdt = jnp.bfloat16     # MXU-native storage for matmul weights (f32 accumulation)

    keys = iter(jax.random.split(key, 2 * depth + 16))

    def nrm(shape):
        return jax.random.normal(next(keys), shape, jnp.float32) * 0.02

    # Depth-stacked SSD-block parameters (leading depth axis => one fused kernel).
    w1t = jnp.stack([nrm((hidden_len, L)).T for _ in range(depth)]).astype(wdt)  # (d, L, hidden)
    w2 = jnp.stack([nrm((L, hidden_len)) for _ in range(depth)]).astype(wdt)     # (d, L, hidden) torch layout
    spa_gamma = jnp.ones((depth, 1, C), jnp.float32)
    spa_beta = jnp.zeros((depth, 1, C), jnp.float32)
    spe_gamma = jnp.ones((depth, 1, hidden_len), jnp.float32)
    spe_beta = jnp.zeros((depth, 1, hidden_len), jnp.float32)
    b1 = jnp.zeros((depth, 1, hidden_len), jnp.float32)
    b2 = jnp.zeros((depth, L, 1), jnp.float32)       # column bias for (L, C) layout

    # Conv1d center projection: torch (out, in, k) -> (k, in, out)
    cpw = jnp.transpose(nrm((C, C, K)), (2, 1, 0)).astype(wdt)
    cpb = jnp.zeros((1, C), jnp.float32)

    spa_w = jnp.stack([nrm((C, C)) for _ in range(4)]).astype(wdt)    # q, k, v, out
    spa_b = jnp.zeros((4, C), jnp.float32)

    # Spe attention: q, k, v projections + out-projection stored pre-transposed
    # so the kernel emits the residual directly in (L, C) layout.
    spe_qkv = [nrm((L, L)) for _ in range(3)]
    spe_out_t = nrm((L, L)).T
    spe_w = jnp.stack(spe_qkv + [spe_out_t]).astype(wdt)              # (4, L, L)
    spe_b = jnp.zeros((3, L), jnp.float32)
    spe_bo = jnp.zeros((L, 1), jnp.float32)

    # Conv2d downsample: torch (out, in, kh, kw) -> (tap, in, out)
    dsw = jnp.transpose(nrm((C, C, 3, 3)), (2, 3, 1, 0)).reshape(9, C, C).astype(wdt)

    # head-membership 0/1 matrices (per-head slicing/concat replaced by matmuls)
    dh = C // num_heads
    hmap = np.zeros((C, num_heads), np.float32)
    for h in range(num_heads):
        hmap[h * dh:(h + 1) * dh, h] = 1.0

    Ho = Wo = (patch_size + 2 - 3) // 2 + 1
    # TODO(synk): for large patch_size replace the dense 0/1 im2col matrix with
    # strided gathers; at these sizes one small bf16 matmul is cheapest.
    G = _make_im2col_matrix(patch_size, patch_size, Ho, Wo)

    pos_embed = jnp.asarray(get_2d_sincos_pos_embed(C, patch_size))   # (L, C)

    return dict(
        pos_embed=pos_embed,
        spa_gamma=spa_gamma, spa_beta=spa_beta, w1t=w1t, b1=b1,
        spe_gamma=spe_gamma, spe_beta=spe_beta, w2=w2, b2=b2,
        norm_gamma=jnp.ones((1, C), jnp.float32),
        norm_beta=jnp.zeros((1, C), jnp.float32),
        cpw=cpw, cpb=cpb,
        spa_w=spa_w, spa_b=spa_b,
        hmap=jnp.asarray(hmap), hmapT=jnp.asarray(hmap.T),
        spe_w=spe_w, spe_b=spe_b, spe_bo=spe_bo,
        dsw=dsw, G=jnp.asarray(G).astype(wdt),
        ds_gamma=jnp.ones((1, C), jnp.float32),
        ds_beta=jnp.zeros((1, C), jnp.float32),
    )


# ---------------------------------------------------------------------------
if __name__ == "__main__":
    B, C = 2, 32
    patch_size = 8                 # H = W = patch_size, seq_len = patch_size**2
    depth = 2
    num_heads = 4
    hidden_len = 32
    spa_query_len = 5

    key = jax.random.PRNGKey(0)
    kx, kp = jax.random.split(key)
    x = jax.random.normal(kx, (B, C, patch_size, patch_size), jnp.float32)
    params = init_params(kp, channels=C, depth=depth, patch_size=patch_size,
                         hidden_len=hidden_len, spa_query_len=spa_query_len,
                         num_heads=num_heads)

    fwd = jax.jit(basic_block_v1_forward)
    out = jax.block_until_ready(fwd(x, params))
    assert out.shape == (B, C, patch_size // 2, patch_size // 2), out.shape
    assert bool(jnp.all(jnp.isfinite(out)))
    print("KERNEL_OK")
</pallas_src>

<mosaic_0001>
module attributes {stable_mosaic.version = 11 : i64} {
  func.func @_fused_forward_kernel(%arg0: i32, %arg1: memref<1x32x64xf32, #tpu.memory_space<vmem>>, %arg2: memref<64x32xf32, #tpu.memory_space<vmem>>, %arg3: memref<2x1x32xf32, #tpu.memory_space<vmem>>, %arg4: memref<2x1x32xf32, #tpu.memory_space<vmem>>, %arg5: memref<2x64x32xbf16, #tpu.memory_space<vmem>>, %arg6: memref<2x1x32xf32, #tpu.memory_space<vmem>>, %arg7: memref<2x1x32xf32, #tpu.memory_space<vmem>>, %arg8: memref<2x1x32xf32, #tpu.memory_space<vmem>>, %arg9: memref<2x64x32xbf16, #tpu.memory_space<vmem>>, %arg10: memref<2x64x1xf32, #tpu.memory_space<vmem>>, %arg11: memref<1x32xf32, #tpu.memory_space<vmem>>, %arg12: memref<1x32xf32, #tpu.memory_space<vmem>>, %arg13: memref<5x32x32xbf16, #tpu.memory_space<vmem>>, %arg14: memref<1x32xf32, #tpu.memory_space<vmem>>, %arg15: memref<4x32x32xbf16, #tpu.memory_space<vmem>>, %arg16: memref<4x32xf32, #tpu.memory_space<vmem>>, %arg17: memref<32x4xf32, #tpu.memory_space<vmem>>, %arg18: memref<4x32xf32, #tpu.memory_space<vmem>>, %arg19: memref<4x64x64xbf16, #tpu.memory_space<vmem>>, %arg20: memref<3x64xf32, #tpu.memory_space<vmem>>, %arg21: memref<64x1xf32, #tpu.memory_space<vmem>>, %arg22: memref<9x32x32xbf16, #tpu.memory_space<vmem>>, %arg23: memref<144x64xbf16, #tpu.memory_space<vmem>>, %arg24: memref<1x32xf32, #tpu.memory_space<vmem>>, %arg25: memref<1x32xf32, #tpu.memory_space<vmem>>, %arg26: memref<1x32x16xf32, #tpu.memory_space<vmem>>) attributes {dimension_semantics = [#tpu.dimension_semantics<parallel>], iteration_bounds = array<i64: 2>, scalar_prefetch = 0 : i64, scratch_operands = 0 : i64, tpu.core_type = #tpu.core_type<tc>, window_params = [{transform_indices = @transform_0, window_bounds = array<i64: 1, 32, 64>}, {pipeline_mode = #tpu.pipeline_mode<synchronous>, transform_indices = @transform_1, window_bounds = array<i64: 64, 32>}, {pipeline_mode = #tpu.pipeline_mode<synchronous>, transform_indices = @transform_2, window_bounds = array<i64: 2, 1, 32>}, {pipeline_mode = #tpu.pipeline_mode<synchronous>, transform_indices = @transform_3, window_bounds = array<i64: 2, 1, 32>}, {pipeline_mode = #tpu.pipeline_mode<synchronous>, transform_indices = @transform_4, window_bounds = array<i64: 2, 64, 32>}, {pipeline_mode = #tpu.pipeline_mode<synchronous>, transform_indices = @transform_5, window_bounds = array<i64: 2, 1, 32>}, {pipeline_mode = #tpu.pipeline_mode<synchronous>, transform_indices = @transform_6, window_bounds = array<i64: 2, 1, 32>}, {pipeline_mode = #tpu.pipeline_mode<synchronous>, transform_indices = @transform_7, window_bounds = array<i64: 2, 1, 32>}, {pipeline_mode = #tpu.pipeline_mode<synchronous>, transform_indices = @transform_8, window_bounds = array<i64: 2, 64, 32>}, {pipeline_mode = #tpu.pipeline_mode<synchronous>, transform_indices = @transform_9, window_bounds = array<i64: 2, 64, 1>}, {pipeline_mode = #tpu.pipeline_mode<synchronous>, transform_indices = @transform_10, window_bounds = array<i64: 1, 32>}, {pipeline_mode = #tpu.pipeline_mode<synchronous>, transform_indices = @transform_11, window_bounds = array<i64: 1, 32>}, {pipeline_mode = #tpu.pipeline_mode<synchronous>, transform_indices = @transform_12, window_bounds = array<i64: 5, 32, 32>}, {pipeline_mode = #tpu.pipeline_mode<synchronous>, transform_indices = @transform_13, window_bounds = array<i64: 1, 32>}, {pipeline_mode = #tpu.pipeline_mode<synchronous>, transform_indices = @transform_14, window_bounds = array<i64: 4, 32, 32>}, {pipeline_mode = #tpu.pipeline_mode<synchronous>, transform_indices = @transform_15, window_bounds = array<i64: 4, 32>}, {pipeline_mode = #tpu.pipeline_mode<synchronous>, transform_indices = @transform_16, window_bounds = array<i64: 32, 4>}, {pipeline_mode = #tpu.pipeline_mode<synchronous>, transform_indices = @transform_17, window_bounds = array<i64: 4, 32>}, {pipeline_mode = #tpu.pipeline_mode<synchronous>, transform_indices = @transform_18, window_bounds = array<i64: 4, 64, 64>}, {pipeline_mode = #tpu.pipeline_mode<synchronous>, transform_indices = @transform_19, window_bounds = array<i64: 3, 64>}, {pipeline_mode = #tpu.pipeline_mode<synchronous>, transform_indices = @transform_20, window_bounds = array<i64: 64, 1>}, {pipeline_mode = #tpu.pipeline_mode<synchronous>, transform_indices = @transform_21, window_bounds = array<i64: 9, 32, 32>}, {pipeline_mode = #tpu.pipeline_mode<synchronous>, transform_indices = @transform_22, window_bounds = array<i64: 144, 64>}, {pipeline_mode = #tpu.pipeline_mode<synchronous>, transform_indices = @transform_23, window_bounds = array<i64: 1, 32>}, {pipeline_mode = #tpu.pipeline_mode<synchronous>, transform_indices = @transform_24, window_bounds = array<i64: 1, 32>}, {transform_indices = @transform_25, window_bounds = array<i64: 1, 32, 16>}]} {
    %c0 = arith.constant 0 : index
    %c0_0 = arith.constant 0 : index
    %c0_1 = arith.constant 0 : index
    %0 = vector.load %arg1[%c0, %c0_0, %c0_1] : memref<1x32x64xf32, #tpu.memory_space<vmem>>, vector<1x32x64xf32>
    %1 = vector.shape_cast %0 : vector<1x32x64xf32> to vector<32x64xf32>
    %2 = tpu.transpose %1, [1, 0] : vector<32x64xf32> -> vector<64x32xf32>
    %c0_2 = arith.constant 0 : index
    %c0_3 = arith.constant 0 : index
    %3 = vector.load %arg2[%c0_2, %c0_3] : memref<64x32xf32, #tpu.memory_space<vmem>>, vector<64x32xf32>
    %4 = arith.addf %2, %3 : vector<64x32xf32>
    %c0_4 = arith.constant 0 : index
    %c0_5 = arith.constant 0 : index
    %c0_6 = arith.constant 0 : index
    %5 = vector.load %arg3[%c0_4, %c0_5, %c0_6] : memref<2x1x32xf32, #tpu.memory_space<vmem>>, vector<1x1x32xf32>
    %6 = vector.shape_cast %5 : vector<1x1x32xf32> to vector<1x32xf32>
    %c0_7 = arith.constant 0 : index
    %c0_8 = arith.constant 0 : index
    %c0_9 = arith.constant 0 : index
    %7 = vector.load %arg4[%c0_7, %c0_8, %c0_9] : memref<2x1x32xf32, #tpu.memory_space<vmem>>, vector<1x1x32xf32>
    %8 = vector.shape_cast %7 : vector<1x1x32xf32> to vector<1x32xf32>
    %cst = arith.constant dense<0.000000e+00> : vector<64xf32>
    %9 = vector.multi_reduction <add>, %4, %cst [1] : vector<64x32xf32> to vector<64xf32>
    %10 = vector.shape_cast %9 : vector<64xf32> to vector<64x1xf32>
    %cst_10 = arith.constant 3.200000e+01 : f32
    %11 = vector.broadcast %cst_10 : f32 to vector<64x1xf32>
    %12 = arith.divf %10, %11 : vector<64x1xf32>
    %13 = vector.broadcast %12 : vector<64x1xf32> to vector<64x32xf32>
    %14 = arith.subf %4, %13 : vector<64x32xf32>
    %15 = vector.broadcast %12 : vector<64x1xf32> to vector<64x32xf32>
    %16 = arith.subf %4, %15 : vector<64x32xf32>
    %17 = arith.mulf %14, %16 : vector<64x32xf32>
    %cst_11 = arith.constant dense<0.000000e+00> : vector<64xf32>
    %18 = vector.multi_reduction <add>, %17, %cst_11 [1] : vector<64x32xf32> to vector<64xf32>
    %19 = vector.shape_cast %18 : vector<64xf32> to vector<64x1xf32>
    %cst_12 = arith.constant 3.200000e+01 : f32
    %20 = vector.broadcast %cst_12 : f32 to vector<64x1xf32>
    %21 = arith.divf %19, %20 : vector<64x1xf32>
    %22 = vector.broadcast %12 : vector<64x1xf32> to vector<64x32xf32>
    %23 = arith.subf %4, %22 : vector<64x32xf32>
    %cst_13 = arith.constant 9.99999974E-6 : f32
    %24 = vector.broadcast %cst_13 : f32 to vector<64x1xf32>
    %25 = arith.addf %21, %24 : vector<64x1xf32>
    %26 = math.rsqrt %25 : vector<64x1xf32>
    %27 = vector.broadcast %26 : vector<64x1xf32> to vector<64x32xf32>
    %28 = arith.mulf %23, %27 : vector<64x32xf32>
    %29 = vector.broadcast %6 : vector<1x32xf32> to vector<64x32xf32>
    %30 = arith.mulf %28, %29 : vector<64x32xf32>
    %31 = vector.broadcast %8 : vector<1x32xf32> to vector<64x32xf32>
    %32 = arith.addf %30, %31 : vector<64x32xf32>
    %33 = arith.addf %4, %32 : vector<64x32xf32>
    %c0_14 = arith.constant 0 : index
    %c0_15 = arith.constant 0 : index
    %c0_16 = arith.constant 0 : index
    %34 = vector.load %arg5[%c0_14, %c0_15, %c0_16] : memref<2x64x32xbf16, #tpu.memory_space<vmem>>, vector<1x64x32xbf16>
    %35 = vector.shape_cast %34 : vector<1x64x32xbf16> to vector<64x32xbf16>
    %36 = arith.truncf %33 : vector<64x32xf32> to vector<64x32xbf16>
    %cst_17 = arith.constant dense<0.000000e+00> : vector<32x32xf32>
    %37 = tpu.matmul %36, %35, %cst_17 {dimension_numbers = #tpu.dot_dimension_numbers<[0], [0], [1], [1], [0, 1, 1, 1], [], []>} : vector<64x32xbf16>, vector<64x32xbf16>, vector<32x32xf32> -> vector<32x32xf32>
    %c0_18 = arith.constant 0 : index
    %c0_19 = arith.constant 0 : index
    %c0_20 = arith.constant 0 : index
    %38 = vector.load %arg6[%c0_18, %c0_19, %c0_20] : memref<2x1x32xf32, #tpu.memory_space<vmem>>, vector<1x1x32xf32>
    %39 = vector.shape_cast %38 : vector<1x1x32xf32> to vector<1x32xf32>
    %40 = vector.broadcast %39 : vector<1x32xf32> to vector<32x32xf32>
    %41 = arith.addf %37, %40 : vector<32x32xf32>
    %42 = arith.mulf %41, %41 : vector<32x32xf32>
    %43 = arith.mulf %41, %42 : vector<32x32xf32>
    %cst_21 = arith.constant 4.471500e-02 : f32
    %44 = vector.broadcast %cst_21 : f32 to vector<32x32xf32>
    %45 = arith.mulf %44, %43 : vector<32x32xf32>
    %46 = arith.addf %41, %45 : vector<32x32xf32>
    %cst_22 = arith.constant 0.797884583 : f32
    %47 = vector.broadcast %cst_22 : f32 to vector<32x32xf32>
    %48 = arith.mulf %47, %46 : vector<32x32xf32>
    %49 = math.tanh %48 : vector<32x32xf32>
    %cst_23 = arith.constant 1.000000e+00 : f32
    %50 = vector.broadcast %cst_23 : f32 to vector<32x32xf32>
    %51 = arith.addf %50, %49 : vector<32x32xf32>
    %cst_24 = arith.constant 5.000000e-01 : f32
    %52 = vector.broadcast %cst_24 : f32 to vector<32x32xf32>
    %53 = arith.mulf %52, %51 : vector<32x32xf32>
    %54 = arith.mulf %41, %53 : vector<32x32xf32>
    %c0_25 = arith.constant 0 : index
    %c0_26 = arith.constant 0 : index
    %c0_27 = arith.constant 0 : index
    %55 = vector.load %arg7[%c0_25, %c0_26, %c0_27] : memref<2x1x32xf32, #tpu.memory_space<vmem>>, vector<1x1x32xf32>
    %56 = vector.shape_cast %55 : vector<1x1x32xf32> to vector<1x32xf32>
    %c0_28 = arith.constant 0 : index
    %c0_29 = arith.constant 0 : index
    %c0_30 = arith.constant 0 : index
    %57 = vector.load %arg8[%c0_28, %c0_29, %c0_30] : memref<2x1x32xf32, #tpu.memory_space<vmem>>, vector<1x1x32xf32>
    %58 = vector.shape_cast %57 : vector<1x1x32xf32> to vector<1x32xf32>
    %cst_31 = arith.constant dense<0.000000e+00> : vector<32xf32>
    %59 = vector.multi_reduction <add>, %54, %cst_31 [1] : vector<32x32xf32> to vector<32xf32>
    %60 = vector.shape_cast %59 : vector<32xf32> to vector<32x1xf32>
    %cst_32 = arith.constant 3.200000e+01 : f32
    %61 = vector.broadcast %cst_32 : f32 to vector<32x1xf32>
    %62 = arith.divf %60, %61 : vector<32x1xf32>
    %63 = vector.broadcast %62 : vector<32x1xf32> to vector<32x32xf32>
    %64 = arith.subf %54, %63 : vector<32x32xf32>
    %65 = vector.broadcast %62 : vector<32x1xf32> to vector<32x32xf32>
    %66 = arith.subf %54, %65 : vector<32x32xf32>
    %67 = arith.mulf %64, %66 : vector<32x32xf32>
    %cst_33 = arith.constant dense<0.000000e+00> : vector<32xf32>
    %68 = vector.multi_reduction <add>, %67, %cst_33 [1] : vector<32x32xf32> to vector<32xf32>
    %69 = vector.shape_cast %68 : vector<32xf32> to vector<32x1xf32>
    %cst_34 = arith.constant 3.200000e+01 : f32
    %70 = vector.broadcast %cst_34 : f32 to vector<32x1xf32>
    %71 = arith.divf %69, %70 : vector<32x1xf32>
    %72 = vector.broadcast %62 : vector<32x1xf32> to vector<32x32xf32>
    %73 = arith.subf %54, %72 : vector<32x32xf32>
    %cst_35 = arith.constant 9.99999974E-6 : f32
    %74 = vector.broadcast %cst_35 : f32 to vector<32x1xf32>
    %75 = arith.addf %71, %74 : vector<32x1xf32>
    %76 = math.rsqrt %75 : vector<32x1xf32>
    %77 = vector.broadcast %76 : vector<32x1xf32> to vector<32x32xf32>
    %78 = arith.mulf %73, %77 : vector<32x32xf32>
    %79 = vector.broadcast %56 : vector<1x32xf32> to vector<32x32xf32>
    %80 = arith.mulf %78, %79 : vector<32x32xf32>
    %81 = vector.broadcast %58 : vector<1x32xf32> to vector<32x32xf32>
    %82 = arith.addf %80, %81 : vector<32x32xf32>
    %c0_36 = arith.constant 0 : index
    %c0_37 = arith.constant 0 : index
    %c0_38 = arith.constant 0 : index
    %83 = vector.load %arg9[%c0_36, %c0_37, %c0_38] : memref<2x64x32xbf16, #tpu.memory_space<vmem>>, vector<1x64x32xbf16>
    %84 = vector.shape_cast %83 : vector<1x64x32xbf16> to vector<64x32xbf16>
    %85 = arith.truncf %82 : vector<32x32xf32> to vector<32x32xbf16>
    %cst_39 = arith.constant dense<0.000000e+00> : vector<64x32xf32>
    %86 = tpu.matmul %84, %85, %cst_39 {dimension_numbers = #tpu.dot_dimension_numbers<[1], [1], [0], [0], [0, 0, 1, 0], [], []>} : vector<64x32xbf16>, vector<32x32xbf16>, vector<64x32xf32> -> vector<64x32xf32>
    %c0_40 = arith.constant 0 : index
    %c0_41 = arith.constant 0 : index
    %c0_42 = arith.constant 0 : index
    %87 = vector.load %arg10[%c0_40, %c0_41, %c0_42] : memref<2x64x1xf32, #tpu.memory_space<vmem>>, vector<1x64x1xf32>
    %88 = vector.shape_cast %87 : vector<1x64x1xf32> to vector<64x1xf32>
    %89 = vector.broadcast %88 : vector<64x1xf32> to vector<64x32xf32>
    %90 = arith.addf %86, %89 : vector<64x32xf32>
    %91 = arith.mulf %90, %90 : vector<64x32xf32>
    %92 = arith.mulf %90, %91 : vector<64x32xf32>
    %cst_43 = arith.constant 4.471500e-02 : f32
    %93 = vector.broadcast %cst_43 : f32 to vector<64x32xf32>
    %94 = arith.mulf %93, %92 : vector<64x32xf32>
    %95 = arith.addf %90, %94 : vector<64x32xf32>
    %cst_44 = arith.constant 0.797884583 : f32
    %96 = vector.broadcast %cst_44 : f32 to vector<64x32xf32>
    %97 = arith.mulf %96, %95 : vector<64x32xf32>
    %98 = math.tanh %97 : vector<64x32xf32>
    %cst_45 = arith.constant 1.000000e+00 : f32
    %99 = vector.broadcast %cst_45 : f32 to vector<64x32xf32>
    %100 = arith.addf %99, %98 : vector<64x32xf32>
    %cst_46 = arith.constant 5.000000e-01 : f32
    %101 = vector.broadcast %cst_46 : f32 to vector<64x32xf32>
    %102 = arith.mulf %101, %100 : vector<64x32xf32>
    %103 = arith.mulf %90, %102 : vector<64x32xf32>
    %104 = arith.addf %103, %33 : vector<64x32xf32>
    %c1 = arith.constant 1 : index
    %c0_47 = arith.constant 0 : index
    %c0_48 = arith.constant 0 : index
    %105 = vector.load %arg3[%c1, %c0_47, %c0_48] : memref<2x1x32xf32, #tpu.memory_space<vmem>>, vector<1x1x32xf32>
    %106 = vector.shape_cast %105 : vector<1x1x32xf32> to vector<1x32xf32>
    %c1_49 = arith.constant 1 : index
    %c0_50 = arith.constant 0 : index
    %c0_51 = arith.constant 0 : index
    %107 = vector.load %arg4[%c1_49, %c0_50, %c0_51] : memref<2x1x32xf32, #tpu.memory_space<vmem>>, vector<1x1x32xf32>
    %108 = vector.shape_cast %107 : vector<1x1x32xf32> to vector<1x32xf32>
    %cst_52 = arith.constant dense<0.000000e+00> : vector<64xf32>
    %109 = vector.multi_reduction <add>, %104, %cst_52 [1] : vector<64x32xf32> to vector<64xf32>
    %110 = vector.shape_cast %109 : vector<64xf32> to vector<64x1xf32>
    %cst_53 = arith.constant 3.200000e+01 : f32
    %111 = vector.broadcast %cst_53 : f32 to vector<64x1xf32>
    %112 = arith.divf %110, %111 : vector<64x1xf32>
    %113 = vector.broadcast %112 : vector<64x1xf32> to vector<64x32xf32>
    %114 = arith.subf %104, %113 : vector<64x32xf32>
    %115 = vector.broadcast %112 : vector<64x1xf32> to vector<64x32xf32>
    %116 = arith.subf %104, %115 : vector<64x32xf32>
    %117 = arith.mulf %114, %116 : vector<64x32xf32>
    %cst_54 = arith.constant dense<0.000000e+00> : vector<64xf32>
    %118 = vector.multi_reduction <add>, %117, %cst_54 [1] : vector<64x32xf32> to vector<64xf32>
    %119 = vector.shape_cast %118 : vector<64xf32> to vector<64x1xf32>
    %cst_55 = arith.constant 3.200000e+01 : f32
    %120 = vector.broadcast %cst_55 : f32 to vector<64x1xf32>
    %121 = arith.divf %119, %120 : vector<64x1xf32>
    %122 = vector.broadcast %112 : vector<64x1xf32> to vector<64x32xf32>
    %123 = arith.subf %104, %122 : vector<64x32xf32>
    %cst_56 = arith.constant 9.99999974E-6 : f32
    %124 = vector.broadcast %cst_56 : f32 to vector<64x1xf32>
    %125 = arith.addf %121, %124 : vector<64x1xf32>
    %126 = math.rsqrt %125 : vector<64x1xf32>
    %127 = vector.broadcast %126 : vector<64x1xf32> to vector<64x32xf32>
    %128 = arith.mulf %123, %127 : vector<64x32xf32>
    %129 = vector.broadcast %106 : vector<1x32xf32> to vector<64x32xf32>
    %130 = arith.mulf %128, %129 : vector<64x32xf32>
    %131 = vector.broadcast %108 : vector<1x32xf32> to vector<64x32xf32>
    %132 = arith.addf %130, %131 : vector<64x32xf32>
    %133 = arith.addf %104, %132 : vector<64x32xf32>
    %c1_57 = arith.constant 1 : index
    %c0_58 = arith.constant 0 : index
    %c0_59 = arith.constant 0 : index
    %134 = vector.load %arg5[%c1_57, %c0_58, %c0_59] : memref<2x64x32xbf16, #tpu.memory_space<vmem>>, vector<1x64x32xbf16>
    %135 = vector.shape_cast %134 : vector<1x64x32xbf16> to vector<64x32xbf16>
    %136 = arith.truncf %133 : vector<64x32xf32> to vector<64x32xbf16>
    %cst_60 = arith.constant dense<0.000000e+00> : vector<32x32xf32>
    %137 = tpu.matmul %136, %135, %cst_60 {dimension_numbers = #tpu.dot_dimension_numbers<[0], [0], [1], [1], [0, 1, 1, 1], [], []>} : vector<64x32xbf16>, vector<64x32xbf16>, vector<32x32xf32> -> vector<32x32xf32>
    %c1_61 = arith.constant 1 : index
    %c0_62 = arith.constant 0 : index
    %c0_63 = arith.constant 0 : index
    %138 = vector.load %arg6[%c1_61, %c0_62, %c0_63] : memref<2x1x32xf32, #tpu.memory_space<vmem>>, vector<1x1x32xf32>
    %139 = vector.shape_cast %138 : vector<1x1x32xf32> to vector<1x32xf32>
    %140 = vector.broadcast %139 : vector<1x32xf32> to vector<32x32xf32>
    %141 = arith.addf %137, %140 : vector<32x32xf32>
    %142 = arith.mulf %141, %141 : vector<32x32xf32>
    %143 = arith.mulf %141, %142 : vector<32x32xf32>
    %cst_64 = arith.constant 4.471500e-02 : f32
    %144 = vector.broadcast %cst_64 : f32 to vector<32x32xf32>
    %145 = arith.mulf %144, %143 : vector<32x32xf32>
    %146 = arith.addf %141, %145 : vector<32x32xf32>
    %cst_65 = arith.constant 0.797884583 : f32
    %147 = vector.broadcast %cst_65 : f32 to vector<32x32xf32>
    %148 = arith.mulf %147, %146 : vector<32x32xf32>
    %149 = math.tanh %148 : vector<32x32xf32>
    %cst_66 = arith.constant 1.000000e+00 : f32
    %150 = vector.broadcast %cst_66 : f32 to vector<32x32xf32>
    %151 = arith.addf %150, %149 : vector<32x32xf32>
    %cst_67 = arith.constant 5.000000e-01 : f32
    %152 = vector.broadcast %cst_67 : f32 to vector<32x32xf32>
    %153 = arith.mulf %152, %151 : vector<32x32xf32>
    %154 = arith.mulf %141, %153 : vector<32x32xf32>
    %c1_68 = arith.constant 1 : index
    %c0_69 = arith.constant 0 : index
    %c0_70 = arith.constant 0 : index
    %155 = vector.load %arg7[%c1_68, %c0_69, %c0_70] : memref<2x1x32xf32, #tpu.memory_space<vmem>>, vector<1x1x32xf32>
    %156 = vector.shape_cast %155 : vector<1x1x32xf32> to vector<1x32xf32>
    %c1_71 = arith.constant 1 : index
    %c0_72 = arith.constant 0 : index
    %c0_73 = arith.constant 0 : index
    %157 = vector.load %arg8[%c1_71, %c0_72, %c0_73] : memref<2x1x32xf32, #tpu.memory_space<vmem>>, vector<1x1x32xf32>
    %158 = vector.shape_cast %157 : vector<1x1x32xf32> to vector<1x32xf32>
    %cst_74 = arith.constant dense<0.000000e+00> : vector<32xf32>
    %159 = vector.multi_reduction <add>, %154, %cst_74 [1] : vector<32x32xf32> to vector<32xf32>
    %160 = vector.shape_cast %159 : vector<32xf32> to vector<32x1xf32>
    %cst_75 = arith.constant 3.200000e+01 : f32
    %161 = vector.broadcast %cst_75 : f32 to vector<32x1xf32>
    %162 = arith.divf %160, %161 : vector<32x1xf32>
    %163 = vector.broadcast %162 : vector<32x1xf32> to vector<32x32xf32>
    %164 = arith.subf %154, %163 : vector<32x32xf32>
    %165 = vector.broadcast %162 : vector<32x1xf32> to vector<32x32xf32>
    %166 = arith.subf %154, %165 : vector<32x32xf32>
    %167 = arith.mulf %164, %166 : vector<32x32xf32>
    %cst_76 = arith.constant dense<0.000000e+00> : vector<32xf32>
    %168 = vector.multi_reduction <add>, %167, %cst_76 [1] : vector<32x32xf32> to vector<32xf32>
    %169 = vector.shape_cast %168 : vector<32xf32> to vector<32x1xf32>
    %cst_77 = arith.constant 3.200000e+01 : f32
    %170 = vector.broadcast %cst_77 : f32 to vector<32x1xf32>
    %171 = arith.divf %169, %170 : vector<32x1xf32>
    %172 = vector.broadcast %162 : vector<32x1xf32> to vector<32x32xf32>
    %173 = arith.subf %154, %172 : vector<32x32xf32>
    %cst_78 = arith.constant 9.99999974E-6 : f32
    %174 = vector.broadcast %cst_78 : f32 to vector<32x1xf32>
    %175 = arith.addf %171, %174 : vector<32x1xf32>
    %176 = math.rsqrt %175 : vector<32x1xf32>
    %177 = vector.broadcast %176 : vector<32x1xf32> to vector<32x32xf32>
    %178 = arith.mulf %173, %177 : vector<32x32xf32>
    %179 = vector.broadcast %156 : vector<1x32xf32> to vector<32x32xf32>
    %180 = arith.mulf %178, %179 : vector<32x32xf32>
    %181 = vector.broadcast %158 : vector<1x32xf32> to vector<32x32xf32>
    %182 = arith.addf %180, %181 : vector<32x32xf32>
    %c1_79 = arith.constant 1 : index
    %c0_80 = arith.constant 0 : index
    %c0_81 = arith.constant 0 : index
    %183 = vector.load %arg9[%c1_79, %c0_80, %c0_81] : memref<2x64x32xbf16, #tpu.memory_space<vmem>>, vector<1x64x32xbf16>
    %184 = vector.shape_cast %183 : vector<1x64x32xbf16> to vector<64x32xbf16>
    %185 = arith.truncf %182 : vector<32x32xf32> to vector<32x32xbf16>
    %cst_82 = arith.constant dense<0.000000e+00> : vector<64x32xf32>
    %186 = tpu.matmul %184, %185, %cst_82 {dimension_numbers = #tpu.dot_dimension_numbers<[1], [1], [0], [0], [0, 0, 1, 0], [], []>} : vector<64x32xbf16>, vector<32x32xbf16>, vector<64x32xf32> -> vector<64x32xf32>
    %c1_83 = arith.constant 1 : index
    %c0_84 = arith.constant 0 : index
    %c0_85 = arith.constant 0 : index
    %187 = vector.load %arg10[%c1_83, %c0_84, %c0_85] : memref<2x64x1xf32, #tpu.memory_space<vmem>>, vector<1x64x1xf32>
    %188 = vector.shape_cast %187 : vector<1x64x1xf32> to vector<64x1xf32>
    %189 = vector.broadcast %188 : vector<64x1xf32> to vector<64x32xf32>
    %190 = arith.addf %186, %189 : vector<64x32xf32>
    %191 = arith.mulf %190, %190 : vector<64x32xf32>
    %192 = arith.mulf %190, %191 : vector<64x32xf32>
    %cst_86 = arith.constant 4.471500e-02 : f32
    %193 = vector.broadcast %cst_86 : f32 to vector<64x32xf32>
    %194 = arith.mulf %193, %192 : vector<64x32xf32>
    %195 = arith.addf %190, %194 : vector<64x32xf32>
    %cst_87 = arith.constant 0.797884583 : f32
    %196 = vector.broadcast %cst_87 : f32 to vector<64x32xf32>
    %197 = arith.mulf %196, %195 : vector<64x32xf32>
    %198 = math.tanh %197 : vector<64x32xf32>
    %cst_88 = arith.constant 1.000000e+00 : f32
    %199 = vector.broadcast %cst_88 : f32 to vector<64x32xf32>
    %200 = arith.addf %199, %198 : vector<64x32xf32>
    %cst_89 = arith.constant 5.000000e-01 : f32
    %201 = vector.broadcast %cst_89 : f32 to vector<64x32xf32>
    %202 = arith.mulf %201, %200 : vector<64x32xf32>
    %203 = arith.mulf %190, %202 : vector<64x32xf32>
    %204 = arith.addf %203, %133 : vector<64x32xf32>
    %c0_90 = arith.constant 0 : index
    %c0_91 = arith.constant 0 : index
    %205 = vector.load %arg11[%c0_90, %c0_91] : memref<1x32xf32, #tpu.memory_space<vmem>>, vector<1x32xf32>
    %c0_92 = arith.constant 0 : index
    %c0_93 = arith.constant 0 : index
    %206 = vector.load %arg12[%c0_92, %c0_93] : memref<1x32xf32, #tpu.memory_space<vmem>>, vector<1x32xf32>
    %cst_94 = arith.constant dense<0.000000e+00> : vector<64xf32>
    %207 = vector.multi_reduction <add>, %204, %cst_94 [1] : vector<64x32xf32> to vector<64xf32>
    %208 = vector.shape_cast %207 : vector<64xf32> to vector<64x1xf32>
    %cst_95 = arith.constant 3.200000e+01 : f32
    %209 = vector.broadcast %cst_95 : f32 to vector<64x1xf32>
    %210 = arith.divf %208, %209 : vector<64x1xf32>
    %211 = vector.broadcast %210 : vector<64x1xf32> to vector<64x32xf32>
    %212 = arith.subf %204, %211 : vector<64x32xf32>
    %213 = vector.broadcast %210 : vector<64x1xf32> to vector<64x32xf32>
    %214 = arith.subf %204, %213 : vector<64x32xf32>
    %215 = arith.mulf %212, %214 : vector<64x32xf32>
    %cst_96 = arith.constant dense<0.000000e+00> : vector<64xf32>
    %216 = vector.multi_reduction <add>, %215, %cst_96 [1] : vector<64x32xf32> to vector<64xf32>
    %217 = vector.shape_cast %216 : vector<64xf32> to vector<64x1xf32>
    %cst_97 = arith.constant 3.200000e+01 : f32
    %218 = vector.broadcast %cst_97 : f32 to vector<64x1xf32>
    %219 = arith.divf %217, %218 : vector<64x1xf32>
    %220 = vector.broadcast %210 : vector<64x1xf32> to vector<64x32xf32>
    %221 = arith.subf %204, %220 : vector<64x32xf32>
    %cst_98 = arith.constant 9.99999974E-6 : f32
    %222 = vector.broadcast %cst_98 : f32 to vector<64x1xf32>
    %223 = arith.addf %219, %222 : vector<64x1xf32>
    %224 = math.rsqrt %223 : vector<64x1xf32>
    %225 = vector.broadcast %224 : vector<64x1xf32> to vector<64x32xf32>
    %226 = arith.mulf %221, %225 : vector<64x32xf32>
    %227 = vector.broadcast %205 : vector<1x32xf32> to vector<64x32xf32>
    %228 = arith.mulf %226, %227 : vector<64x32xf32>
    %229 = vector.broadcast %206 : vector<1x32xf32> to vector<64x32xf32>
    %230 = arith.addf %228, %229 : vector<64x32xf32>
    %c0_99 = arith.constant 0 : index
    %c0_100 = arith.constant 0 : index
    %231 = vector.load %arg14[%c0_99, %c0_100] : memref<1x32xf32, #tpu.memory_space<vmem>>, vector<1x32xf32>
    %232 = vector.extract_strided_slice %230 {offsets = [0, 0], sizes = [1, 32], strides = [1, 1]} : vector<64x32xf32> to vector<1x32xf32>
    %c0_101 = arith.constant 0 : index
    %c0_102 = arith.constant 0 : index
    %c0_103 = arith.constant 0 : index
    %233 = vector.load %arg13[%c0_101, %c0_102, %c0_103] : memref<5x32x32xbf16, #tpu.memory_space<vmem>>, vector<1x32x32xbf16>
    %234 = vector.shape_cast %233 : vector<1x32x32xbf16> to vector<32x32xbf16>
    %235 = arith.truncf %232 : vector<1x32xf32> to vector<1x32xbf16>
    %cst_104 = arith.constant dense<0.000000e+00> : vector<1x32xf32>
    %236 = tpu.matmul %235, %234, %cst_104 {dimension_numbers = #tpu.dot_dimension_numbers<[1], [0], [0], [1], [0, 0, 1, 1], [], []>} : vector<1x32xbf16>, vector<32x32xbf16>, vector<1x32xf32> -> vector<1x32xf32>
    %237 = arith.addf %231, %236 : vector<1x32xf32>
    %238 = vector.extract_strided_slice %230 {offsets = [1, 0], sizes = [1, 32], strides = [1, 1]} : vector<64x32xf32> to vector<1x32xf32>
    %c1_105 = arith.constant 1 : index
    %c0_106 = arith.constant 0 : index
    %c0_107 = arith.constant 0 : index
    %239 = vector.load %arg13[%c1_105, %c0_106, %c0_107] : memref<5x32x32xbf16, #tpu.memory_space<vmem>>, vector<1x32x32xbf16>
    %240 = vector.shape_cast %239 : vector<1x32x32xbf16> to vector<32x32xbf16>
    %241 = arith.truncf %238 : vector<1x32xf32> to vector<1x32xbf16>
    %cst_108 = arith.constant dense<0.000000e+00> : vector<1x32xf32>
    %242 = tpu.matmul %241, %240, %cst_108 {dimension_numbers = #tpu.dot_dimension_numbers<[1], [0], [0], [1], [0, 0, 1, 1], [], []>} : vector<1x32xbf16>, vector<32x32xbf16>, vector<1x32xf32> -> vector<1x32xf32>
    %243 = arith.addf %237, %242 : vector<1x32xf32>
    %244 = vector.extract_strided_slice %230 {offsets = [2, 0], sizes = [1, 32], strides = [1, 1]} : vector<64x32xf32> to vector<1x32xf32>
    %c2 = arith.constant 2 : index
    %c0_109 = arith.constant 0 : index
    %c0_110 = arith.constant 0 : index
    %245 = vector.load %arg13[%c2, %c0_109, %c0_110] : memref<5x32x32xbf16, #tpu.memory_space<vmem>>, vector<1x32x32xbf16>
    %246 = vector.shape_cast %245 : vector<1x32x32xbf16> to vector<32x32xbf16>
    %247 = arith.truncf %244 : vector<1x32xf32> to vector<1x32xbf16>
    %cst_111 = arith.constant dense<0.000000e+00> : vector<1x32xf32>
    %248 = tpu.matmul %247, %246, %cst_111 {dimension_numbers = #tpu.dot_dimension_numbers<[1], [0], [0], [1], [0, 0, 1, 1], [], []>} : vector<1x32xbf16>, vector<32x32xbf16>, vector<1x32xf32> -> vector<1x32xf32>
    %249 = arith.addf %243, %248 : vector<1x32xf32>
    %250 = vector.extract_strided_slice %230 {offsets = [3, 0], sizes = [1, 32], strides = [1, 1]} : vector<64x32xf32> to vector<1x32xf32>
    %c3 = arith.constant 3 : index
    %c0_112 = arith.constant 0 : index
    %c0_113 = arith.constant 0 : index
    %251 = vector.load %arg13[%c3, %c0_112, %c0_113] : memref<5x32x32xbf16, #tpu.memory_space<vmem>>, vector<1x32x32xbf16>
    %252 = vector.shape_cast %251 : vector<1x32x32xbf16> to vector<32x32xbf16>
    %253 = arith.truncf %250 : vector<1x32xf32> to vector<1x32xbf16>
    %cst_114 = arith.constant dense<0.000000e+00> : vector<1x32xf32>
    %254 = tpu.matmul %253, %252, %cst_114 {dimension_numbers = #tpu.dot_dimension_numbers<[1], [0], [0], [1], [0, 0, 1, 1], [], []>} : vector<1x32xbf16>, vector<32x32xbf16>, vector<1x32xf32> -> vector<1x32xf32>
    %255 = arith.addf %249, %254 : vector<1x32xf32>
    %256 = vector.extract_strided_slice %230 {offsets = [4, 0], sizes = [1, 32], strides = [1, 1]} : vector<64x32xf32> to vector<1x32xf32>
    %c4 = arith.constant 4 : index
    %c0_115 = arith.constant 0 : index
    %c0_116 = arith.constant 0 : index
    %257 = vector.load %arg13[%c4, %c0_115, %c0_116] : memref<5x32x32xbf16, #tpu.memory_space<vmem>>, vector<1x32x32xbf16>
    %258 = vector.shape_cast %257 : vector<1x32x32xbf16> to vector<32x32xbf16>
    %259 = arith.truncf %256 : vector<1x32xf32> to vector<1x32xbf16>
    %cst_117 = arith.constant dense<0.000000e+00> : vector<1x32xf32>
    %260 = tpu.matmul %259, %258, %cst_117 {dimension_numbers = #tpu.dot_dimension_numbers<[1], [0], [0], [1], [0, 0, 1, 1], [], []>} : vector<1x32xbf16>, vector<32x32xbf16>, vector<1x32xf32> -> vector<1x32xf32>
    %261 = arith.addf %255, %260 : vector<1x32xf32>
    %c0_118 = arith.constant 0 : index
    %c0_119 = arith.constant 0 : index
    %c0_120 = arith.constant 0 : index
    %262 = vector.load %arg15[%c0_118, %c0_119, %c0_120] : memref<4x32x32xbf16, #tpu.memory_space<vmem>>, vector<1x32x32xbf16>
    %263 = vector.shape_cast %262 : vector<1x32x32xbf16> to vector<32x32xbf16>
    %264 = arith.truncf %261 : vector<1x32xf32> to vector<1x32xbf16>
    %cst_121 = arith.constant dense<0.000000e+00> : vector<1x32xf32>
    %265 = tpu.matmul %264, %263, %cst_121 {dimension_numbers = #tpu.dot_dimension_numbers<[1], [0], [0], [1], [0, 0, 1, 1], [], []>} : vector<1x32xbf16>, vector<32x32xbf16>, vector<1x32xf32> -> vector<1x32xf32>
    %c0_122 = arith.constant 0 : index
    %c0_123 = arith.constant 0 : index
    %266 = vector.load %arg16[%c0_122, %c0_123] : memref<4x32xf32, #tpu.memory_space<vmem>>, vector<1x32xf32>
    %267 = arith.addf %265, %266 : vector<1x32xf32>
    %c1_124 = arith.constant 1 : index
    %c0_125 = arith.constant 0 : index
    %c0_126 = arith.constant 0 : index
    %268 = vector.load %arg15[%c1_124, %c0_125, %c0_126] : memref<4x32x32xbf16, #tpu.memory_space<vmem>>, vector<1x32x32xbf16>
    %269 = vector.shape_cast %268 : vector<1x32x32xbf16> to vector<32x32xbf16>
    %270 = arith.truncf %230 : vector<64x32xf32> to vector<64x32xbf16>
    %cst_127 = arith.constant dense<0.000000e+00> : vector<64x32xf32>
    %271 = tpu.matmul %270, %269, %cst_127 {dimension_numbers = #tpu.dot_dimension_numbers<[1], [0], [0], [1], [0, 0, 1, 1], [], []>} : vector<64x32xbf16>, vector<32x32xbf16>, vector<64x32xf32> -> vector<64x32xf32>
    %c1_128 = arith.constant 1 : index
    %c0_129 = arith.constant 0 : index
    %272 = vector.load %arg16[%c1_128, %c0_129] : memref<4x32xf32, #tpu.memory_space<vmem>>, vector<1x32xf32>
    %273 = vector.broadcast %272 : vector<1x32xf32> to vector<64x32xf32>
    %274 = arith.addf %271, %273 : vector<64x32xf32>
    %c2_130 = arith.constant 2 : index
    %c0_131 = arith.constant 0 : index
    %c0_132 = arith.constant 0 : index
    %275 = vector.load %arg15[%c2_130, %c0_131, %c0_132] : memref<4x32x32xbf16, #tpu.memory_space<vmem>>, vector<1x32x32xbf16>
    %276 = vector.shape_cast %275 : vector<1x32x32xbf16> to vector<32x32xbf16>
    %277 = arith.truncf %230 : vector<64x32xf32> to vector<64x32xbf16>
    %cst_133 = arith.constant dense<0.000000e+00> : vector<64x32xf32>
    %278 = tpu.matmul %277, %276, %cst_133 {dimension_numbers = #tpu.dot_dimension_numbers<[1], [0], [0], [1], [0, 0, 1, 1], [], []>} : vector<64x32xbf16>, vector<32x32xbf16>, vector<64x32xf32> -> vector<64x32xf32>
    %c2_134 = arith.constant 2 : index
    %c0_135 = arith.constant 0 : index
    %279 = vector.load %arg16[%c2_134, %c0_135] : memref<4x32xf32, #tpu.memory_space<vmem>>, vector<1x32xf32>
    %280 = vector.broadcast %279 : vector<1x32xf32> to vector<64x32xf32>
    %281 = arith.addf %278, %280 : vector<64x32xf32>
    %282 = vector.broadcast %267 : vector<1x32xf32> to vector<64x32xf32>
    %283 = arith.mulf %274, %282 : vector<64x32xf32>
    %c0_136 = arith.constant 0 : index
    %c0_137 = arith.constant 0 : index
    %284 = vector.load %arg17[%c0_136, %c0_137] : memref<32x4xf32, #tpu.memory_space<vmem>>, vector<32x4xf32>
    %cst_138 = arith.constant dense<0.000000e+00> : vector<64x4xf32>
    %285 = tpu.matmul %283, %284, %cst_138 {dimension_numbers = #tpu.dot_dimension_numbers<[1], [0], [0], [1], [0, 0, 1, 1], [], []>} : vector<64x32xf32>, vector<32x4xf32>, vector<64x4xf32> -> vector<64x4xf32>
    %cst_139 = arith.constant 0.353553385 : f32
    %286 = vector.broadcast %cst_139 : f32 to vector<64x4xf32>
    %287 = arith.mulf %285, %286 : vector<64x4xf32>
    %cst_140 = arith.constant dense<0xFF800000> : vector<4xf32>
    %288 = vector.multi_reduction <maximumf>, %287, %cst_140 [0] : vector<64x4xf32> to vector<4xf32>
    %289 = vector.shape_cast %288 : vector<4xf32> to vector<1x4xf32>
    %290 = vector.broadcast %289 : vector<1x4xf32> to vector<64x4xf32>
    %291 = arith.subf %287, %290 : vector<64x4xf32>
    %292 = math.exp %291 : vector<64x4xf32>
    %cst_141 = arith.constant dense<0.000000e+00> : vector<4xf32>
    %293 = vector.multi_reduction <add>, %292, %cst_141 [0] : vector<64x4xf32> to vector<4xf32>
    %294 = vector.shape_cast %293 : vector<4xf32> to vector<1x4xf32>
    %295 = vector.broadcast %294 : vector<1x4xf32> to vector<64x4xf32>
    %296 = arith.divf %292, %295 : vector<64x4xf32>
    %c0_142 = arith.constant 0 : index
    %c0_143 = arith.constant 0 : index
    %297 = vector.load %arg18[%c0_142, %c0_143] : memref<4x32xf32, #tpu.memory_space<vmem>>, vector<4x32xf32>
    %cst_144 = arith.constant dense<0.000000e+00> : vector<64x32xf32>
    %298 = tpu.matmul %296, %297, %cst_144 {dimension_numbers = #tpu.dot_dimension_numbers<[1], [0], [0], [1], [0, 0, 1, 1], [], []>} : vector<64x4xf32>, vector<4x32xf32>, vector<64x32xf32> -> vector<64x32xf32>
    %299 = arith.mulf %298, %281 : vector<64x32xf32>
    %cst_145 = arith.constant dense<0.000000e+00> : vector<32xf32>
    %300 = vector.multi_reduction <add>, %299, %cst_145 [0] : vector<64x32xf32> to vector<32xf32>
    %301 = vector.shape_cast %300 : vector<32xf32> to vector<1x32xf32>
    %c3_146 = arith.constant 3 : index
    %c0_147 = arith.constant 0 : index
    %c0_148 = arith.constant 0 : index
    %302 = vector.load %arg15[%c3_146, %c0_147, %c0_148] : memref<4x32x32xbf16, #tpu.memory_space<vmem>>, vector<1x32x32xbf16>
    %303 = vector.shape_cast %302 : vector<1x32x32xbf16> to vector<32x32xbf16>
    %304 = arith.truncf %301 : vector<1x32xf32> to vector<1x32xbf16>
    %cst_149 = arith.constant dense<0.000000e+00> : vector<1x32xf32>
    %305 = tpu.matmul %304, %303, %cst_149 {dimension_numbers = #tpu.dot_dimension_numbers<[1], [0], [0], [1], [0, 0, 1, 1], [], []>} : vector<1x32xbf16>, vector<32x32xbf16>, vector<1x32xf32> -> vector<1x32xf32>
    %306 = vector.broadcast %305 : vector<1x32xf32> to vector<64x32xf32>
    %307 = arith.addf %230, %306 : vector<64x32xf32>
    %c3_150 = arith.constant 3 : index
    %c0_151 = arith.constant 0 : index
    %308 = vector.load %arg16[%c3_150, %c0_151] : memref<4x32xf32, #tpu.memory_space<vmem>>, vector<1x32xf32>
    %309 = vector.broadcast %308 : vector<1x32xf32> to vector<64x32xf32>
    %310 = arith.addf %307, %309 : vector<64x32xf32>
    %c0_152 = arith.constant 0 : index
    %c0_153 = arith.constant 0 : index
    %c0_154 = arith.constant 0 : index
    %311 = vector.load %arg19[%c0_152, %c0_153, %c0_154] : memref<4x64x64xbf16, #tpu.memory_space<vmem>>, vector<1x64x64xbf16>
    %312 = vector.shape_cast %311 : vector<1x64x64xbf16> to vector<64x64xbf16>
    %313 = arith.truncf %310 : vector<64x32xf32> to vector<64x32xbf16>
    %cst_155 = arith.constant dense<0.000000e+00> : vector<32x64xf32>
    %314 = tpu.matmul %313, %312, %cst_155 {dimension_numbers = #tpu.dot_dimension_numbers<[0], [0], [1], [1], [0, 1, 1, 1], [], []>} : vector<64x32xbf16>, vector<64x64xbf16>, vector<32x64xf32> -> vector<32x64xf32>
    %c0_156 = arith.constant 0 : index
    %c0_157 = arith.constant 0 : index
    %315 = vector.load %arg20[%c0_156, %c0_157] : memref<3x64xf32, #tpu.memory_space<vmem>>, vector<1x64xf32>
    %316 = vector.broadcast %315 : vector<1x64xf32> to vector<32x64xf32>
    %317 = arith.addf %314, %316 : vector<32x64xf32>
    %c1_158 = arith.constant 1 : index
    %c0_159 = arith.constant 0 : index
    %c0_160 = arith.constant 0 : index
    %318 = vector.load %arg19[%c1_158, %c0_159, %c0_160] : memref<4x64x64xbf16, #tpu.memory_space<vmem>>, vector<1x64x64xbf16>
    %319 = vector.shape_cast %318 : vector<1x64x64xbf16> to vector<64x64xbf16>
    %320 = arith.truncf %310 : vector<64x32xf32> to vector<64x32xbf16>
    %cst_161 = arith.constant dense<0.000000e+00> : vector<32x64xf32>
    %321 = tpu.matmul %320, %319, %cst_161 {dimension_numbers = #tpu.dot_dimension_numbers<[0], [0], [1], [1], [0, 1, 1, 1], [], []>} : vector<64x32xbf16>, vector<64x64xbf16>, vector<32x64xf32> -> vector<32x64xf32>
    %c1_162 = arith.constant 1 : index
    %c0_163 = arith.constant 0 : index
    %322 = vector.load %arg20[%c1_162, %c0_163] : memref<3x64xf32, #tpu.memory_space<vmem>>, vector<1x64xf32>
    %323 = vector.broadcast %322 : vector<1x64xf32> to vector<32x64xf32>
    %324 = arith.addf %321, %323 : vector<32x64xf32>
    %c2_164 = arith.constant 2 : index
    %c0_165 = arith.constant 0 : index
    %c0_166 = arith.constant 0 : index
    %325 = vector.load %arg19[%c2_164, %c0_165, %c0_166] : memref<4x64x64xbf16, #tpu.memory_space<vmem>>, vector<1x64x64xbf16>
    %326 = vector.shape_cast %325 : vector<1x64x64xbf16> to vector<64x64xbf16>
    %327 = arith.truncf %310 : vector<64x32xf32> to vector<64x32xbf16>
    %cst_167 = arith.constant dense<0.000000e+00> : vector<32x64xf32>
    %328 = tpu.matmul %327, %326, %cst_167 {dimension_numbers = #tpu.dot_dimension_numbers<[0], [0], [1], [1], [0, 1, 1, 1], [], []>} : vector<64x32xbf16>, vector<64x64xbf16>, vector<32x64xf32> -> vector<32x64xf32>
    %c2_168 = arith.constant 2 : index
    %c0_169 = arith.constant 0 : index
    %329 = vector.load %arg20[%c2_168, %c0_169] : memref<3x64xf32, #tpu.memory_space<vmem>>, vector<1x64xf32>
    %330 = vector.broadcast %329 : vector<1x64xf32> to vector<32x64xf32>
    %331 = arith.addf %328, %330 : vector<32x64xf32>
    %cst_170 = arith.constant dense<0.000000e+00> : vector<32x32xf32>
    %332 = tpu.matmul %317, %324, %cst_170 {dimension_numbers = #tpu.dot_dimension_numbers<[1], [1], [0], [0], [0, 0, 1, 0], [], []>} : vector<32x64xf32>, vector<32x64xf32>, vector<32x32xf32> -> vector<32x32xf32>
    %cst_171 = arith.constant 1.250000e-01 : f32
    %333 = vector.broadcast %cst_171 : f32 to vector<32x32xf32>
    %334 = arith.mulf %332, %333 : vector<32x32xf32>
    %cst_172 = arith.constant dense<0xFF800000> : vector<32xf32>
    %335 = vector.multi_reduction <maximumf>, %334, %cst_172 [1] : vector<32x32xf32> to vector<32xf32>
    %336 = vector.shape_cast %335 : vector<32xf32> to vector<32x1xf32>
    %337 = vector.broadcast %336 : vector<32x1xf32> to vector<32x32xf32>
    %338 = arith.subf %334, %337 : vector<32x32xf32>
    %339 = math.exp %338 : vector<32x32xf32>
    %cst_173 = arith.constant dense<0.000000e+00> : vector<32xf32>
    %340 = vector.multi_reduction <add>, %339, %cst_173 [1] : vector<32x32xf32> to vector<32xf32>
    %341 = vector.shape_cast %340 : vector<32xf32> to vector<32x1xf32>
    %342 = vector.broadcast %341 : vector<32x1xf32> to vector<32x32xf32>
    %343 = arith.divf %339, %342 : vector<32x32xf32>
    %cst_174 = arith.constant dense<0.000000e+00> : vector<32x64xf32>
    %344 = tpu.matmul %343, %331, %cst_174 {dimension_numbers = #tpu.dot_dimension_numbers<[1], [0], [0], [1], [0, 0, 1, 1], [], []>} : vector<32x32xf32>, vector<32x64xf32>, vector<32x64xf32> -> vector<32x64xf32>
    %c3_175 = arith.constant 3 : index
    %c0_176 = arith.constant 0 : index
    %c0_177 = arith.constant 0 : index
    %345 = vector.load %arg19[%c3_175, %c0_176, %c0_177] : memref<4x64x64xbf16, #tpu.memory_space<vmem>>, vector<1x64x64xbf16>
    %346 = vector.shape_cast %345 : vector<1x64x64xbf16> to vector<64x64xbf16>
    %347 = arith.truncf %344 : vector<32x64xf32> to vector<32x64xbf16>
    %cst_178 = arith.constant dense<0.000000e+00> : vector<64x32xf32>
    %348 = tpu.matmul %346, %347, %cst_178 {dimension_numbers = #tpu.dot_dimension_numbers<[1], [1], [0], [0], [0, 0, 1, 0], [], []>} : vector<64x64xbf16>, vector<32x64xbf16>, vector<64x32xf32> -> vector<64x32xf32>
    %349 = arith.addf %310, %348 : vector<64x32xf32>
    %c0_179 = arith.constant 0 : index
    %c0_180 = arith.constant 0 : index
    %350 = vector.load %arg21[%c0_179, %c0_180] : memref<64x1xf32, #tpu.memory_space<vmem>>, vector<64x1xf32>
    %351 = vector.broadcast %350 : vector<64x1xf32> to vector<64x32xf32>
    %352 = arith.addf %349, %351 : vector<64x32xf32>
    %c0_181 = arith.constant 0 : index
    %c0_182 = arith.constant 0 : index
    %353 = vector.load %arg23[%c0_181, %c0_182] : memref<144x64xbf16, #tpu.memory_space<vmem>>, vector<144x64xbf16>
    %354 = arith.truncf %352 : vector<64x32xf32> to vector<64x32xbf16>
    %cst_183 = arith.constant dense<0.000000e+00> : vector<144x32xf32>
    %355 = tpu.matmul %353, %354, %cst_183 {dimension_numbers = #tpu.dot_dimension_numbers<[1], [0], [0], [1], [0, 0, 1, 1], [], []>} : vector<144x64xbf16>, vector<64x32xbf16>, vector<144x32xf32> -> vector<144x32xf32>
    %356 = vector.extract_strided_slice %355 {offsets = [0, 0], sizes = [16, 32], strides = [1, 1]} : vector<144x32xf32> to vector<16x32xf32>
    %c0_184 = arith.constant 0 : index
    %c0_185 = arith.constant 0 : index
    %c0_186 = arith.constant 0 : index
    %357 = vector.load %arg22[%c0_184, %c0_185, %c0_186] : memref<9x32x32xbf16, #tpu.memory_space<vmem>>, vector<1x32x32xbf16>
    %358 = vector.shape_cast %357 : vector<1x32x32xbf16> to vector<32x32xbf16>
    %359 = arith.truncf %356 : vector<16x32xf32> to vector<16x32xbf16>
    %cst_187 = arith.constant dense<0.000000e+00> : vector<16x32xf32>
    %360 = tpu.matmul %359, %358, %cst_187 {dimension_numbers = #tpu.dot_dimension_numbers<[1], [0], [0], [1], [0, 0, 1, 1], [], []>} : vector<16x32xbf16>, vector<32x32xbf16>, vector<16x32xf32> -> vector<16x32xf32>
    %361 = vector.extract_strided_slice %355 {offsets = [16, 0], sizes = [16, 32], strides = [1, 1]} : vector<144x32xf32> to vector<16x32xf32>
    %c1_188 = arith.constant 1 : index
    %c0_189 = arith.constant 0 : index
    %c0_190 = arith.constant 0 : index
    %362 = vector.load %arg22[%c1_188, %c0_189, %c0_190] : memref<9x32x32xbf16, #tpu.memory_space<vmem>>, vector<1x32x32xbf16>
    %363 = vector.shape_cast %362 : vector<1x32x32xbf16> to vector<32x32xbf16>
    %364 = arith.truncf %361 : vector<16x32xf32> to vector<16x32xbf16>
    %cst_191 = arith.constant dense<0.000000e+00> : vector<16x32xf32>
    %365 = tpu.matmul %364, %363, %cst_191 {dimension_numbers = #tpu.dot_dimension_numbers<[1], [0], [0], [1], [0, 0, 1, 1], [], []>} : vector<16x32xbf16>, vector<32x32xbf16>, vector<16x32xf32> -> vector<16x32xf32>
    %366 = arith.addf %360, %365 : vector<16x32xf32>
    %367 = vector.extract_strided_slice %355 {offsets = [32, 0], sizes = [16, 32], strides = [1, 1]} : vector<144x32xf32> to vector<16x32xf32>
    %c2_192 = arith.constant 2 : index
    %c0_193 = arith.constant 0 : index
    %c0_194 = arith.constant 0 : index
    %368 = vector.load %arg22[%c2_192, %c0_193, %c0_194] : memref<9x32x32xbf16, #tpu.memory_space<vmem>>, vector<1x32x32xbf16>
    %369 = vector.shape_cast %368 : vector<1x32x32xbf16> to vector<32x32xbf16>
    %370 = arith.truncf %367 : vector<16x32xf32> to vector<16x32xbf16>
    %cst_195 = arith.constant dense<0.000000e+00> : vector<16x32xf32>
    %371 = tpu.matmul %370, %369, %cst_195 {dimension_numbers = #tpu.dot_dimension_numbers<[1], [0], [0], [1], [0, 0, 1, 1], [], []>} : vector<16x32xbf16>, vector<32x32xbf16>, vector<16x32xf32> -> vector<16x32xf32>
    %372 = arith.addf %366, %371 : vector<16x32xf32>
    %373 = vector.extract_strided_slice %355 {offsets = [48, 0], sizes = [16, 32], strides = [1, 1]} : vector<144x32xf32> to vector<16x32xf32>
    %c3_196 = arith.constant 3 : index
    %c0_197 = arith.constant 0 : index
    %c0_198 = arith.constant 0 : index
    %374 = vector.load %arg22[%c3_196, %c0_197, %c0_198] : memref<9x32x32xbf16, #tpu.memory_space<vmem>>, vector<1x32x32xbf16>
    %375 = vector.shape_cast %374 : vector<1x32x32xbf16> to vector<32x32xbf16>
    %376 = arith.truncf %373 : vector<16x32xf32> to vector<16x32xbf16>
    %cst_199 = arith.constant dense<0.000000e+00> : vector<16x32xf32>
    %377 = tpu.matmul %376, %375, %cst_199 {dimension_numbers = #tpu.dot_dimension_numbers<[1], [0], [0], [1], [0, 0, 1, 1], [], []>} : vector<16x32xbf16>, vector<32x32xbf16>, vector<16x32xf32> -> vector<16x32xf32>
    %378 = arith.addf %372, %377 : vector<16x32xf32>
    %379 = vector.extract_strided_slice %355 {offsets = [64, 0], sizes = [16, 32], strides = [1, 1]} : vector<144x32xf32> to vector<16x32xf32>
    %c4_200 = arith.constant 4 : index
    %c0_201 = arith.constant 0 : index
    %c0_202 = arith.constant 0 : index
    %380 = vector.load %arg22[%c4_200, %c0_201, %c0_202] : memref<9x32x32xbf16, #tpu.memory_space<vmem>>, vector<1x32x32xbf16>
    %381 = vector.shape_cast %380 : vector<1x32x32xbf16> to vector<32x32xbf16>
    %382 = arith.truncf %379 : vector<16x32xf32> to vector<16x32xbf16>
    %cst_203 = arith.constant dense<0.000000e+00> : vector<16x32xf32>
    %383 = tpu.matmul %382, %381, %cst_203 {dimension_numbers = #tpu.dot_dimension_numbers<[1], [0], [0], [1], [0, 0, 1, 1], [], []>} : vector<16x32xbf16>, vector<32x32xbf16>, vector<16x32xf32> -> vector<16x32xf32>
    %384 = arith.addf %378, %383 : vector<16x32xf32>
    %385 = vector.extract_strided_slice %355 {offsets = [80, 0], sizes = [16, 32], strides = [1, 1]} : vector<144x32xf32> to vector<16x32xf32>
    %c5 = arith.constant 5 : index
    %c0_204 = arith.constant 0 : index
    %c0_205 = arith.constant 0 : index
    %386 = vector.load %arg22[%c5, %c0_204, %c0_205] : memref<9x32x32xbf16, #tpu.memory_space<vmem>>, vector<1x32x32xbf16>
    %387 = vector.shape_cast %386 : vector<1x32x32xbf16> to vector<32x32xbf16>
    %388 = arith.truncf %385 : vector<16x32xf32> to vector<16x32xbf16>
    %cst_206 = arith.constant dense<0.000000e+00> : vector<16x32xf32>
    %389 = tpu.matmul %388, %387, %cst_206 {dimension_numbers = #tpu.dot_dimension_numbers<[1], [0], [0], [1], [0, 0, 1, 1], [], []>} : vector<16x32xbf16>, vector<32x32xbf16>, vector<16x32xf32> -> vector<16x32xf32>
    %390 = arith.addf %384, %389 : vector<16x32xf32>
    %391 = vector.extract_strided_slice %355 {offsets = [96, 0], sizes = [16, 32], strides = [1, 1]} : vector<144x32xf32> to vector<16x32xf32>
    %c6 = arith.constant 6 : index
    %c0_207 = arith.constant 0 : index
    %c0_208 = arith.constant 0 : index
    %392 = vector.load %arg22[%c6, %c0_207, %c0_208] : memref<9x32x32xbf16, #tpu.memory_space<vmem>>, vector<1x32x32xbf16>
    %393 = vector.shape_cast %392 : vector<1x32x32xbf16> to vector<32x32xbf16>
    %394 = arith.truncf %391 : vector<16x32xf32> to vector<16x32xbf16>
    %cst_209 = arith.constant dense<0.000000e+00> : vector<16x32xf32>
    %395 = tpu.matmul %394, %393, %cst_209 {dimension_numbers = #tpu.dot_dimension_numbers<[1], [0], [0], [1], [0, 0, 1, 1], [], []>} : vector<16x32xbf16>, vector<32x32xbf16>, vector<16x32xf32> -> vector<16x32xf32>
    %396 = arith.addf %390, %395 : vector<16x32xf32>
    %397 = vector.extract_strided_slice %355 {offsets = [112, 0], sizes = [16, 32], strides = [1, 1]} : vector<144x32xf32> to vector<16x32xf32>
    %c7 = arith.constant 7 : index
    %c0_210 = arith.constant 0 : index
    %c0_211 = arith.constant 0 : index
    %398 = vector.load %arg22[%c7, %c0_210, %c0_211] : memref<9x32x32xbf16, #tpu.memory_space<vmem>>, vector<1x32x32xbf16>
    %399 = vector.shape_cast %398 : vector<1x32x32xbf16> to vector<32x32xbf16>
    %400 = arith.truncf %397 : vector<16x32xf32> to vector<16x32xbf16>
    %cst_212 = arith.constant dense<0.000000e+00> : vector<16x32xf32>
    %401 = tpu.matmul %400, %399, %cst_212 {dimension_numbers = #tpu.dot_dimension_numbers<[1], [0], [0], [1], [0, 0, 1, 1], [], []>} : vector<16x32xbf16>, vector<32x32xbf16>, vector<16x32xf32> -> vector<16x32xf32>
    %402 = arith.addf %396, %401 : vector<16x32xf32>
    %403 = vector.extract_strided_slice %355 {offsets = [128, 0], sizes = [16, 32], strides = [1, 1]} : vector<144x32xf32> to vector<16x32xf32>
    %c8 = arith.constant 8 : index
    %c0_213 = arith.constant 0 : index
    %c0_214 = arith.constant 0 : index
    %404 = vector.load %arg22[%c8, %c0_213, %c0_214] : memref<9x32x32xbf16, #tpu.memory_space<vmem>>, vector<1x32x32xbf16>
    %405 = vector.shape_cast %404 : vector<1x32x32xbf16> to vector<32x32xbf16>
    %406 = arith.truncf %403 : vector<16x32xf32> to vector<16x32xbf16>
    %cst_215 = arith.constant dense<0.000000e+00> : vector<16x32xf32>
    %407 = tpu.matmul %406, %405, %cst_215 {dimension_numbers = #tpu.dot_dimension_numbers<[1], [0], [0], [1], [0, 0, 1, 1], [], []>} : vector<16x32xbf16>, vector<32x32xbf16>, vector<16x32xf32> -> vector<16x32xf32>
    %408 = arith.addf %402, %407 : vector<16x32xf32>
    %c0_216 = arith.constant 0 : index
    %c0_217 = arith.constant 0 : index
    %409 = vector.load %arg24[%c0_216, %c0_217] : memref<1x32xf32, #tpu.memory_space<vmem>>, vector<1x32xf32>
    %c0_218 = arith.constant 0 : index
    %c0_219 = arith.constant 0 : index
    %410 = vector.load %arg25[%c0_218, %c0_219] : memref<1x32xf32, #tpu.memory_space<vmem>>, vector<1x32xf32>
    %cst_220 = arith.constant dense<0.000000e+00> : vector<16xf32>
    %411 = vector.multi_reduction <add>, %408, %cst_220 [1] : vector<16x32xf32> to vector<16xf32>
    %412 = vector.shape_cast %411 : vector<16xf32> to vector<16x1xf32>
    %cst_221 = arith.constant 3.200000e+01 : f32
    %413 = vector.broadcast %cst_221 : f32 to vector<16x1xf32>
    %414 = arith.divf %412, %413 : vector<16x1xf32>
    %415 = vector.broadcast %414 : vector<16x1xf32> to vector<16x32xf32>
    %416 = arith.subf %408, %415 : vector<16x32xf32>
    %417 = vector.broadcast %414 : vector<16x1xf32> to vector<16x32xf32>
    %418 = arith.subf %408, %417 : vector<16x32xf32>
    %419 = arith.mulf %416, %418 : vector<16x32xf32>
    %cst_222 = arith.constant dense<0.000000e+00> : vector<16xf32>
    %420 = vector.multi_reduction <add>, %419, %cst_222 [1] : vector<16x32xf32> to vector<16xf32>
    %421 = vector.shape_cast %420 : vector<16xf32> to vector<16x1xf32>
    %cst_223 = arith.constant 3.200000e+01 : f32
    %422 = vector.broadcast %cst_223 : f32 to vector<16x1xf32>
    %423 = arith.divf %421, %422 : vector<16x1xf32>
    %424 = vector.broadcast %414 : vector<16x1xf32> to vector<16x32xf32>
    %425 = arith.subf %408, %424 : vector<16x32xf32>
    %cst_224 = arith.constant 9.99999974E-6 : f32
    %426 = vector.broadcast %cst_224 : f32 to vector<16x1xf32>
    %427 = arith.addf %423, %426 : vector<16x1xf32>
    %428 = math.rsqrt %427 : vector<16x1xf32>
    %429 = vector.broadcast %428 : vector<16x1xf32> to vector<16x32xf32>
    %430 = arith.mulf %425, %429 : vector<16x32xf32>
    %431 = vector.broadcast %409 : vector<1x32xf32> to vector<16x32xf32>
    %432 = arith.mulf %430, %431 : vector<16x32xf32>
    %433 = vector.broadcast %410 : vector<1x32xf32> to vector<16x32xf32>
    %434 = arith.addf %432, %433 : vector<16x32xf32>
    %435 = tpu.transpose %434, [1, 0] : vector<16x32xf32> -> vector<32x16xf32>
    %c0_225 = arith.constant 0 : index
    %c0_226 = arith.constant 0 : index
    %c0_227 = arith.constant 0 : index
    %436 = vector.load %arg26[%c0_225, %c0_226, %c0_227] : memref<1x32x16xf32, #tpu.memory_space<vmem>>, vector<1x32x16xf32>
    %437 = vector.shape_cast %436 : vector<1x32x16xf32> to vector<32x16xf32>
    %438 = vector.shape_cast %435 : vector<32x16xf32> to vector<1x32x16xf32>
    tpu.vector_store %arg26[%c0_225, %c0_226, %c0_227], %438 {strides = array<i32>} : memref<1x32x16xf32, #tpu.memory_space<vmem>>, vector<1x32x16xf32>,
    return
  }
  func.func @transform_0(%arg0: i32) -> (i32, i32, i32) {
    %c0_i32 = arith.constant 0 : i32
    %c0_i32_0 = arith.constant 0 : i32
    %c0_i32_1 = arith.constant 0 : i32
    return %arg0, %c0_i32, %c0_i32_0 : i32, i32, i32
  }
  func.func @transform_1(%arg0: i32) -> (i32, i32) {
    %c0_i32 = arith.constant 0 : i32
    %c0_i32_0 = arith.constant 0 : i32
    %c0_i32_1 = arith.constant 0 : i32
    return %c0_i32, %c0_i32_0 : i32, i32
  }
  func.func @transform_2(%arg0: i32) -> (i32, i32, i32) {
    %c0_i32 = arith.constant 0 : i32
    %c0_i32_0 = arith.constant 0 : i32
    %c0_i32_1 = arith.constant 0 : i32
    %c0_i32_2 = arith.constant 0 : i32
    return %c0_i32, %c0_i32_0, %c0_i32_1 : i32, i32, i32
  }
  func.func @transform_3(%arg0: i32) -> (i32, i32, i32) {
    %c0_i32 = arith.constant 0 : i32
    %c0_i32_0 = arith.constant 0 : i32
    %c0_i32_1 = arith.constant 0 : i32
    %c0_i32_2 = arith.constant 0 : i32
    return %c0_i32, %c0_i32_0, %c0_i32_1 : i32, i32, i32
  }
  func.func @transform_4(%arg0: i32) -> (i32, i32, i32) {
    %c0_i32 = arith.constant 0 : i32
    %c0_i32_0 = arith.constant 0 : i32
    %c0_i32_1 = arith.constant 0 : i32
    %c0_i32_2 = arith.constant 0 : i32
    return %c0_i32, %c0_i32_0, %c0_i32_1 : i32, i32, i32
  }
  func.func @transform_5(%arg0: i32) -> (i32, i32, i32) {
    %c0_i32 = arith.constant 0 : i32
    %c0_i32_0 = arith.constant 0 : i32
    %c0_i32_1 = arith.constant 0 : i32
    %c0_i32_2 = arith.constant 0 : i32
    return %c0_i32, %c0_i32_0, %c0_i32_1 : i32, i32, i32
  }
  func.func @transform_6(%arg0: i32) -> (i32, i32, i32) {
    %c0_i32 = arith.constant 0 : i32
    %c0_i32_0 = arith.constant 0 : i32
    %c0_i32_1 = arith.constant 0 : i32
    %c0_i32_2 = arith.constant 0 : i32
    return %c0_i32, %c0_i32_0, %c0_i32_1 : i32, i32, i32
  }
  func.func @transform_7(%arg0: i32) -> (i32, i32, i32) {
    %c0_i32 = arith.constant 0 : i32
    %c0_i32_0 = arith.constant 0 : i32
    %c0_i32_1 = arith.constant 0 : i32
    %c0_i32_2 = arith.constant 0 : i32
    return %c0_i32, %c0_i32_0, %c0_i32_1 : i32, i32, i32
  }
  func.func @transform_8(%arg0: i32) -> (i32, i32, i32) {
    %c0_i32 = arith.constant 0 : i32
    %c0_i32_0 = arith.constant 0 : i32
    %c0_i32_1 = arith.constant 0 : i32
    %c0_i32_2 = arith.constant 0 : i32
    return %c0_i32, %c0_i32_0, %c0_i32_1 : i32, i32, i32
  }
  func.func @transform_9(%arg0: i32) -> (i32, i32, i32) {
    %c0_i32 = arith.constant 0 : i32
    %c0_i32_0 = arith.constant 0 : i32
    %c0_i32_1 = arith.constant 0 : i32
    %c0_i32_2 = arith.constant 0 : i32
    return %c0_i32, %c0_i32_0, %c0_i32_1 : i32, i32, i32
  }
  func.func @transform_10(%arg0: i32) -> (i32, i32) {
    %c0_i32 = arith.constant 0 : i32
    %c0_i32_0 = arith.constant 0 : i32
    %c0_i32_1 = arith.constant 0 : i32
    return %c0_i32, %c0_i32_0 : i32, i32
  }
  func.func @transform_11(%arg0: i32) -> (i32, i32) {
    %c0_i32 = arith.constant 0 : i32
    %c0_i32_0 = arith.constant 0 : i32
    %c0_i32_1 = arith.constant 0 : i32
    return %c0_i32, %c0_i32_0 : i32, i32
  }
  func.func @transform_12(%arg0: i32) -> (i32, i32, i32) {
    %c0_i32 = arith.constant 0 : i32
    %c0_i32_0 = arith.constant 0 : i32
    %c0_i32_1 = arith.constant 0 : i32
    %c0_i32_2 = arith.constant 0 : i32
    return %c0_i32, %c0_i32_0, %c0_i32_1 : i32, i32, i32
  }
  func.func @transform_13(%arg0: i32) -> (i32, i32) {
    %c0_i32 = arith.constant 0 : i32
    %c0_i32_0 = arith.constant 0 : i32
    %c0_i32_1 = arith.constant 0 : i32
    return %c0_i32, %c0_i32_0 : i32, i32
  }
  func.func @transform_14(%arg0: i32) -> (i32, i32, i32) {
    %c0_i32 = arith.constant 0 : i32
    %c0_i32_0 = arith.constant 0 : i32
    %c0_i32_1 = arith.constant 0 : i32
    %c0_i32_2 = arith.constant 0 : i32
    return %c0_i32, %c0_i32_0, %c0_i32_1 : i32, i32, i32
  }
  func.func @transform_15(%arg0: i32) -> (i32, i32) {
    %c0_i32 = arith.constant 0 : i32
    %c0_i32_0 = arith.constant 0 : i32
    %c0_i32_1 = arith.constant 0 : i32
    return %c0_i32, %c0_i32_0 : i32, i32
  }
  func.func @transform_16(%arg0: i32) -> (i32, i32) {
    %c0_i32 = arith.constant 0 : i32
    %c0_i32_0 = arith.constant 0 : i32
    %c0_i32_1 = arith.constant 0 : i32
    return %c0_i32, %c0_i32_0 : i32, i32
  }
  func.func @transform_17(%arg0: i32) -> (i32, i32) {
    %c0_i32 = arith.constant 0 : i32
    %c0_i32_0 = arith.constant 0 : i32
    %c0_i32_1 = arith.constant 0 : i32
    return %c0_i32, %c0_i32_0 : i32, i32
  }
  func.func @transform_18(%arg0: i32) -> (i32, i32, i32) {
    %c0_i32 = arith.constant 0 : i32
    %c0_i32_0 = arith.constant 0 : i32
    %c0_i32_1 = arith.constant 0 : i32
    %c0_i32_2 = arith.constant 0 : i32
    return %c0_i32, %c0_i32_0, %c0_i32_1 : i32, i32, i32
  }
  func.func @transform_19(%arg0: i32) -> (i32, i32) {
    %c0_i32 = arith.constant 0 : i32
    %c0_i32_0 = arith.constant 0 : i32
    %c0_i32_1 = arith.constant 0 : i32
    return %c0_i32, %c0_i32_0 : i32, i32
  }
  func.func @transform_20(%arg0: i32) -> (i32, i32) {
    %c0_i32 = arith.constant 0 : i32
    %c0_i32_0 = arith.constant 0 : i32
    %c0_i32_1 = arith.constant 0 : i32
    return %c0_i32, %c0_i32_0 : i32, i32
  }
  func.func @transform_21(%arg0: i32) -> (i32, i32, i32) {
    %c0_i32 = arith.constant 0 : i32
    %c0_i32_0 = arith.constant 0 : i32
    %c0_i32_1 = arith.constant 0 : i32
    %c0_i32_2 = arith.constant 0 : i32
    return %c0_i32, %c0_i32_0, %c0_i32_1 : i32, i32, i32
  }
  func.func @transform_22(%arg0: i32) -> (i32, i32) {
    %c0_i32 = arith.constant 0 : i32
    %c0_i32_0 = arith.constant 0 : i32
    %c0_i32_1 = arith.constant 0 : i32
    return %c0_i32, %c0_i32_0 : i32, i32
  }
  func.func @transform_23(%arg0: i32) -> (i32, i32) {
    %c0_i32 = arith.constant 0 : i32
    %c0_i32_0 = arith.constant 0 : i32
    %c0_i32_1 = arith.constant 0 : i32
    return %c0_i32, %c0_i32_0 : i32, i32
  }
  func.func @transform_24(%arg0: i32) -> (i32, i32) {
    %c0_i32 = arith.constant 0 : i32
    %c0_i32_0 = arith.constant 0 : i32
    %c0_i32_1 = arith.constant 0 : i32
    return %c0_i32, %c0_i32_0 : i32, i32
  }
  func.func @transform_25(%arg0: i32) -> (i32, i32, i32) {
    %c0_i32 = arith.constant 0 : i32
    %c0_i32_0 = arith.constant 0 : i32
    %c0_i32_1 = arith.constant 0 : i32
    return %arg0, %c0_i32, %c0_i32_0 : i32, i32, i32
  }
}

</mosaic_0001>

<bundles_post_ra>
// kernel: basic_block_v1_forward.1
= control target key start
LH: loop header
LB: loop body
LE: loop exit
PB: predicated region body
PF: predicated region fallthrough
CT: control target
= control target key end

     0   :  { %s6122_s29 = smov 0   ;;  %s7345_s0 = inlined_call_operand.vmem [shape: f32[2,32,64], index: 0, kind: input, shape index: {}]   ;;  %s7346_s1 = inlined_call_operand.vmem [shape: f32[64,32], index: 1, kind: input, shape index: {}]   ;;  %s7347_s2 = inlined_call_operand.vmem [shape: f32[2,1,32], index: 2, kind: input, shape index: {}]   ;;  %s7348_s3 = inlined_call_operand.vmem [shape: f32[2,1,32], index: 3, kind: input, shape index: {}]   ;;  %s7349_s4 = inlined_call_operand.vmem [shape: bf16[2,64,32], index: 4, kind: input, shape index: {}]   ;;  %s7350_s5 = inlined_call_operand.vmem [shape: f32[2,1,32], index: 5, kind: input, shape index: {}]   ;;  %s7351_s6 = inlined_call_operand.vmem [shape: f32[2,1,32], index: 6, kind: input, shape index: {}]   ;;  %s7352_s7 = inlined_call_operand.vmem [shape: f32[2,1,32], index: 7, kind: input, shape index: {}]   ;;  %s7353_s8 = inlined_call_operand.vmem [shape: bf16[2,64,32], index: 8, kind: input, shape index: {}]   ;;  %s7354_s9 = inlined_call_operand.vmem [shape: f32[2,64,1], index: 9, kind: input, shape index: {}]   ;;  %s7355_s10 = inlined_call_operand.vmem [shape: f32[1,32], index: 10, kind: input, shape index: {}]   ;;  %s7356_s11 = inlined_call_operand.vmem [shape: f32[1,32], index: 11, kind: input, shape index: {}]   ;;  %s7357_s12 = inlined_call_operand.vmem [shape: bf16[5,32,32], index: 12, kind: input, shape index: {}]   ;;  %s7358_s13 = inlined_call_operand.vmem [shape: f32[1,32], index: 13, kind: input, shape index: {}]   ;;  %s7359_s14 = inlined_call_operand.vmem [shape: bf16[4,32,32], index: 14, kind: input, shape index: {}]   ;;  %s7360_s15 = inlined_call_operand.vmem [shape: f32[4,32], index: 15, kind: input, shape index: {}]   ;;  %s7361_s16 = inlined_call_operand.vmem [shape: f32[32,4], index: 16, kind: input, shape index: {}]   ;;  %s7362_s17 = inlined_call_operand.vmem [shape: f32[4,32], index: 17, kind: input, shape index: {}]   ;;  %s7363_s18 = inlined_call_operand.vmem [shape: bf16[4,64,64], index: 18, kind: input, shape index: {}]   ;;  %s7364_s19 = inlined_call_operand.vmem [shape: f32[3,64], index: 19, kind: input, shape index: {}]   ;;  %s7365_s20 = inlined_call_operand.vmem [shape: f32[64,1], index: 20, kind: input, shape index: {}]   ;;  %s7366_s21 = inlined_call_operand.vmem [shape: bf16[9,32,32], index: 21, kind: input, shape index: {}]   ;;  %s7367_s22 = inlined_call_operand.vmem [shape: bf16[144,64], index: 22, kind: input, shape index: {}]   ;;  %s7368_s23 = inlined_call_operand.vmem [shape: f32[1,32], index: 23, kind: input, shape index: {}]   ;;  %s7369_s24 = inlined_call_operand.vmem [shape: f32[1,32], index: 24, kind: input, shape index: {}]   ;;  %s7370_s25 = inlined_call_operand.vmem [shape: f32[2,32,16], index: 25, kind: output, shape index: {}]  }
   0x1   :  { %7385 = sst [smem:[#allocation3_spill]] %s7345_s0 }
   0x2   :  { %7386 = sst [smem:[#allocation4_spill]] %s7346_s1 }
   0x3   :  { %7387 = sst [smem:[#allocation5_spill]] %s7347_s2 }
   0x4   :  { %7388 = sst [smem:[#allocation6_spill]] %s7348_s3 }
   0x5   :  { %7389 = sst [smem:[#allocation7_spill]] %s7349_s4 }
   0x6   :  { %7390 = sst [smem:[#allocation8_spill]] %s7350_s5 }
   0x7   :  { %7391 = sst [smem:[#allocation9_spill]] %s7351_s6 }
   0x8   :  { %7392 = sst [smem:[#allocation10_spill]] %s7352_s7 }
   0x9   :  { %7393 = sst [smem:[#allocation11_spill]] %s7353_s8 }
   0xa   :  { %7394 = sst [smem:[#allocation12_spill]] %s7354_s9 }
   0xb   :  { %7395 = sst [smem:[#allocation13_spill]] %s7369_s24 }
   0xc   :  { %7396 = sst [smem:[#allocation14_spill]] %s7370_s25 }
   0xd LB: > { %7397 = sst [smem:[#allocation2_spill]] %s5987_s29  ;;  %s4842_s2 = sadd.s32 4294967295, %s5987_s29   ;;  %s5987_s29 = sphi %s6122_s29, %s35_s29  }
   0xe   : > { %p4846_p0 = scmp.ge.s32.totalorder %s5987_s29, 1  ;;  %p687_p1 = scmp.lt.s32.totalorder %s5987_s29, 3 }
  0x10   : > { %p688_p2 = pnand %p4846_p0, %p687_p1 }
  0x11   : > { %p755_p3 = scmp.lt.s32.totalorder (!%p688_p2), %s4842_s2, 1  ;;  %s7398_s3 = sld [smem:[#allocation3_spill]] (!%p688_p2)  ;;  %vm820_vm0 = vcmask (!%p688_p2), 261120   ;;  %vm1021_vm1 = vcmask (!%p688_p2), 523264   ;;  %vm5991_vm2 = vmmov (!%p688_p2), 0   ;;  %vm2994_vm3 = vcmask (!%p688_p2), 1043456  }
  0x12   : > { %691 = sbr.rel (%p688_p2) target bundleno = 6642 (0x19f2), region = 120  ;;  %s7399_s27 = sld [smem:[#allocation4_spill]] (!%p688_p2)  ;;  %vm2893_vm4 = vcmask (!%p688_p2), 31744   ;;  %vm5670_vm5 = vmpackc.low (!%p688_p2), %vm1021_vm1, %vm1021_vm1  ;;  %vm4782_vm6 = vcmask (!%p688_p2), 130048  }
  0x13   : > { %s7400_s30 = sld [smem:[#allocation7_spill]] (!%p688_p2)  ;;  %s7401_s28 = sld [smem:[#allocation5_spill]] (!%p688_p2) }
  0x14   : > { %s7403_s8 = sld [smem:[#allocation8_spill]] (!%p688_p2)  ;;  %s7404_s5 = sld [smem:[#allocation11_spill]] (!%p688_p2) }
  0x15   : > { %s7406_s4 = sld [smem:[#allocation9_spill]] (!%p688_p2)  ;;  %s7407_s7 = sld [smem:[#allocation10_spill]] (!%p688_p2) }
  0x16   : > { %s7408_s24 = sld [smem:[#allocation13_spill]] (!%p688_p2) }
  0x18   : > { %v802_v4 = vld [vmem:[%s7399_s27] sm:$0xff] (!%p688_p2)  ;;  %v803_v7 = vld [vmem:[%s7399_s27 + $0x8] sm:$0xff] (!%p688_p2)  ;;  %v804_v11 = vld [vmem:[%s7399_s27 + $0x10] sm:$0xff] (!%p688_p2) }
  0x19   : > { %s7413_s2 = smov (!%p755_p3, %s4842_s2), 1  ;;  %v805_v15 = vld [vmem:[%s7399_s27 + $0x18] sm:$0xff]  ;;  %v806_v19 = vld [vmem:[%s7399_s27 + $0x20] sm:$0xff]  ;;  %v807_v23 = vld [vmem:[%s7399_s27 + $0x28] sm:$0xff] }
  0x1a   : > { %s7380_s6 = sshll.u32 %s7413_s2, 5  ;;  %v808_v27 = vld [vmem:[%s7399_s27 + $0x30] sm:$0xff]  ;;  %v809_v31 = vld [vmem:[%s7399_s27 + $0x38] sm:$0xff]  ;;  %s7409_s25 = sshll.u32 %s7413_s2, 5 }
  0x1b   : > { %s759_s26 = scalar_lea.vmem %s7398_s3, %s7380_s6  ;;  %s7402_s3 = sld [smem:[#allocation6_spill]] }
  0x1c   : > { %v766_v0 = vld [vmem:[%s759_s26] sm:$0xff]  ;;  %v767_v1 = vld [vmem:[%s759_s26 + $0x8] sm:$0xff]  ;;  %v768_v2 = vld [vmem:[%s759_s26 + $0x10] sm:$0xff] }
  0x1d   : > { %770 = vxpose.xlu0.b32.start [1/4] (short) (narrow) %v766_v0, 64  ;;  %v769_v3 = vld [vmem:[%s759_s26 + $0x18] sm:$0xff]  ;;  %s7405_s26 = sld [smem:[#allocation12_spill]] }
  0x21   : > { %771 = vxpose.xlu0.b32.cont [2/4] (short) (narrow) %v767_v1, 64 }
  0x25   : > { %772 = vxpose.xlu0.b32.cont [3/4] (short) (narrow) %v768_v2, 64 }
  0x29   : > { %773 = vxpose.xlu0.b32.end [4/4] (short) (narrow) %v769_v3, 64 }
  0x9d   : > { %v786_v5 = vpop.trf.xlu0 }
  0x9e   : > { %v6141_v6 = vadd.f32 %v802_v4, %v786_v5 }
  0xa0   : > { %v821_v8 = vsel %vm820_vm0, %v6141_v6, 0.0 }
  0xa1   : > { %822 = vadd.xlane.f32.xlu1 %v821_v8  ;;  %v787_v9 = vpop.trf.xlu0 }
  0xa2   : > { %v6148_v10 = vadd.f32 %v803_v7, %v787_v9 }
  0xa4   : > { %v824_v12 = vsel %vm820_vm0, %v6148_v10, 0.0 }
  0xa5   : > { %825 = vadd.xlane.f32.xlu1 %v824_v12  ;;  %v788_v13 = vpop.trf.xlu0 }
  0xa6   : > { %v6155_v14 = vadd.f32 %v804_v11, %v788_v13 }
  0xa8   : > { %v827_v16 = vsel %vm820_vm0, %v6155_v14, 0.0 }
  0xa9   : > { %828 = vadd.xlane.f32.xlu1 %v827_v16  ;;  %v789_v17 = vpop.trf.xlu0  ;;  %v5755_v16 = vld [vmem:[%s7400_s30 + $0x8] sm:$0xff]  }
  0xaa   : > { %v6162_v18 = vadd.f32 %v805_v15, %v789_v17  ;;  %v5754_v15 = vld [vmem:[%s7400_s30] sm:$0xff]   ;;  %v5756_v17 = vld [vmem:[%s7400_s30 + $0x10] sm:$0xff]  }
  0xab   : > { %5307 = vmatprep.subr.bf16.mxu0 %v5754_v15 }
  0xac   : > { %v830_v20 = vsel %vm820_vm0, %v6162_v18, 0.0  ;;  %5308 = vmatpush3.bf16.msra.mxu0 %v5754_v15 }
  0xad   : > { %831 = vadd.xlane.f32.xlu1 %v830_v20  ;;  %v790_v21 = vpop.trf.xlu0  ;;  %5309 = vmatprep.subr.bf16.mxu0 %v5755_v16 }
  0xae   : > { %v6169_v22 = vadd.f32 %v806_v19, %v790_v21 }
  0xb0   : > { %v833_v24 = vsel %vm820_vm0, %v6169_v22, 0.0  ;;  %5310 = vmatpush3.bf16.msra.mxu0 %v5755_v16 }
  0xb1   : > { %834 = vadd.xlane.f32.xlu0 %v833_v24  ;;  %v791_v25 = vpop.trf.xlu0  ;;  %5311 = vmatprep.subr.bf16.mxu0 %v5756_v17 }
  0xb2   : > { %v6176_v26 = vadd.f32 %v807_v23, %v791_v25 }
  0xb4   : > { %v836_v28 = vsel %vm820_vm0, %v6176_v26, 0.0  ;;  %5312 = vmatpush3.bf16.msra.mxu0 %v5756_v17 }
  0xb5   : > { %837 = vadd.xlane.f32.xlu1 %v836_v28  ;;  %v792_v29 = vpop.trf.xlu0 }
  0xb6   : > { %v6183_v30 = vadd.f32 %v808_v27, %v792_v29 }
  0xb8   : > { %v839_v32 = vsel %vm820_vm0, %v6183_v30, 0.0 }
  0xb9   : > { %840 = vadd.xlane.f32.xlu1 %v839_v32  ;;  %v793_v33 = vpop.trf.xlu0 }
  0xba   : > { %v6190_v34 = vadd.f32 %v809_v31, %v793_v33 }
  0xbc   : > { %v842_v35 = vsel %vm820_vm0, %v6190_v34, 0.0 }
  0xbd   : > { %843 = vadd.xlane.f32.xlu1 %v842_v35 }
 0x12e   : > { %v823_v36 = vpop.xlane.xlu1 %822 }
 0x12f   : > { %v846_v37 = vmul.f32 0.03125, %v823_v36  ;;  %v4851_v36 = vld [vmem:[%s7401_s28] ss:$0 sm:$0xff] }
 0x131   : > { %v6195_v38 = vsub.f32 %v6141_v6, %v846_v37  ;;  %v5757_v37 = vld [vmem:[%s7400_s30 + $0x18] sm:$0xff]  }
 0x132   : > { %v826_v39 = vpop.xlane.xlu1 %825  ;;  %5313 = vmatprep.subr.bf16.mxu0 %v5757_v37 }
 0x133   : > { %v847_v40 = vmul.f32 0.03125, %v826_v39  ;;  %v862_v41 = vmul.f32 %v6195_v38, %v6195_v38  ;;  %5314 = vmatpush3.bf16.msra.mxu0 %v5757_v37 }
 0x135   : > { %v6200_v42 = vsub.f32 %v6148_v10, %v847_v40  ;;  %v870_v43 = vsel %vm820_vm0, %v862_v41, 0.0 }
 0x136   : > { %v829_v44 = vpop.xlane.xlu1 %828  ;;  %871 = vadd.xlane.f32.xlu1 %v870_v43 }
 0x137   : > { %v848_v45 = vmul.f32 0.03125, %v829_v44  ;;  %v863_v46 = vmul.f32 %v6200_v42, %v6200_v42 }
 0x139   : > { %v6206_v47 = vsub.f32 %v6155_v14, %v848_v45  ;;  %v873_v48 = vsel %vm820_vm0, %v863_v46, 0.0  ;;  %v4852_v46 = vld [vmem:[%s7402_s3] ss:$0 sm:$0xff] }
 0x13a   : > { %v832_v49 = vpop.xlane.xlu1 %831  ;;  %874 = vadd.xlane.f32.xlu1 %v873_v48 }
 0x13b   : > { %v849_v50 = vmul.f32 0.03125, %v832_v49  ;;  %v864_v51 = vmul.f32 %v6206_v47, %v6206_v47 }
 0x13d   : > { %v6212_v52 = vsub.f32 %v6162_v18, %v849_v50  ;;  %v876_v53 = vsel %vm820_vm0, %v864_v51, 0.0 }
 0x13e   : > { %877 = vadd.xlane.f32.xlu1 %v876_v53  ;;  %v835_v54 = vpop.xlane.xlu0 %834 }
 0x13f   : > { %v850_v55 = vmul.f32 0.03125, %v835_v54  ;;  %v865_v56 = vmul.f32 %v6212_v52, %v6212_v52 }
 0x141   : > { %v6218_v57 = vsub.f32 %v6169_v22, %v850_v55  ;;  %v879_v58 = vsel %vm820_vm0, %v865_v56, 0.0 }
 0x142   : > { %v838_v59 = vpop.xlane.xlu1 %837  ;;  %880 = vadd.xlane.f32.xlu1 %v879_v58 }
 0x143   : > { %v851_v60 = vmul.f32 0.03125, %v838_v59  ;;  %v866_v61 = vmul.f32 %v6218_v57, %v6218_v57 }
 0x145   : > { %v6224_v62 = vsub.f32 %v6176_v26, %v851_v60  ;;  %v882_v63 = vsel %vm820_vm0, %v866_v61, 0.0 }
 0x146   : > { %v841_v0 = vpop.xlane.xlu1 %840  ;;  %883 = vadd.xlane.f32.xlu1 %v882_v63 }
 0x147   : > { %v852_v1 = vmul.f32 0.03125, %v841_v0  ;;  %v867_v2 = vmul.f32 %v6224_v62, %v6224_v62 }
 0x149   : > { %v6230_v3 = vsub.f32 %v6183_v30, %v852_v1  ;;  %v885_v4 = vsel %vm820_vm0, %v867_v2, 0.0 }
 0x14a   : > { %v844_v5 = vpop.xlane.xlu1 %843  ;;  %886 = vadd.xlane.f32.xlu1 %v885_v4 }
 0x14b   : > { %v853_v7 = vmul.f32 0.03125, %v844_v5  ;;  %v868_v8 = vmul.f32 %v6230_v3, %v6230_v3 }
 0x14d   : > { %v6236_v9 = vsub.f32 %v6190_v34, %v853_v7  ;;  %v888_v11 = vsel %vm820_vm0, %v868_v8, 0.0 }
 0x14e   : > { %889 = vadd.xlane.f32.xlu1 %v888_v11 }
 0x14f   : > { %v869_v12 = vmul.f32 %v6236_v9, %v6236_v9 }
 0x151   : > { %v891_v13 = vsel %vm820_vm0, %v869_v12, 0.0 }
 0x152   : > { %892 = vadd.xlane.f32.xlu1 %v891_v13 }
 0x1c3   : > { %v872_v19 = vpop.xlane.xlu1 %871 }
 0x1c4   : > { %v894_v20 = vmul.f32 0.03125, %v872_v19 }
 0x1c6   : > { %v902_v21 = vadd.f32 1e-05, %v894_v20 }
 0x1c7   : > { %v875_v23 = vpop.xlane.xlu1 %874 }
 0x1c8   : > { %5831 = vrsqrt.f32 %v902_v21  ;;  %v895_v24 = vmul.f32 0.03125, %v875_v23 }
 0x1ca   : > { %v903_v25 = vadd.f32 1e-05, %v895_v24 }
 0x1cb   : > { %v878_v27 = vpop.xlane.xlu1 %877 }
 0x1cc   : > { %5833 = vrsqrt.f32 %v903_v25  ;;  %v896_v28 = vmul.f32 0.03125, %v878_v27 }
 0x1ce   : > { %v904_v29 = vadd.f32 1e-05, %v896_v28 }
 0x1cf   : > { %v881_v31 = vpop.xlane.xlu1 %880 }
 0x1d0   : > { %5835 = vrsqrt.f32 %v904_v29  ;;  %v897_v32 = vmul.f32 0.03125, %v881_v31 }
 0x1d2   : > { %v5832_v33 = vpop.eup %5831  ;;  %v905_v35 = vadd.f32 1e-05, %v897_v32 }
 0x1d3   : > { %v884_v39 = vpop.xlane.xlu1 %883  ;;  %v918_v40 = vmul.f32 %v5832_v33, %v6195_v38 }
 0x1d4   : > { %5837 = vrsqrt.f32 %v905_v35  ;;  %v898_v41 = vmul.f32 0.03125, %v884_v39 }
 0x1d5   : > { %v932_v43 = vmul.f32 %v4851_v36, %v918_v40 }
 0x1d6   : > { %v5834_v44 = vpop.eup %5833  ;;  %v906_v45 = vadd.f32 1e-05, %v898_v41 }
 0x1d7   : > { %v887_v48 = vpop.xlane.xlu1 %886  ;;  %v919_v49 = vmul.f32 %v5834_v44, %v6200_v42  ;;  %v946_v53 = vadd.f32 %v4852_v46, %v932_v43 }
 0x1d8   : > { %5839 = vrsqrt.f32 %v906_v45  ;;  %v899_v50 = vmul.f32 0.03125, %v887_v48 }
 0x1d9   : > { %v933_v51 = vmul.f32 %v4851_v36, %v919_v49  ;;  %v6264_v60 = vadd.f32 %v946_v53, %v6141_v6 }
 0x1da   : > { %v5836_v54 = vpop.eup %5835  ;;  %v907_v38 = vadd.f32 1e-05, %v899_v50 }
 0x1db   : > { %v890_v55 = vpop.xlane.xlu1 %889  ;;  %v947_v56 = vadd.f32 %v4852_v46, %v933_v51  ;;  %v920_v58 = vmul.f32 %v5836_v54, %v6206_v47 }
 0x1dc   : > { %5841 = vrsqrt.f32 %v907_v38  ;;  %v900_v59 = vmul.f32 0.03125, %v890_v55 }
 0x1dd   : > { %v6267_v61 = vadd.f32 %v947_v56, %v6148_v10  ;;  %v934_v63 = vmul.f32 %v4851_v36, %v920_v58 }
 0x1de   : > { %v5838_v42 = vpop.eup %5837  ;;  %v908_v0 = vadd.f32 1e-05, %v900_v59 }
 0x1df   : > { %v893_v1 = vpop.xlane.xlu1 %892  ;;  %v970_v2 = vpack.c.bf16 %v6267_v61, %v6264_v60  ;;  %v921_v4 = vmul.f32 %v5838_v42, %v6212_v52  ;;  %v948_v7 = vadd.f32 %v4852_v46, %v934_v63 }
 0x1e0   : > { %5843 = vrsqrt.f32 %v908_v0  ;;  %v901_v5 = vmul.f32 0.03125, %v893_v1 }
 0x1e1   : > { %981 = vxpose.xlu1.c.b16.start [1/4] (short) (narrow) %v970_v2, 32  ;;  %v935_v47 = vmul.f32 %v4851_v36, %v921_v4  ;;  %v6274_v12 = vadd.f32 %v948_v7, %v6155_v14 }
 0x1e2   : > { %v5840_v8 = vpop.eup %5839  ;;  %v909_v6 = vadd.f32 1e-05, %v901_v5 }
 0x1e3   : > { %v949_v11 = vadd.f32 %v4852_v46, %v935_v47  ;;  %v922_v10 = vmul.f32 %v5840_v8, %v6218_v57 }
 0x1e4   : > { %5845 = vrsqrt.f32 %v909_v6 }
 0x1e5   : > { %v6277_v13 = vadd.f32 %v949_v11, %v6162_v18  ;;  %v936_v15 = vmul.f32 %v4851_v36, %v922_v10 }
 0x1e6   : > { %v5842_v16 = vpop.eup %5841 }
 0x1e7   : > { %v971_v52 = vpack.c.bf16 %v6277_v13, %v6274_v12  ;;  %v923_v17 = vmul.f32 %v5842_v16, %v6224_v62  ;;  %v950_v20 = vadd.f32 %v4852_v46, %v936_v15 }
 0x1e9   : > { %982 = vxpose.xlu1.c.b16.cont [2/4] (short) (narrow) %v971_v52, 32  ;;  %v937_v19 = vmul.f32 %v4851_v36, %v923_v17  ;;  %v6284_v14 = vadd.f32 %v950_v20, %v6169_v22 }
 0x1ea   : > { %v5844_v21 = vpop.eup %5843 }
 0x1eb   : > { %v951_v23 = vadd.f32 %v4852_v46, %v937_v19  ;;  %v924_v57 = vmul.f32 %v5844_v21, %v6230_v3 }
 0x1ed   : > { %v6287_v18 = vadd.f32 %v951_v23, %v6176_v26  ;;  %v938_v24 = vmul.f32 %v4851_v36, %v924_v57 }
 0x1ee   : > { %v5846_v25 = vpop.eup %5845 }
 0x1ef   : > { %v972_v27 = vpack.c.bf16 %v6287_v18, %v6284_v14  ;;  %v925_v62 = vmul.f32 %v5846_v25, %v6236_v9  ;;  %v952_v29 = vadd.f32 %v4852_v46, %v938_v24  ;;  %v4853_v9 = vld [vmem:[%s7403_s8] ss:$0 sm:$0xff] }
 0x1f1   : > { %983 = vxpose.xlu1.c.b16.cont [3/4] (short) (narrow) %v972_v27, 32  ;;  %v939_v28 = vmul.f32 %v4851_v36, %v925_v62  ;;  %v6293_v32 = vadd.f32 %v952_v29, %v6183_v30 }
 0x1f3   : > { %v953_v31 = vadd.f32 %v4852_v46, %v939_v28 }
 0x1f5   : > { %v6296_v22 = vadd.f32 %v953_v31, %v6190_v34 }
 0x1f7   : > { %v973_v26 = vpack.c.bf16 %v6296_v22, %v6293_v32 }
 0x1f9   : > { %984 = vxpose.xlu1.c.b16.end [4/4] (short) (narrow) %v973_v26, 32 }
 0x253   : > { %v989_v3 = vpop.trf.xlu1 }
 0x254   : > { %5315 = vmatprep.mubr.msk.bf16.mxu0 %vm1021_vm1, %v989_v3 }
 0x257   : > { %v990_v33 = vpop.trf.xlu1 }
 0x258   : > { %5316 = vmatmul.mubr.msk.bf16.vlgmr.msra.gmra.mrb[0].mxu0 %vm1021_vm1, %v990_v33 }
 0x32b   : > { %v5317_v30 = vpop.f32.mrb[0].mxu0 }
 0x32c   : > { %v1071_v35 = vadd.f32 %v5317_v30, %v4853_v9  ;;  %v1062_v36 = vpop.f32.mrb[1].mxu0 }
 0x32d   : > { %v1063_v34 = vadd.f32 %v4853_v9, %v1062_v36  ;;  %v5318_v37 = vpop.f32.mrb[2].mxu0 }
 0x32e   : > { %v1079_v39 = vmul.f32 %v1071_v35, %v1071_v35  ;;  %v1074_v40 = vadd.f32 %v5318_v37, %v4853_v9  ;;  %v1065_v41 = vpop.f32.mrb[3].mxu0 }
 0x32f   : > { %v1077_v43 = vmul.f32 %v1063_v34, %v1063_v34  ;;  %v1066_v44 = vadd.f32 %v4853_v9, %v1065_v41 }
 0x330   : > { %v1083_v45 = vmul.f32 %v1079_v39, %v1071_v35  ;;  %v1080_v46 = vmul.f32 %v1074_v40, %v1074_v40 }
 0x331   : > { %v1081_v48 = vmul.f32 %v1077_v43, %v1063_v34  ;;  %v1078_v49 = vmul.f32 %v1066_v44, %v1066_v44 }
 0x332   : > { %v1087_v50 = vmul.f32 0.044715, %v1083_v45  ;;  %v1084_v51 = vmul.f32 %v1080_v46, %v1074_v40 }
 0x333   : > { %v1085_v53 = vmul.f32 0.044715, %v1081_v48  ;;  %v1082_v54 = vmul.f32 %v1078_v49, %v1066_v44  ;;  %v5758_v48 = vld [vmem:[%s7404_s5] sm:$0xff]   ;;  %v1198_v49 = vld [vmem:[%s7405_s26 + $0x8] sm:$0xff] }
 0x334   : > { %v1091_v38 = vadd.f32 %v1087_v50, %v1071_v35  ;;  %v1088_v55 = vmul.f32 0.044715, %v1084_v51  ;;  %5323 = vmatprep.mubr.msk.bf16.mxu1 %vm820_vm0, %v5758_v48  ;;  %v5989_v50 = vmov 0   ;;  %v1197_v51 = vld [vmem:[%s7405_s26] sm:$0xff] }
 0x335   : > { %v1089_v56 = vadd.f32 %v1085_v53, %v1063_v34  ;;  %v1086_v58 = vmul.f32 0.044715, %v1082_v54  ;;  %5753 = vset.pattern.permute.xlu1 %v5989_v50  ;;  %5752 = vset.pattern.permute.xlu0 %v5989_v50  ;;  %v1199_v53 = vld [vmem:[%s7405_s26 + $0x10] sm:$0xff]  ;;  %v1200_v54 = vld [vmem:[%s7405_s26 + $0x18] sm:$0xff] }
 0x336   : > { %v1092_v59 = vadd.f32 %v1088_v55, %v1074_v40  ;;  %v1095_v63 = vmul.f32 0.7978846, %v1091_v38  ;;  %1212 = vperm.xlu1 %5753, %v1198_v49   ;;  %v1201_v38 = vld [vmem:[%s7405_s26 + $0x20] sm:$0xff]  ;;  %v1202_v55 = vld [vmem:[%s7405_s26 + $0x28] sm:$0xff] }
 0x337   : > { %v1090_v42 = vadd.f32 %v1086_v58, %v1066_v44  ;;  %v1093_v0 = vmul.f32 0.7978846, %v1089_v56  ;;  %v1203_v56 = vld [vmem:[%s7405_s26 + $0x30] sm:$0xff]  ;;  %v1204_v58 = vld [vmem:[%s7405_s26 + $0x38] sm:$0xff] }
 0x338   : > { %5847 = vtanh.f32 %v1095_v63  ;;  %v1096_v2 = vmul.f32 0.7978846, %v1092_v59 }
 0x339   : > { %5849 = vtanh.f32 %v1093_v0  ;;  %v1094_v1 = vmul.f32 0.7978846, %v1090_v42 }
 0x33a   : > { %1217 = vperm.xlu1 %5753, %v1199_v53  }
 0x33b   : > { %5851 = vtanh.f32 %v1094_v1 }
 0x33c   : > { %5853 = vtanh.f32 %v1096_v2 }
 0x33e   : > { %1222 = vperm.xlu1 %5753, %v1200_v54  }
 0x342   : > { %v5848_v4 = vpop.eup %5847  ;;  %1227 = vperm.xlu1 %5753, %v1201_v38  }
 0x343   : > { %v5850_v5 = vpop.eup %5849  ;;  %v1103_v11 = vadd.f32 1.0, %v5848_v4 }
 0x344   : > { %v1101_v47 = vadd.f32 1.0, %v5850_v5 }
 0x345   : > { %v5852_v7 = vpop.eup %5851  ;;  %v1107_v19 = vmul.f32 0.5, %v1103_v11 }
 0x346   : > { %v1105_v8 = vmul.f32 0.5, %v1101_v47  ;;  %v1102_v6 = vadd.f32 1.0, %v5852_v7  ;;  %v5854_v10 = vpop.eup %5853  ;;  %1232 = vperm.xlu1 %5753, %v1202_v55  }
 0x347   : > { %v1104_v20 = vadd.f32 1.0, %v5854_v10  ;;  %v1111_v23 = vmul.f32 %v1107_v19, %v1071_v35  ;;  %v4861_v19 = vld [vmem:[%s7407_s7] ss:$0 sm:$0xff] }
 0x348   : > { %v1109_v15 = vmul.f32 %v1105_v8, %v1063_v34  ;;  %v1106_v16 = vmul.f32 0.5, %v1102_v6 }
 0x349   : > { %v1108_v57 = vmul.f32 0.5, %v1104_v20  ;;  %v1121_v24 = vsel %vm820_vm0, %v1111_v23, 0.0 }
 0x34a   : > { %v1115_v52 = vsel %vm820_vm0, %v1109_v15, 0.0  ;;  %v1110_v17 = vmul.f32 %v1106_v16, %v1066_v44  ;;  %1237 = vperm.xlu1 %5753, %v1203_v56  }
 0x34b   : > { %1116 = vadd.xlane.f32.xlu0 %v1115_v52  ;;  %v1112_v25 = vmul.f32 %v1108_v57, %v1074_v40 }
 0x34c   : > { %v1118_v21 = vsel %vm820_vm0, %v1110_v17, 0.0 }
 0x34d   : > { %v1124_v27 = vsel %vm820_vm0, %v1112_v25, 0.0 }
 0x34e   : > { %1242 = vperm.xlu1 %5753, %v1204_v58  }
 0x34f   : > { %1119 = vadd.xlane.f32.xlu0 %v1118_v21 }
 0x353   : > { %1122 = vadd.xlane.f32.xlu0 %v1121_v24 }
 0x357   : > { %1125 = vadd.xlane.f32.xlu0 %v1124_v27 }
 0x3d8   : > { %v1117_v62 = vpop.xlane.xlu0 %1116 }
 0x3d9   : > { %v1127_v28 = vmul.f32 0.03125, %v1117_v62 }
 0x3db   : > { %v1131_v29 = vsub.f32 %v1109_v15, %v1127_v28  ;;  %v4860_v15 = vld [vmem:[%s7406_s4] ss:$0 sm:$0xff] }
 0x3dc   : > { %v1120_v31 = vpop.xlane.xlu0 %1119 }
 0x3dd   : > { %v1128_v26 = vmul.f32 0.03125, %v1120_v31  ;;  %v1135_v3 = vmul.f32 %v1131_v29, %v1131_v29 }
 0x3df   : > { %v1132_v33 = vsub.f32 %v1110_v17, %v1128_v26  ;;  %v1139_v9 = vsel %vm820_vm0, %v1135_v3, 0.0 }
 0x3e0   : > { %1140 = vadd.xlane.f32.xlu0 %v1139_v9  ;;  %v1123_v30 = vpop.xlane.xlu0 %1122 }
 0x3e1   : > { %v1129_v35 = vmul.f32 0.03125, %v1123_v30  ;;  %v1136_v36 = vmul.f32 %v1132_v33, %v1132_v33  ;;  %v5759_v30 = vld [vmem:[%s7404_s5 + $0x8] sm:$0xff]  }
 0x3e3   : > { %v1133_v34 = vsub.f32 %v1111_v23, %v1129_v35  ;;  %v1142_v37 = vsel %vm820_vm0, %v1136_v36, 0.0  ;;  %v5760_v35 = vld [vmem:[%s7404_s5 + $0x10] sm:$0xff]   ;;  %v5761_v36 = vld [vmem:[%s7404_s5 + $0x18] sm:$0xff]  }
 0x3e4   : > { %1143 = vadd.xlane.f32.xlu0 %v1142_v37  ;;  %v1126_v39 = vpop.xlane.xlu0 %1125 }
 0x3e5   : > { %v1130_v40 = vmul.f32 0.03125, %v1126_v39  ;;  %v1137_v41 = vmul.f32 %v1133_v34, %v1133_v34 }
 0x3e7   : > { %v1134_v43 = vsub.f32 %v1112_v25, %v1130_v40  ;;  %v1145_v44 = vsel %vm820_vm0, %v1137_v41, 0.0 }
 0x3e8   : > { %1146 = vadd.xlane.f32.xlu0 %v1145_v44 }
 0x3e9   : > { %v1138_v45 = vmul.f32 %v1134_v43, %v1134_v43 }
 0x3eb   : > { %v1148_v46 = vsel %vm820_vm0, %v1138_v45, 0.0 }
 0x3ec   : > { %1149 = vadd.xlane.f32.xlu0 %v1148_v46 }
 0x402   : > { %1207 = vperm.xlu0 %5752, %v1197_v51  }
 0x46d   : > { %v1141_v59 = vpop.xlane.xlu0 %1140 }
 0x46e   : > { %v1151_v63 = vmul.f32 0.03125, %v1141_v59 }
 0x470   : > { %v1155_v42 = vadd.f32 1e-05, %v1151_v63 }
 0x471   : > { %v1144_v0 = vpop.xlane.xlu0 %1143 }
 0x472   : > { %5855 = vrsqrt.f32 %v1155_v42  ;;  %v1152_v1 = vmul.f32 0.03125, %v1144_v0 }
 0x474   : > { %v1156_v2 = vadd.f32 1e-05, %v1152_v1 }
 0x475   : > { %v1147_v4 = vpop.xlane.xlu0 %1146 }
 0x476   : > { %5857 = vrsqrt.f32 %v1156_v2  ;;  %v1153_v5 = vmul.f32 0.03125, %v1147_v4 }
 0x478   : > { %v1157_v47 = vadd.f32 1e-05, %v1153_v5 }
 0x479   : > { %v1150_v7 = vpop.xlane.xlu0 %1149 }
 0x47a   : > { %5859 = vrsqrt.f32 %v1157_v47  ;;  %v1154_v8 = vmul.f32 0.03125, %v1150_v7 }
 0x47c   : > { %v5856_v6 = vpop.eup %5855  ;;  %v1158_v11 = vadd.f32 1e-05, %v1154_v8 }
 0x47d   : > { %v1163_v10 = vmul.f32 %v5856_v6, %v1131_v29 }
 0x47e   : > { %5861 = vrsqrt.f32 %v1158_v11 }
 0x47f   : > { %v1173_v17 = vmul.f32 %v4860_v15, %v1163_v10 }
 0x480   : > { %v5858_v16 = vpop.eup %5857 }
 0x481   : > { %v1164_v52 = vmul.f32 %v5858_v16, %v1132_v33  ;;  %v1183_v57 = vadd.f32 %v4861_v19, %v1173_v17 }
 0x483   : > { %v1174_v20 = vmul.f32 %v4860_v15, %v1164_v52 }
 0x484   : > { %v5860_v21 = vpop.eup %5859 }
 0x485   : > { %v1165_v23 = vmul.f32 %v5860_v21, %v1133_v34  ;;  %v1184_v24 = vadd.f32 %v4861_v19, %v1174_v20  ;;  %v1213_v34 = vpop.permute.xlu1 %1212 }
 0x487   : > { %v1195_v25 = vpack.c.bf16 %v1184_v24, %v1183_v57  ;;  %v1175_v29 = vmul.f32 %v4860_v15, %v1165_v23 }
 0x488   : > { %v5862_v27 = vpop.eup %5861 }
 0x489   : > { %v1166_v62 = vmul.f32 %v5862_v27, %v1134_v43  ;;  %5735 = vmatprep.subr.msk.bf16.mxu1 %vm820_vm0, %v1195_v25  ;;  %v1278_v28 = vsel %vm820_vm0, %v1195_v25, 0  ;;  %v1185_v26 = vadd.f32 %v4861_v19, %v1175_v29  ;;  %v1218_v37 = vpop.permute.xlu1 %1217  ;;  %v1208_v43 = vpop.permute.xlu0 %1207 }
 0x48a   : > { %5320 = vmatpush3.bf16.xpose.msra.mxu1 %v1278_v28 }
 0x48b   : > { %v1176_v31 = vmul.f32 %v4860_v15, %v1166_v62 }
 0x48d   : > { %v1186_v3 = vadd.f32 %v4861_v19, %v1176_v31  ;;  %v1223_v39 = vpop.permute.xlu1 %1222 }
 0x48f   : > { %v1196_v33 = vpack.c.bf16 %v1186_v3, %v1185_v26 }
 0x491   : > { %5736 = vmatprep.subr.msk.bf16.mxu1 %vm820_vm0, %v1196_v33  ;;  %v1281_v9 = vsel %vm820_vm0, %v1196_v33, 0  ;;  %v1228_v40 = vpop.permute.xlu1 %1227 }
 0x492   : > { %5322 = vmatpush3.bf16.xpose.msra.mxu1 %v1281_v9 }
 0x495   : > { %v1233_v41 = vpop.permute.xlu1 %1232 }
 0x499   : > { %5324 = vmatmul.mubr.msk.bf16.vlgmr.msra.gmra.mrb[0].mxu1 %vm820_vm0, %v5759_v30  ;;  %v1238_v54 = vpop.permute.xlu1 %1237 }
 0x49a   : > { %5327 = vmatprep.mubr.msk.bf16.mxu1 %vm820_vm0, %v5760_v35 }
 0x49d   : > { %v1243_v6 = vpop.permute.xlu1 %1242 }
 0x4a1   : > { %5328 = vmatmul.mubr.msk.bf16.gmra.mrb[4].mxu1 %vm820_vm0, %v5761_v36 }
 0x56c   : > { %v5325_v44 = vpop.f32.mrb[0].mxu1 }
 0x56d   : > { %v6363_v45 = vadd.f32 %v5325_v44, %v1218_v37  ;;  %v1317_v46 = vpop.f32.mrb[1].mxu1 }
 0x56e   : > { %v6365_v48 = vadd.f32 %v1317_v46, %v1208_v43  ;;  %v5326_v49 = vpop.f32.mrb[2].mxu1 }
 0x56f   : > { %v1350_v50 = vmul.f32 %v6363_v45, %v6363_v45  ;;  %v6369_v51 = vadd.f32 %v5326_v49, %v1223_v39  ;;  %v1320_v53 = vpop.f32.mrb[3].mxu1 }
 0x570   : > { %v1348_v38 = vmul.f32 %v6365_v48, %v6365_v48  ;;  %v6373_v55 = vadd.f32 %v1320_v53, %v1213_v34 }
 0x571   : > { %v1358_v56 = vmul.f32 %v1350_v50, %v6363_v45  ;;  %v1351_v58 = vmul.f32 %v6369_v51, %v6369_v51 }
 0x572   : > { %v1356_v59 = vmul.f32 %v1348_v38, %v6365_v48  ;;  %v1349_v63 = vmul.f32 %v6373_v55, %v6373_v55 }
 0x573   : > { %v1366_v42 = vmul.f32 0.044715, %v1358_v56  ;;  %v1359_v0 = vmul.f32 %v1351_v58, %v6369_v51 }
 0x574   : > { %v1364_v1 = vmul.f32 0.044715, %v1356_v59  ;;  %v1357_v2 = vmul.f32 %v1349_v63, %v6373_v55  ;;  %v5329_v4 = vpop.f32.mrb[4].mxu1 }
 0x575   : > { %v1374_v5 = vadd.f32 %v1366_v42, %v6363_v45  ;;  %v1367_v47 = vmul.f32 0.044715, %v1359_v0  ;;  %v6384_v7 = vadd.f32 %v5329_v4, %v1238_v54  ;;  %v1333_v8 = vpop.f32.mrb[5].mxu1 }
 0x576   : > { %v1372_v11 = vadd.f32 %v1364_v1, %v6365_v48  ;;  %v1365_v10 = vmul.f32 0.044715, %v1357_v2  ;;  %v6387_v15 = vadd.f32 %v1333_v8, %v1228_v40  ;;  %v5330_v16 = vpop.f32.mrb[6].mxu1 }
 0x577   : > { %v1382_v52 = vmul.f32 0.7978846, %v1374_v5  ;;  %v1375_v17 = vadd.f32 %v1367_v47, %v6369_v51  ;;  %v1354_v19 = vmul.f32 %v6384_v7, %v6384_v7  ;;  %v6392_v20 = vadd.f32 %v5330_v16, %v1243_v6  ;;  %v1336_v21 = vpop.f32.mrb[7].mxu1 }
 0x578   : > { %v1380_v23 = vmul.f32 0.7978846, %v1372_v11  ;;  %v1373_v57 = vadd.f32 %v1365_v10, %v6373_v55  ;;  %v1352_v24 = vmul.f32 %v6387_v15, %v6387_v15  ;;  %v6397_v25 = vadd.f32 %v1336_v21, %v1233_v41 }
 0x579   : > { %5863 = vtanh.f32 %v1382_v52  ;;  %v1383_v27 = vmul.f32 0.7978846, %v1375_v17  ;;  %v1362_v62 = vmul.f32 %v1354_v19, %v6384_v7  ;;  %v1355_v28 = vmul.f32 %v6392_v20, %v6392_v20 }
 0x57a   : > { %5865 = vtanh.f32 %v1380_v23  ;;  %v1381_v29 = vmul.f32 0.7978846, %v1373_v57  ;;  %v1360_v31 = vmul.f32 %v1352_v24, %v6387_v15  ;;  %v1353_v26 = vmul.f32 %v6397_v25, %v6397_v25 }
 0x57b   : > { %5867 = vtanh.f32 %v1383_v27  ;;  %v1370_v3 = vmul.f32 0.044715, %v1362_v62  ;;  %v1363_v33 = vmul.f32 %v1355_v28, %v6392_v20 }
 0x57c   : > { %5869 = vtanh.f32 %v1381_v29  ;;  %v1368_v9 = vmul.f32 0.044715, %v1360_v31  ;;  %v1361_v30 = vmul.f32 %v1353_v26, %v6397_v25 }
 0x57d   : > { %v1378_v35 = vadd.f32 %v1370_v3, %v6384_v7  ;;  %v1371_v36 = vmul.f32 0.044715, %v1363_v33 }
 0x57e   : > { %v1376_v34 = vadd.f32 %v1368_v9, %v6387_v15  ;;  %v1369_v37 = vmul.f32 0.044715, %v1361_v30 }
 0x57f   : > { %v1386_v39 = vmul.f32 0.7978846, %v1378_v35  ;;  %v1379_v40 = vadd.f32 %v1371_v36, %v6392_v20 }
 0x580   : > { %v1384_v41 = vmul.f32 0.7978846, %v1376_v34  ;;  %v1377_v43 = vadd.f32 %v1369_v37, %v6397_v25 }
 0x581   : > { %5871 = vtanh.f32 %v1386_v39  ;;  %v1387_v44 = vmul.f32 0.7978846, %v1379_v40 }
 0x582   : > { %5873 = vtanh.f32 %v1384_v41  ;;  %v1385_v46 = vmul.f32 0.7978846, %v1377_v43 }
 0x583   : > { %v5864_v49 = vpop.eup %5863  ;;  %5875 = vtanh.f32 %v1387_v44 }
 0x584   : > { %v5866_v50 = vpop.eup %5865  ;;  %5877 = vtanh.f32 %v1385_v46  ;;  %v1398_v53 = vadd.f32 1.0, %v5864_v49 }
 0x585   : > { %v5868_v54 = vpop.eup %5867  ;;  %v1396_v38 = vadd.f32 1.0, %v5866_v50 }
 0x586   : > { %v5870_v56 = vpop.eup %5869  ;;  %v1406_v58 = vmul.f32 0.5, %v1398_v53  ;;  %v1399_v59 = vadd.f32 1.0, %v5868_v54 }
 0x587   : > { %v1404_v63 = vmul.f32 0.5, %v1396_v38  ;;  %v1397_v42 = vadd.f32 1.0, %v5870_v56 }
 0x588   : > { %v1414_v0 = vmul.f32 %v1406_v58, %v6363_v45  ;;  %v1407_v1 = vmul.f32 0.5, %v1399_v59 }
 0x589   : > { %v1412_v2 = vmul.f32 %v1404_v63, %v6365_v48  ;;  %v1405_v4 = vmul.f32 0.5, %v1397_v42 }
 0x58a   : > { %v6414_v5 = vadd.f32 %v1414_v0, %v6274_v12  ;;  %v1415_v47 = vmul.f32 %v1407_v1, %v6369_v51 }
 0x58b   : > { %v5872_v8 = vpop.eup %5871  ;;  %v1413_v6 = vmul.f32 %v1405_v4, %v6373_v55  ;;  %v6424_v45 = vadd.f32 %v1412_v2, %v6264_v60 }
 0x58c   : > { %v5874_v11 = vpop.eup %5873  ;;  %v1438_v10 = vsel %vm820_vm0, %v6414_v5, 0.0  ;;  %v6421_v16 = vadd.f32 %v1415_v47, %v6277_v13  ;;  %v1402_v48 = vadd.f32 1.0, %v5872_v8 }
 0x58d   : > { %v5876_v52 = vpop.eup %5875  ;;  %1439 = vadd.xlane.f32.xlu1 %v1438_v10  ;;  %v1400_v12 = vadd.f32 1.0, %v5874_v11  ;;  %v6429_v55 = vadd.f32 %v1413_v6, %v6267_v61  ;;  %v1432_v60 = vsel %vm820_vm0, %v6424_v45, 0.0 }
 0x58e   : > { %v5878_v17 = vpop.eup %5877  ;;  %v1441_v51 = vsel %vm820_vm0, %v6421_v16, 0.0  ;;  %v1410_v19 = vmul.f32 0.5, %v1402_v48  ;;  %v1403_v21 = vadd.f32 1.0, %v5876_v52 }
 0x58f   : > { %1442 = vadd.xlane.f32.xlu0 %v1441_v51  ;;  %v1408_v23 = vmul.f32 0.5, %v1400_v12  ;;  %v1401_v13 = vadd.f32 1.0, %v5878_v17  ;;  %v1435_v28 = vsel %vm820_vm0, %v6429_v55, 0.0 }
 0x590   : > { %v1411_v57 = vmul.f32 0.5, %v1403_v21  ;;  %v1418_v62 = vmul.f32 %v1410_v19, %v6384_v7  ;;  %v5762_v19 = vld [vmem:[%s7400_s30 + $0x20] sm:$0xff]   ;;  %v5763_v21 = vld [vmem:[%s7400_s30 + $0x28] sm:$0xff]  }
 0x591   : > { %1433 = vadd.xlane.f32.xlu1 %v1432_v60  ;;  %v1416_v24 = vmul.f32 %v1408_v23, %v6387_v15  ;;  %v1409_v27 = vmul.f32 0.5, %v1401_v13  ;;  %5331 = vmatprep.subr.bf16.mxu0 %v5762_v19  ;;  %v5764_v23 = vld [vmem:[%s7400_s30 + $0x30] sm:$0xff]  }
 0x592   : > { %v1419_v31 = vmul.f32 %v1411_v57, %v6392_v20  ;;  %v6448_v15 = vadd.f32 %v1418_v62, %v6293_v32  ;;  %5332 = vmatpush3.bf16.msra.mxu0 %v5762_v19 }
 0x593   : > { %1436 = vadd.xlane.f32.xlu0 %v1435_v28  ;;  %v6438_v61 = vadd.f32 %v1416_v24, %v6284_v14  ;;  %v1417_v29 = vmul.f32 %v1409_v27, %v6397_v25  ;;  %5333 = vmatprep.subr.bf16.mxu0 %v5763_v21 }
 0x594   : > { %v6453_v14 = vadd.f32 %v1419_v31, %v6296_v22  ;;  %v1450_v20 = vsel %vm820_vm0, %v6448_v15, 0.0  ;;  %v5765_v31 = vld [vmem:[%s7400_s30 + $0x38] sm:$0xff]  }
 0x595   : > { %v1444_v26 = vsel %vm820_vm0, %v6438_v61, 0.0  ;;  %v6445_v3 = vadd.f32 %v1417_v29, %v6287_v18 }
 0x596   : > { %1445 = vadd.xlane.f32.xlu1 %v1444_v26  ;;  %v1453_v25 = vsel %vm820_vm0, %v6453_v14, 0.0  ;;  %5334 = vmatpush3.bf16.msra.mxu0 %v5763_v21 }
 0x597   : > { %v1447_v7 = vsel %vm820_vm0, %v6445_v3, 0.0  ;;  %5335 = vmatprep.subr.bf16.mxu0 %v5764_v23 }
 0x598   : > { %1448 = vadd.xlane.f32.xlu0 %v1447_v7 }
 0x59a   : > { %1451 = vadd.xlane.f32.xlu1 %v1450_v20  ;;  %5336 = vmatpush3.bf16.msra.mxu0 %v5764_v23 }
 0x59b   : > { %5337 = vmatprep.subr.bf16.mxu0 %v5765_v31 }
 0x59c   : > { %1454 = vadd.xlane.f32.xlu0 %v1453_v25 }
 0x59e   : > { %5338 = vmatpush3.bf16.msra.mxu0 %v5765_v31 }
 0x61a   : > { %v1440_v18 = vpop.xlane.xlu1 %1439 }
 0x61b   : > { %v1458_v33 = vmul.f32 0.03125, %v1440_v18 }
 0x61c   : > { %v1443_v32 = vpop.xlane.xlu0 %1442 }
 0x61d   : > { %v6460_v9 = vsub.f32 %v6414_v5, %v1458_v33  ;;  %v1459_v30 = vmul.f32 0.03125, %v1443_v32 }
 0x61e   : > { %v1434_v35 = vpop.xlane.xlu1 %1433 }
 0x61f   : > { %v6463_v22 = vsub.f32 %v6421_v16, %v1459_v30  ;;  %v1456_v36 = vmul.f32 0.03125, %v1434_v35  ;;  %v1474_v34 = vmul.f32 %v6460_v9, %v6460_v9 }
 0x620   : > { %v1437_v37 = vpop.xlane.xlu0 %1436 }
 0x621   : > { %v6468_v39 = vsub.f32 %v6424_v45, %v1456_v36  ;;  %v1457_v40 = vmul.f32 0.03125, %v1437_v37  ;;  %v1486_v41 = vsel %vm820_vm0, %v1474_v34, 0.0  ;;  %v1475_v43 = vmul.f32 %v6463_v22, %v6463_v22 }
 0x622   : > { %1487 = vadd.xlane.f32.xlu1 %v1486_v41 }
 0x623   : > { %v6474_v44 = vsub.f32 %v6429_v55, %v1457_v40  ;;  %v1446_v46 = vpop.xlane.xlu1 %1445  ;;  %v1489_v49 = vsel %vm820_vm0, %v1475_v43, 0.0  ;;  %v1472_v50 = vmul.f32 %v6468_v39, %v6468_v39 }
 0x624   : > { %v1460_v53 = vmul.f32 0.03125, %v1446_v46  ;;  %1490 = vadd.xlane.f32.xlu0 %v1489_v49 }
 0x625   : > { %v1449_v54 = vpop.xlane.xlu0 %1448  ;;  %v1480_v38 = vsel %vm820_vm0, %v1472_v50, 0.0  ;;  %v1473_v56 = vmul.f32 %v6474_v44, %v6474_v44 }
 0x626   : > { %v6483_v58 = vsub.f32 %v6438_v61, %v1460_v53  ;;  %v1461_v59 = vmul.f32 0.03125, %v1449_v54  ;;  %1481 = vadd.xlane.f32.xlu1 %v1480_v38 }
 0x627   : > { %v1452_v63 = vpop.xlane.xlu1 %1451  ;;  %v1483_v42 = vsel %vm820_vm0, %v1473_v56, 0.0 }
 0x628   : > { %v6487_v0 = vsub.f32 %v6445_v3, %v1461_v59  ;;  %v1462_v1 = vmul.f32 0.03125, %v1452_v63  ;;  %1484 = vadd.xlane.f32.xlu0 %v1483_v42  ;;  %v1476_v2 = vmul.f32 %v6483_v58, %v6483_v58  ;;  %v4872_v63 = vld [vmem:[%s7401_s28 + $0x1] ss:$0 sm:$0xff] }
 0x629   : > { %v1455_v4 = vpop.xlane.xlu0 %1454 }
 0x62a   : > { %v6492_v47 = vsub.f32 %v6448_v15, %v1462_v1  ;;  %v1463_v8 = vmul.f32 0.03125, %v1455_v4  ;;  %v1492_v6 = vsel %vm820_vm0, %v1476_v2, 0.0  ;;  %v1477_v11 = vmul.f32 %v6487_v0, %v6487_v0 }
 0x62b   : > { %1493 = vadd.xlane.f32.xlu1 %v1492_v6 }
 0x62c   : > { %v6498_v10 = vsub.f32 %v6453_v14, %v1463_v8  ;;  %v1495_v48 = vsel %vm820_vm0, %v1477_v11, 0.0  ;;  %v1478_v52 = vmul.f32 %v6492_v47, %v6492_v47 }
 0x62d   : > { %1496 = vadd.xlane.f32.xlu0 %v1495_v48 }
 0x62e   : > { %v1498_v12 = vsel %vm820_vm0, %v1478_v52, 0.0  ;;  %v1479_v17 = vmul.f32 %v6498_v10, %v6498_v10 }
 0x62f   : > { %1499 = vadd.xlane.f32.xlu1 %v1498_v12 }
 0x630   : > { %v1501_v51 = vsel %vm820_vm0, %v1479_v17, 0.0 }
 0x631   : > { %1502 = vadd.xlane.f32.xlu0 %v1501_v51 }
 0x6af   : > { %v1488_v13 = vpop.xlane.xlu1 %1487 }
 0x6b0   : > { %v1506_v60 = vmul.f32 0.03125, %v1488_v13 }
 0x6b1   : > { %v1491_v57 = vpop.xlane.xlu0 %1490 }
 0x6b2   : > { %v1514_v24 = vadd.f32 1e-05, %v1506_v60  ;;  %v1507_v27 = vmul.f32 0.03125, %v1491_v57 }
 0x6b3   : > { %v1482_v62 = vpop.xlane.xlu1 %1481 }
 0x6b4   : > { %v1515_v28 = vadd.f32 1e-05, %v1507_v27  ;;  %v1504_v29 = vmul.f32 0.03125, %v1482_v62  ;;  %5879 = vrsqrt.f32 %v1514_v24 }
 0x6b5   : > { %v1485_v26 = vpop.xlane.xlu0 %1484 }
 0x6b6   : > { %5881 = vrsqrt.f32 %v1515_v28  ;;  %v1512_v7 = vadd.f32 1e-05, %v1504_v29  ;;  %v1505_v20 = vmul.f32 0.03125, %v1485_v26 }
 0x6b8   : > { %5883 = vrsqrt.f32 %v1512_v7  ;;  %v1513_v25 = vadd.f32 1e-05, %v1505_v20  ;;  %v1494_v18 = vpop.xlane.xlu1 %1493  ;;  %v4883_v20 = vld [vmem:[%s7403_s8 + $0x1] ss:$0 sm:$0xff] }
 0x6b9   : > { %v1508_v33 = vmul.f32 0.03125, %v1494_v18 }
 0x6ba   : > { %5885 = vrsqrt.f32 %v1513_v25  ;;  %v1497_v32 = vpop.xlane.xlu0 %1496 }
 0x6bb   : > { %v1516_v30 = vadd.f32 1e-05, %v1508_v33  ;;  %v1509_v35 = vmul.f32 0.03125, %v1497_v32 }
 0x6bc   : > { %v1500_v36 = vpop.xlane.xlu1 %1499 }
 0x6bd   : > { %5887 = vrsqrt.f32 %v1516_v30  ;;  %v1517_v34 = vadd.f32 1e-05, %v1509_v35  ;;  %v1510_v37 = vmul.f32 0.03125, %v1500_v36 }
 0x6be   : > { %v1503_v40 = vpop.xlane.xlu0 %1502  ;;  %v5880_v41 = vpop.eup %5879 }
 0x6bf   : > { %5889 = vrsqrt.f32 %v1517_v34  ;;  %v1518_v43 = vadd.f32 1e-05, %v1510_v37  ;;  %v1511_v46 = vmul.f32 0.03125, %v1503_v40  ;;  %v1530_v38 = vmul.f32 %v5880_v41, %v6460_v9 }
 0x6c0   : > { %v5882_v49 = vpop.eup %5881 }
 0x6c1   : > { %v1531_v50 = vmul.f32 %v5882_v49, %v6463_v22  ;;  %5891 = vrsqrt.f32 %v1518_v43  ;;  %v1519_v53 = vadd.f32 1e-05, %v1511_v46  ;;  %v4873_v22 = vld [vmem:[%s7402_s3 + $0x1] ss:$0 sm:$0xff]  ;;  %v1544_v8 = vmul.f32 %v4872_v63, %v1530_v38  ;;  %s7410_s3 = sld [smem:[#allocation14_spill]] }
 0x6c2   : > { %v5884_v54 = vpop.eup %5883 }
 0x6c3   : > { %v1528_v56 = vmul.f32 %v5884_v54, %v6468_v39  ;;  %5893 = vrsqrt.f32 %v1519_v53  ;;  %v1545_v42 = vmul.f32 %v4872_v63, %v1531_v50  ;;  %v1558_v21 = vadd.f32 %v4873_v22, %v1544_v8 }
 0x6c4   : > { %v5886_v59 = vpop.eup %5885 }
 0x6c5   : > { %v1529_v1 = vmul.f32 %v5886_v59, %v6474_v44  ;;  %v1542_v2 = vmul.f32 %v4872_v63, %v1528_v56  ;;  %v1559_v52 = vadd.f32 %v4873_v22, %v1545_v42 }
 0x6c7   : > { %v5888_v4 = vpop.eup %5887  ;;  %v1543_v6 = vmul.f32 %v4872_v63, %v1529_v1  ;;  %v1556_v9 = vadd.f32 %v4873_v22, %v1542_v2  ;;  %v6541_v57 = vadd.f32 %v1559_v52, %v6421_v16 }
 0x6c8   : > { %v1532_v39 = vmul.f32 %v5888_v4, %v6483_v58 }
 0x6c9   : > { %v5890_v11 = vpop.eup %5889  ;;  %v1557_v48 = vadd.f32 %v4873_v22, %v1543_v6  ;;  %v6532_v44 = vadd.f32 %v1556_v9, %v6424_v45  ;;  %v6545_v45 = vadd.f32 %v1558_v21, %v6414_v5 }
 0x6ca   : > { %v1533_v12 = vmul.f32 %v5890_v11, %v6487_v0  ;;  %v1546_v51 = vmul.f32 %v4872_v63, %v1532_v39 }
 0x6cb   : > { %v5892_v17 = vpop.eup %5891  ;;  %v6535_v19 = vadd.f32 %v1557_v48, %v6429_v55 }
 0x6cc   : > { %v1547_v23 = vmul.f32 %v4872_v63, %v1533_v12  ;;  %v1534_v13 = vmul.f32 %v5892_v17, %v6492_v47  ;;  %v1560_v55 = vadd.f32 %v4873_v22, %v1546_v51  ;;  %v1582_v47 = vpack.c.bf16 %v6541_v57, %v6545_v45 }
 0x6cd   : > { %v5894_v60 = vpop.eup %5893  ;;  %v1581_v58 = vpack.c.bf16 %v6535_v19, %v6532_v44 }
 0x6ce   : > { %v1535_v0 = vmul.f32 %v5894_v60, %v6498_v10  ;;  %v1561_v24 = vadd.f32 %v4873_v22, %v1547_v23  ;;  %v1548_v27 = vmul.f32 %v4872_v63, %v1534_v13  ;;  %v6553_v16 = vadd.f32 %v1560_v55, %v6438_v61 }
 0x6cf   : > { %1593 = vxpose.xlu1.c.b16.start [1/4] (short) (narrow) %v1581_v58, 32 }
 0x6d0   : > { %v1549_v62 = vmul.f32 %v4872_v63, %v1535_v0  ;;  %v6550_v28 = vadd.f32 %v1561_v24, %v6445_v3  ;;  %v1562_v10 = vadd.f32 %v4873_v22, %v1548_v27 }
 0x6d2   : > { %v1563_v29 = vadd.f32 %v4873_v22, %v1549_v62  ;;  %v1583_v31 = vpack.c.bf16 %v6550_v28, %v6553_v16  ;;  %v6561_v26 = vadd.f32 %v1562_v10, %v6448_v15 }
 0x6d3   : > { %1594 = vxpose.xlu1.c.b16.cont [2/4] (short) (narrow) %v1582_v47, 32 }
 0x6d4   : > { %v6558_v5 = vadd.f32 %v1563_v29, %v6453_v14 }
 0x6d6   : > { %v1584_v3 = vpack.c.bf16 %v6558_v5, %v6561_v26 }
 0x6d7   : > { %1595 = vxpose.xlu1.c.b16.cont [3/4] (short) (narrow) %v1583_v31, 32 }
 0x6db   : > { %1596 = vxpose.xlu1.c.b16.end [4/4] (short) (narrow) %v1584_v3, 32 }
 0x735   : > { %v1601_v7 = vpop.trf.xlu1 }
 0x736   : > { %5339 = vmatprep.mubr.msk.bf16.mxu0 %vm1021_vm1, %v1601_v7 }
 0x739   : > { %v1602_v61 = vpop.trf.xlu1 }
 0x73a   : > { %5340 = vmatmul.mubr.msk.bf16.vlgmr.msra.gmra.mrb[4].mxu0 %vm1021_vm1, %v1602_v61 }
 0x80d   : > { %v5341_v14 = vpop.f32.mrb[4].mxu0 }
 0x80e   : > { %v1682_v25 = vadd.f32 %v5341_v14, %v4883_v20  ;;  %v1673_v18 = vpop.f32.mrb[5].mxu0 }
 0x80f   : > { %v1674_v33 = vadd.f32 %v4883_v20, %v1673_v18  ;;  %v5342_v15 = vpop.f32.mrb[6].mxu0 }
 0x810   : > { %v1690_v32 = vmul.f32 %v1682_v25, %v1682_v25  ;;  %v1685_v30 = vadd.f32 %v5342_v15, %v4883_v20  ;;  %v1676_v35 = vpop.f32.mrb[7].mxu0 }
 0x811   : > { %v1688_v36 = vmul.f32 %v1674_v33, %v1674_v33  ;;  %v1677_v34 = vadd.f32 %v4883_v20, %v1676_v35 }
 0x812   : > { %v1694_v37 = vmul.f32 %v1690_v32, %v1682_v25  ;;  %v1691_v40 = vmul.f32 %v1685_v30, %v1685_v30 }
 0x813   : > { %v1692_v41 = vmul.f32 %v1688_v36, %v1674_v33  ;;  %v1689_v43 = vmul.f32 %v1677_v34, %v1677_v34 }
 0x814   : > { %v1698_v46 = vmul.f32 0.044715, %v1694_v37  ;;  %v1695_v49 = vmul.f32 %v1691_v40, %v1685_v30 }
 0x815   : > { %v1696_v50 = vmul.f32 0.044715, %v1692_v41  ;;  %v1693_v53 = vmul.f32 %v1689_v43, %v1677_v34  ;;  %v4902_v41 = vld [vmem:[%s7405_s26 + $0x40] sm:$0xff] }
 0x816   : > { %v1702_v54 = vadd.f32 %v1698_v46, %v1682_v25  ;;  %v1699_v38 = vmul.f32 0.044715, %v1695_v49  ;;  %v5766_v43 = vld [vmem:[%s7404_s5 + $0x20] sm:$0xff]  }
 0x817   : > { %v1700_v56 = vadd.f32 %v1696_v50, %v1674_v33  ;;  %v1697_v59 = vmul.f32 0.044715, %v1693_v53  ;;  %5347 = vmatprep.mubr.msk.bf16.mxu1 %vm820_vm0, %v5766_v43 }
 0x818   : > { %v1703_v63 = vadd.f32 %v1699_v38, %v1685_v30  ;;  %v1706_v42 = vmul.f32 0.7978846, %v1702_v54 }
 0x819   : > { %v1701_v1 = vadd.f32 %v1697_v59, %v1677_v34  ;;  %v1704_v2 = vmul.f32 0.7978846, %v1700_v56 }
 0x81a   : > { %5895 = vtanh.f32 %v1706_v42  ;;  %v1707_v4 = vmul.f32 0.7978846, %v1703_v63 }
 0x81b   : > { %5897 = vtanh.f32 %v1704_v2  ;;  %v1705_v22 = vmul.f32 0.7978846, %v1701_v1 }
 0x81d   : > { %5899 = vtanh.f32 %v1705_v22 }
 0x81e   : > { %5901 = vtanh.f32 %v1707_v4 }
 0x824   : > { %v5896_v8 = vpop.eup %5895 }
 0x825   : > { %v5898_v6 = vpop.eup %5897  ;;  %v1714_v52 = vadd.f32 1.0, %v5896_v8  ;;  %v4892_v8 = vld [vmem:[%s7406_s4 + $0x1] ss:$0 sm:$0xff]  ;;  %s764_s4 = scalar_lea.vmem %s7410_s3, %s7409_s25 }
 0x826   : > { %v1712_v9 = vadd.f32 1.0, %v5898_v6 }
 0x827   : > { %v5900_v39 = vpop.eup %5899  ;;  %v1718_v13 = vmul.f32 0.5, %v1714_v52 }
 0x828   : > { %v1716_v11 = vmul.f32 0.5, %v1712_v9  ;;  %v1713_v48 = vadd.f32 1.0, %v5900_v39  ;;  %v5902_v12 = vpop.eup %5901 }
 0x829   : > { %v1715_v60 = vadd.f32 1.0, %v5902_v12  ;;  %v1722_v0 = vmul.f32 %v1718_v13, %v1682_v25 }
 0x82a   : > { %v1720_v17 = vmul.f32 %v1716_v11, %v1674_v33  ;;  %v1717_v51 = vmul.f32 0.5, %v1713_v48  ;;  %v4893_v11 = vld [vmem:[%s7407_s7 + $0x1] ss:$0 sm:$0xff] }
 0x82b   : > { %v1719_v24 = vmul.f32 0.5, %v1715_v60  ;;  %v1734_v27 = vsel %vm820_vm0, %v1722_v0, 0.0 }
 0x82c   : > { %v1728_v21 = vsel %vm820_vm0, %v1720_v17, 0.0  ;;  %v1721_v23 = vmul.f32 %v1717_v51, %v1677_v34 }
 0x82d   : > { %1729 = vadd.xlane.f32.xlu0 %v1728_v21  ;;  %v1723_v55 = vmul.f32 %v1719_v24, %v1685_v30 }
 0x82e   : > { %v1731_v58 = vsel %vm820_vm0, %v1721_v23, 0.0 }
 0x82f   : > { %v1737_v62 = vsel %vm820_vm0, %v1723_v55, 0.0 }
 0x831   : > { %1732 = vadd.xlane.f32.xlu0 %v1731_v58 }
 0x835   : > { %1735 = vadd.xlane.f32.xlu0 %v1734_v27 }
 0x839   : > { %1738 = vadd.xlane.f32.xlu0 %v1737_v62 }
 0x8ba   : > { %v1730_v47 = vpop.xlane.xlu0 %1729 }
 0x8bb   : > { %v1740_v29 = vmul.f32 0.03125, %v1730_v47  ;;  %v5767_v47 = vld [vmem:[%s7404_s5 + $0x28] sm:$0xff]  }
 0x8bd   : > { %v1744_v10 = vsub.f32 %v1720_v17, %v1740_v29  ;;  %v5768_v29 = vld [vmem:[%s7404_s5 + $0x30] sm:$0xff]  }
 0x8be   : > { %v1733_v31 = vpop.xlane.xlu0 %1732 }
 0x8bf   : > { %v1741_v3 = vmul.f32 0.03125, %v1733_v31  ;;  %v1748_v7 = vmul.f32 %v1744_v10, %v1744_v10 }
 0x8c1   : > { %v1745_v61 = vsub.f32 %v1721_v23, %v1741_v3  ;;  %v1752_v20 = vsel %vm820_vm0, %v1748_v7, 0.0 }
 0x8c2   : > { %1753 = vadd.xlane.f32.xlu0 %v1752_v20  ;;  %v1736_v14 = vpop.xlane.xlu0 %1735 }
 0x8c3   : > { %v1742_v25 = vmul.f32 0.03125, %v1736_v14  ;;  %v1749_v18 = vmul.f32 %v1745_v61, %v1745_v61 }
 0x8c5   : > { %v1746_v33 = vsub.f32 %v1722_v0, %v1742_v25  ;;  %v1755_v15 = vsel %vm820_vm0, %v1749_v18, 0.0 }
 0x8c6   : > { %1756 = vadd.xlane.f32.xlu0 %v1755_v15  ;;  %v1739_v32 = vpop.xlane.xlu0 %1738 }
 0x8c7   : > { %v1743_v30 = vmul.f32 0.03125, %v1739_v32  ;;  %v1750_v35 = vmul.f32 %v1746_v33, %v1746_v33 }
 0x8c9   : > { %v1747_v36 = vsub.f32 %v1723_v55, %v1743_v30  ;;  %v1758_v34 = vsel %vm820_vm0, %v1750_v35, 0.0 }
 0x8ca   : > { %1759 = vadd.xlane.f32.xlu0 %v1758_v34 }
 0x8cb   : > { %v1751_v37 = vmul.f32 %v1747_v36, %v1747_v36 }
 0x8cd   : > { %v1761_v40 = vsel %vm820_vm0, %v1751_v37, 0.0 }
 0x8ce   : > { %1762 = vadd.xlane.f32.xlu0 %v1761_v40 }
 0x8e4   : > { %1822 = vperm.xlu0 %5752, %v4902_v41   ;;  %v4905_v41 = vld [vmem:[%s7405_s26 + $0x58] sm:$0xff] }
 0x94f   : > { %v1754_v46 = vpop.xlane.xlu0 %1753 }
 0x950   : > { %v1764_v49 = vmul.f32 0.03125, %v1754_v46 }
 0x952   : > { %v1768_v50 = vadd.f32 1e-05, %v1764_v49 }
 0x953   : > { %v1757_v53 = vpop.xlane.xlu0 %1756 }
 0x954   : > { %5903 = vrsqrt.f32 %v1768_v50  ;;  %v1765_v54 = vmul.f32 0.03125, %v1757_v53 }
 0x956   : > { %v1769_v38 = vadd.f32 1e-05, %v1765_v54  ;;  %v4904_v54 = vld [vmem:[%s7405_s26 + $0x50] sm:$0xff] }
 0x957   : > { %v1760_v56 = vpop.xlane.xlu0 %1759 }
 0x958   : > { %5905 = vrsqrt.f32 %v1769_v38  ;;  %v1766_v59 = vmul.f32 0.03125, %v1760_v56  ;;  %v4906_v38 = vld [vmem:[%s7405_s26 + $0x60] sm:$0xff] }
 0x95a   : > { %v1770_v63 = vadd.f32 1e-05, %v1766_v59 }
 0x95b   : > { %v1763_v42 = vpop.xlane.xlu0 %1762 }
 0x95c   : > { %5907 = vrsqrt.f32 %v1770_v63  ;;  %v1767_v1 = vmul.f32 0.03125, %v1763_v42  ;;  %v4907_v63 = vld [vmem:[%s7405_s26 + $0x68] sm:$0xff] }
 0x95e   : > { %v5904_v2 = vpop.eup %5903  ;;  %v1771_v22 = vadd.f32 1e-05, %v1767_v1  ;;  %v5770_v1 = vld [vmem:[%s7357_s12] sm:$0xff]  }
 0x95f   : > { %v1776_v4 = vmul.f32 %v5904_v2, %v1744_v10  ;;  %v5769_v10 = vld [vmem:[%s7404_s5 + $0x38] sm:$0xff]  }
 0x960   : > { %5909 = vrsqrt.f32 %v1771_v22  ;;  %v5990_v22 = vmov 0.0  }
 0x961   : > { %v1786_v39 = vmul.f32 %v4892_v8, %v1776_v4  ;;  %v4908_v4 = vld [vmem:[%s7405_s26 + $0x70] sm:$0xff]  ;;  %5363 = vmatprep.subr.bf16.mxu0 %v5990_v22  ;;  %5367 = vmatprep.mubr.msk.bf16.mxu0 %vm5991_vm2, %v5990_v22 }
 0x962   : > { %v5906_v6 = vpop.eup %5905 }
 0x963   : > { %v1777_v9 = vmul.f32 %v5906_v6, %v1745_v61  ;;  %v1796_v17 = vadd.f32 %v4893_v11, %v1786_v39  ;;  %v1823_v3 = vpop.permute.xlu0 %1822  ;;  %v5772_v6 = vld [vmem:[%s7357_s12 + $0x8] sm:$0xff]   ;;  %v5773_v39 = vld [vmem:[%s7357_s12 + $0x18] sm:$0xff]  }
 0x965   : > { %v1787_v48 = vmul.f32 %v4892_v8, %v1777_v9  ;;  %v4909_v9 = vld [vmem:[%s7405_s26 + $0x78] sm:$0xff] }
 0x966   : > { %v5908_v52 = vpop.eup %5907 }
 0x967   : > { %v1778_v12 = vmul.f32 %v5908_v52, %v1746_v33  ;;  %v1797_v51 = vadd.f32 %v4893_v11, %v1787_v48 }
 0x969   : > { %v1809_v21 = vpack.c.bf16 %v1797_v51, %v1796_v17  ;;  %v1788_v58 = vmul.f32 %v4892_v8, %v1778_v12 }
 0x96a   : > { %v5910_v23 = vpop.eup %5909 }
 0x96b   : > { %v1779_v13 = vmul.f32 %v5910_v23, %v1747_v36  ;;  %5737 = vmatprep.subr.msk.bf16.mxu1 %vm820_vm0, %v1809_v21  ;;  %v1893_v60 = vsel %vm820_vm0, %v1809_v21, 0  ;;  %v1798_v24 = vadd.f32 %v4893_v11, %v1788_v58 }
 0x96c   : > { %5344 = vmatpush3.bf16.xpose.msra.mxu1 %v1893_v60 }
 0x96d   : > { %v1789_v0 = vmul.f32 %v4892_v8, %v1779_v13  ;;  %v5771_v8 = vld [vmem:[%s7357_s12 + $0x10] sm:$0xff]  }
 0x96e   : > { %5364 = vmatpush3.bf16.msra.mxu0 %v5771_v8 }
 0x96f   : > { %v1799_v27 = vadd.f32 %v4893_v11, %v1789_v0  ;;  %5365 = vmatprep.subr.bf16.mxu0 %v5990_v22 }
 0x971   : > { %v1810_v55 = vpack.c.bf16 %v1799_v27, %v1798_v24 }
 0x972   : > { %5366 = vmatpush3.bf16.msra.mxu0 %v5773_v39 }
 0x973   : > { %5738 = vmatprep.subr.msk.bf16.mxu1 %vm820_vm0, %v1810_v55  ;;  %v1896_v62 = vsel %vm820_vm0, %v1810_v55, 0  ;;  %5371 = vmatprep.subr.bf16.mxu0 %v5990_v22 }
 0x974   : > { %5346 = vmatpush3.bf16.xpose.msra.mxu1 %v1896_v62 }
 0x975   : > { %5355 = vmatprep.subr.bf16.mxu1 %v5990_v22 }
 0x97b   : > { %5348 = vmatmul.mubr.msk.bf16.vlgmr.msra.gmra.mrb[8].mxu1 %vm820_vm0, %v5767_v47 }
 0x97c   : > { %5351 = vmatprep.mubr.msk.bf16.mxu1 %vm820_vm0, %v5768_v29  ;;  %5356 = vmatpush3.bf16.msra.mxu1 %v5770_v1 }
 0x97d   : > { %5357 = vmatprep.subr.bf16.mxu1 %v5990_v22 }
 0x980   : > { %5358 = vmatpush3.bf16.msra.mxu1 %v5772_v6 }
 0x981   : > { %5395 = vmatprep.subr.bf16.mxu1 %v5990_v22 }
 0x983   : > { %5352 = vmatmul.mubr.msk.bf16.gmra.mrb[12].mxu1 %vm820_vm0, %v5769_v10 }
 0x984   : > { %5359 = vmatprep.mubr.msk.bf16.mxu1 %vm5991_vm2, %v5990_v22 }
 0xa4e   : > { %v6607_v31 = vpop.f32.mrb[8].mxu1 }
 0xa4f   : > { %v1932_v7 = vpop.f32.mrb[9].mxu1 }
 0xa50   : > { %v1933_v61 = vadd.f32 %v1932_v7, %v1823_v3  ;;  %v5350_v20 = vpop.f32.mrb[10].mxu1 }
 0xa51   : > { %v6609_v14 = vpop.f32.mrb[11].mxu1 }
 0xa52   : > { %v1963_v25 = vmul.f32 %v1933_v61, %v1933_v61 }
 0xa54   : > { %v1971_v18 = vmul.f32 %v1963_v25, %v1933_v61 }
 0xa56   : > { %v1979_v33 = vmul.f32 0.044715, %v1971_v18  ;;  %v6630_v56 = vpop.f32.mrb[12].mxu1 }
 0xa57   : > { %v1948_v59 = vpop.f32.mrb[13].mxu1 }
 0xa58   : > { %v1987_v15 = vadd.f32 %v1979_v33, %v1933_v61  ;;  %v6635_v42 = vpop.f32.mrb[14].mxu1 }
 0xa59   : > { %v1951_v2 = vpop.f32.mrb[15].mxu1 }
 0xa5a   : > { %v1995_v32 = vmul.f32 0.7978846, %v1987_v15 }
 0xa5c   : > { %5911 = vtanh.f32 %v1995_v32  ;;  %v6697_v32 = vld [vmem:[%s7356_s11] ss:$0 sm:$0xff] }
 0xa66   : > { %v5912_v30 = vpop.eup %5911 }
 0xa67   : > { %v2011_v35 = vadd.f32 1.0, %v5912_v30 }
 0xa69   : > { %v2019_v36 = vmul.f32 0.5, %v2011_v35 }
 0xa6b   : > { %v2027_v34 = vmul.f32 %v2019_v36, %v1933_v61 }
 0xa6d   : > { %v2035_v37 = vadd.f32 %v2027_v34, %v6532_v44  ;;  %v4903_v44 = vld [vmem:[%s7405_s26 + $0x48] sm:$0xff] }
 0xa6f   : > { %v2045_v40 = vsel %vm820_vm0, %v2035_v37, 0.0 }
 0xa70   : > { %2046 = vadd.xlane.f32.xlu0 %v2045_v40 }
 0xa86   : > { %1837 = vperm.xlu0 %5752, %v4905_v41  }
 0xafd   : > { %v2047_v43 = vpop.xlane.xlu0 %2046 }
 0xafe   : > { %v2069_v46 = vmul.f32 0.03125, %v2047_v43 }
 0xb00   : > { %v6616_v49 = vsub.f32 %v2035_v37, %v2069_v46 }
 0xb02   : > { %v2085_v50 = vmul.f32 %v6616_v49, %v6616_v49 }
 0xb04   : > { %v2093_v53 = vsel %vm820_vm0, %v2085_v50, 0.0 }
 0xb05   : > { %2094 = vadd.xlane.f32.xlu1 %v2093_v53  ;;  %v1838_v11 = vpop.permute.xlu0 %1837 }
 0xb06   : > { %v6665_v48 = vadd.f32 %v5350_v20, %v1838_v11 }
 0xb08   : > { %v1966_v52 = vmul.f32 %v6665_v48, %v6665_v48 }
 0xb0a   : > { %v1974_v12 = vmul.f32 %v1966_v52, %v6665_v48 }
 0xb0c   : > { %v1982_v21 = vmul.f32 0.044715, %v1974_v12  ;;  %v5775_v12 = vld [vmem:[%s7357_s12 + $0x28] sm:$0xff]  }
 0xb0e   : > { %v1990_v58 = vadd.f32 %v1982_v21, %v6665_v48 }
 0xb10   : > { %v1998_v62 = vmul.f32 0.7978846, %v1990_v58 }
 0xb16   : > { %1827 = vperm.xlu1 %5753, %v4903_v44  }
 0xb1a   : > { %1832 = vperm.xlu1 %5753, %v4904_v54  }
 0xb1e   : > { %1842 = vperm.xlu1 %5753, %v4906_v38  }
 0xb22   : > { %1847 = vperm.xlu1 %5753, %v4907_v63   ;;  %v5774_v63 = vld [vmem:[%s7357_s12 + $0x20] sm:$0xff]  }
 0xb26   : > { %1852 = vperm.xlu1 %5753, %v4908_v4  }
 0xb2a   : > { %1857 = vperm.xlu1 %5753, %v4909_v9  }
 0xb92   : > { %v2095_v17 = vpop.xlane.xlu1 %2094 }
 0xb93   : > { %v2117_v51 = vmul.f32 0.03125, %v2095_v17 }
 0xb95   : > { %v2125_v23 = vadd.f32 1e-05, %v2117_v51 }
 0xb96   : > { %v1828_v13 = vpop.permute.xlu1 %1827 }
 0xb97   : > { %5913 = vrsqrt.f32 %v2125_v23  ;;  %v6671_v60 = vadd.f32 %v6609_v14, %v1828_v13  ;;  %v6689_v14 = vld [vmem:[%s7355_s10] ss:$0 sm:$0xff] }
 0xb98   : > { %5915 = vtanh.f32 %v1998_v62 }
 0xb99   : > { %v1964_v0 = vmul.f32 %v6671_v60, %v6671_v60 }
 0xb9a   : > { %v1833_v24 = vpop.permute.xlu1 %1832 }
 0xb9b   : > { %v1972_v27 = vmul.f32 %v1964_v0, %v6671_v60  ;;  %v6678_v55 = vadd.f32 %v6607_v31, %v1833_v24 }
 0xb9d   : > { %v1980_v47 = vmul.f32 0.044715, %v1972_v27  ;;  %v1965_v29 = vmul.f32 %v6678_v55, %v6678_v55 }
 0xb9e   : > { %v1843_v10 = vpop.permute.xlu1 %1842 }
 0xb9f   : > { %v1988_v3 = vadd.f32 %v1980_v47, %v6671_v60  ;;  %v1973_v7 = vmul.f32 %v1965_v29, %v6678_v55  ;;  %v6684_v61 = vadd.f32 %v1948_v59, %v1843_v10 }
 0xba1   : > { %v5914_v20 = vpop.eup %5913  ;;  %v1996_v31 = vmul.f32 0.7978846, %v1988_v3  ;;  %v1981_v25 = vmul.f32 0.044715, %v1973_v7  ;;  %v1967_v18 = vmul.f32 %v6684_v61, %v6684_v61 }
 0xba2   : > { %v2141_v33 = vmul.f32 %v5914_v20, %v6616_v49  ;;  %v1848_v15 = vpop.permute.xlu1 %1847  ;;  %v5916_v1 = vpop.eup %5915  ;;  %v5776_v20 = vld [vmem:[%s7357_s12 + $0x30] sm:$0xff]  }
 0xba3   : > { %5917 = vtanh.f32 %v1996_v31  ;;  %v1989_v30 = vadd.f32 %v1981_v25, %v6678_v55  ;;  %v1975_v35 = vmul.f32 %v1967_v18, %v6684_v61  ;;  %v6701_v36 = vadd.f32 %v1951_v2, %v1848_v15 }
 0xba4   : > { %v2155_v34 = vmul.f32 %v6689_v14, %v2141_v33 }
 0xba5   : > { %v1997_v37 = vmul.f32 0.7978846, %v1989_v30  ;;  %v1983_v40 = vmul.f32 0.044715, %v1975_v35  ;;  %v1968_v41 = vmul.f32 %v6701_v36, %v6701_v36 }
 0xba6   : > { %v6707_v43 = vadd.f32 %v6697_v32, %v2155_v34  ;;  %v1853_v46 = vpop.permute.xlu1 %1852 }
 0xba7   : > { %5919 = vtanh.f32 %v1997_v37  ;;  %v1991_v49 = vadd.f32 %v1983_v40, %v6684_v61  ;;  %v1976_v50 = vmul.f32 %v1968_v41, %v6701_v36  ;;  %v6712_v53 = vadd.f32 %v6630_v56, %v1853_v46 }
 0xba8   : > { %v6716_v44 = vpack.c.bf16 %v6707_v43, %v6707_v43 }
 0xba9   : > { %v1999_v54 = vmul.f32 0.7978846, %v1991_v49  ;;  %v1984_v38 = vmul.f32 0.044715, %v1976_v50  ;;  %v1969_v59 = vmul.f32 %v6712_v53, %v6712_v53 }
 0xbaa   : > { %5360 = vmatmul.mubr.msk.bf16.vlgmr.msra.gmra.mrb[16].mxu1 %vm820_vm0, %v6716_v44  ;;  %v1858_v2 = vpop.permute.xlu1 %1857  ;;  %v2244_v56 = vshrl.u32 %v6716_v44, 16  ;;  %v2308_v25 = vrot.slane %v6716_v44, 1 }
 0xbab   : > { %5921 = vtanh.f32 %v1999_v54  ;;  %v1992_v4 = vadd.f32 %v1984_v38, %v6701_v36  ;;  %v1977_v8 = vmul.f32 %v1969_v59, %v6712_v53  ;;  %v6729_v6 = vadd.f32 %v6635_v42, %v1858_v2  ;;  %5399 = vmatprep.mubr.msk.bf16.mxu1 %vm5991_vm2, %v5990_v22 }
 0xbac   : > { %5368 = vmatmul.mubr.msk.bf16.vlgmr.msra.gmra.mrb[8].mxu0 %vm820_vm0, %v2244_v56  ;;  %v2014_v42 = vadd.f32 1.0, %v5916_v1 }
 0xbad   : > { %v5918_v9 = vpop.eup %5917  ;;  %v2000_v39 = vmul.f32 0.7978846, %v1992_v4  ;;  %v1985_v11 = vmul.f32 0.044715, %v1977_v8  ;;  %v1970_v52 = vmul.f32 %v6729_v6, %v6729_v6  ;;  %5372 = vmatpush3.bf16.msra.mxu0 %v5774_v63  ;;  %5375 = vmatprep.mubr.msk.bf16.mxu0 %vm5991_vm2, %v5990_v22  ;;  %v2370_v63 = vrot.slane %v2244_v56, 1  ;;  %v5779_v4 = vld [vmem:[%s7357_s12 + $0x48] sm:$0xff]  }
 0xbae   : > { %5373 = vmatprep.subr.bf16.mxu0 %v5990_v22  ;;  %v2012_v17 = vadd.f32 1.0, %v5918_v9  ;;  %v2022_v24 = vmul.f32 0.5, %v2014_v42  ;;  %v2432_v9 = vrot.slane %v6716_v44, 2 }
 0xbaf   : > { %5923 = vtanh.f32 %v2000_v39  ;;  %v1993_v51 = vadd.f32 %v1985_v11, %v6712_v53  ;;  %v1978_v21 = vmul.f32 %v1970_v52, %v6729_v6  ;;  %v5780_v39 = vld [vmem:[%s7359_s14] sm:$0xff]  }
 0xbb0   : > { %v2020_v23 = vmul.f32 0.5, %v2012_v17  ;;  %v2030_v31 = vmul.f32 %v2022_v24, %v6665_v48  ;;  %v5777_v48 = vld [vmem:[%s7357_s12 + $0x38] sm:$0xff]   ;;  %5396 = vmatpush3.bf16.msra.mxu1 %v5780_v39 }
 0xbb1   : > { %v5920_v13 = vpop.eup %5919  ;;  %v2001_v58 = vmul.f32 0.7978846, %v1993_v51  ;;  %v1986_v0 = vmul.f32 0.044715, %v1978_v21  ;;  %5374 = vmatpush3.bf16.msra.mxu0 %v5775_v12  ;;  %5397 = vmatprep.subr.bf16.mxu1 %v5990_v22 }
 0xbb2   : > { %v2028_v27 = vmul.f32 %v2020_v23, %v6671_v60  ;;  %v2013_v62 = vadd.f32 1.0, %v5920_v13  ;;  %5379 = vmatprep.subr.bf16.mxu0 %v5990_v22  ;;  %v2038_v34 = vadd.f32 %v2030_v31, %v6541_v57 }
 0xbb3   : > { %5925 = vtanh.f32 %v2001_v58  ;;  %v1994_v47 = vadd.f32 %v1986_v0, %v6729_v6 }
 0xbb4   : > { %v6750_v29 = vadd.f32 %v2028_v27, %v6535_v19  ;;  %v2021_v10 = vmul.f32 0.5, %v2013_v62  ;;  %v2054_v49 = vsel %vm820_vm0, %v2038_v34, 0.0 }
 0xbb5   : > { %v5922_v3 = vpop.eup %5921  ;;  %v2002_v7 = vmul.f32 0.7978846, %v1994_v47 }
 0xbb6   : > { %v2048_v60 = vsel %vm820_vm0, %v6750_v29, 0.0  ;;  %v2029_v18 = vmul.f32 %v2021_v10, %v6678_v55  ;;  %v2015_v33 = vadd.f32 1.0, %v5922_v3 }
 0xbb7   : > { %5927 = vtanh.f32 %v2002_v7  ;;  %2049 = vadd.xlane.f32.xlu1 %v2048_v60 }
 0xbb8   : > { %5376 = vmatmul.mubr.msk.bf16.vlgmr.msra.gmra.mrb[8].mxu0 %vm820_vm0, %v2308_v25  ;;  %v2037_v19 = vadd.f32 %v2029_v18, %v6545_v45  ;;  %v2023_v15 = vmul.f32 0.5, %v2015_v33 }
 0xbb9   : > { %v5924_v30 = vpop.eup %5923  ;;  %5380 = vmatpush3.bf16.msra.mxu0 %v5776_v20  ;;  %5383 = vmatprep.mubr.msk.bf16.mxu0 %vm5991_vm2, %v5990_v22 }
 0xbba   : > { %v2051_v35 = vsel %vm820_vm0, %v2037_v19, 0.0  ;;  %v2031_v55 = vmul.f32 %v2023_v15, %v6684_v61  ;;  %5381 = vmatprep.subr.bf16.mxu0 %v5990_v22  ;;  %v2016_v37 = vadd.f32 1.0, %v5924_v30 }
 0xbbb   : > { %2052 = vadd.xlane.f32.xlu0 %v2051_v35 }
 0xbbc   : > { %v2039_v45 = vadd.f32 %v2031_v55, %v6553_v16  ;;  %v2024_v40 = vmul.f32 0.5, %v2016_v37  ;;  %v5778_v16 = vld [vmem:[%s7357_s12 + $0x40] sm:$0xff]  }
 0xbbd   : > { %v5926_v41 = vpop.eup %5925  ;;  %5382 = vmatpush3.bf16.msra.mxu0 %v5777_v48 }
 0xbbe   : > { %v2057_v46 = vsel %vm820_vm0, %v2039_v45, 0.0  ;;  %v2032_v50 = vmul.f32 %v2024_v40, %v6701_v36  ;;  %v2017_v54 = vadd.f32 1.0, %v5926_v41  ;;  %5387 = vmatprep.subr.bf16.mxu0 %v5990_v22 }
 0xbbf   : > { %2058 = vadd.xlane.f32.xlu1 %v2057_v46  ;;  %2055 = vadd.xlane.f32.xlu0 %v2054_v49 }
 0xbc0   : > { %v2040_v57 = vadd.f32 %v2032_v50, %v6550_v28  ;;  %v2025_v61 = vmul.f32 0.5, %v2017_v54  ;;  %v2177_v50 = vld [vmem:[%s7358_s13] sm:$0x1] }
 0xbc1   : > { %v5928_v38 = vpop.eup %5927 }
 0xbc2   : > { %v2060_v59 = vsel %vm820_vm0, %v2040_v57, 0.0  ;;  %v2033_v36 = vmul.f32 %v2025_v61, %v6712_v53  ;;  %v2018_v1 = vadd.f32 1.0, %v5928_v38 }
 0xbc3   : > { %2061 = vadd.xlane.f32.xlu0 %v2060_v59 }
 0xbc4   : > { %5384 = vmatmul.mubr.msk.bf16.vlgmr.msra.gmra.mrb[8].mxu0 %vm820_vm0, %v2370_v63  ;;  %v2041_v2 = vadd.f32 %v2033_v36, %v6561_v26  ;;  %v2026_v28 = vmul.f32 0.5, %v2018_v1  ;;  %v5783_v36 = vld [vmem:[%s7359_s14 + $0x18] sm:$0xff]   ;;  %v5784_v1 = vld [vmem:[%s7359_s14 + $0x20] sm:$0xff]  }
 0xbc5   : > { %5388 = vmatpush3.bf16.msra.mxu0 %v5778_v16  ;;  %5391 = vmatprep.mubr.msk.bf16.mxu0 %vm5991_vm2, %v5990_v22 }
 0xbc6   : > { %v2063_v8 = vsel %vm820_vm0, %v2041_v2, 0.0  ;;  %v2034_v56 = vmul.f32 %v2026_v28, %v6729_v6  ;;  %5389 = vmatprep.subr.bf16.mxu0 %v5990_v22  ;;  %v5781_v6 = vld [vmem:[%s7359_s14 + $0x8] sm:$0xff]  }
 0xbc7   : > { %2064 = vadd.xlane.f32.xlu1 %v2063_v8  ;;  %5398 = vmatpush3.bf16.msra.mxu1 %v5781_v6 }
 0xbc8   : > { %v2042_v53 = vadd.f32 %v2034_v56, %v6558_v5 }
 0xbc9   : > { %5390 = vmatpush3.bf16.msra.mxu0 %v5779_v4 }
 0xbca   : > { %v2066_v26 = vsel %vm820_vm0, %v2042_v53, 0.0 }
 0xbcb   : > { %2067 = vadd.xlane.f32.xlu0 %v2066_v26 }
 0xbd0   : > { %5392 = vmatmul.mubr.msk.bf16.vlgmr.msra.gmra.mrb[8].mxu0 %vm820_vm0, %v2432_v9 }
 0xc44   : > { %v2050_v5 = vpop.xlane.xlu1 %2049 }
 0xc45   : > { %v2070_v11 = vmul.f32 0.03125, %v2050_v5 }
 0xc47   : > { %v6806_v52 = vsub.f32 %v6750_v29, %v2070_v11 }
 0xc48   : > { %v2053_v44 = vpop.xlane.xlu0 %2052 }
 0xc49   : > { %v2071_v12 = vmul.f32 0.03125, %v2053_v44  ;;  %v2086_v42 = vmul.f32 %v6806_v52, %v6806_v52 }
 0xc4b   : > { %v6810_v17 = vsub.f32 %v2037_v19, %v2071_v12  ;;  %v2096_v51 = vsel %vm820_vm0, %v2086_v42, 0.0 }
 0xc4c   : > { %2097 = vadd.xlane.f32.xlu1 %v2096_v51  ;;  %v2059_v21 = vpop.xlane.xlu1 %2058  ;;  %v2056_v23 = vpop.xlane.xlu0 %2055 }
 0xc4d   : > { %v2073_v13 = vmul.f32 0.03125, %v2059_v21  ;;  %v2072_v58 = vmul.f32 0.03125, %v2056_v23  ;;  %v2087_v0 = vmul.f32 %v6810_v17, %v6810_v17 }
 0xc4f   : > { %v6815_v24 = vsub.f32 %v2039_v45, %v2073_v13  ;;  %v6817_v27 = vsub.f32 %v2038_v34, %v2072_v58  ;;  %v2099_v62 = vsel %vm820_vm0, %v2087_v0, 0.0  ;;  %v5782_v45 = vld [vmem:[%s7359_s14 + $0x10] sm:$0xff]  }
 0xc50   : > { %2100 = vadd.xlane.f32.xlu0 %v2099_v62  ;;  %v2062_v47 = vpop.xlane.xlu0 %2061  ;;  %5403 = vmatprep.subr.bf16.mxu1 %v5782_v45 }
 0xc51   : > { %v2074_v29 = vmul.f32 0.03125, %v2062_v47  ;;  %v2089_v10 = vmul.f32 %v6815_v24, %v6815_v24  ;;  %v2088_v3 = vmul.f32 %v6817_v27, %v6817_v27 }
 0xc53   : > { %v6824_v7 = vsub.f32 %v2040_v57, %v2074_v29  ;;  %v2105_v20 = vsel %vm820_vm0, %v2089_v10, 0.0  ;;  %v2102_v31 = vsel %vm820_vm0, %v2088_v3, 0.0 }
 0xc54   : > { %v2065_v60 = vpop.xlane.xlu1 %2064  ;;  %2106 = vadd.xlane.f32.xlu0 %v2105_v20  ;;  %2103 = vadd.xlane.f32.xlu1 %v2102_v31 }
 0xc55   : > { %v2075_v25 = vmul.f32 0.03125, %v2065_v60  ;;  %v2090_v18 = vmul.f32 %v6824_v7, %v6824_v7 }
 0xc57   : > { %v6830_v33 = vsub.f32 %v2041_v2, %v2075_v25  ;;  %v2108_v19 = vsel %vm820_vm0, %v2090_v18, 0.0 }
 0xc58   : > { %2109 = vadd.xlane.f32.xlu1 %v2108_v19  ;;  %v2068_v15 = vpop.xlane.xlu0 %2067 }
 0xc59   : > { %v2076_v30 = vmul.f32 0.03125, %v2068_v15  ;;  %v2091_v48 = vmul.f32 %v6830_v33, %v6830_v33 }
 0xc5b   : > { %v6835_v35 = vsub.f32 %v2042_v53, %v2076_v30  ;;  %v2111_v55 = vsel %vm820_vm0, %v2091_v48, 0.0 }
 0xc5c   : > { %2112 = vadd.xlane.f32.xlu0 %v2111_v55 }
 0xc5d   : > { %v2092_v34 = vmul.f32 %v6835_v35, %v6835_v35 }
 0xc5f   : > { %v2114_v37 = vsel %vm820_vm0, %v2092_v34, 0.0 }
 0xc60   : > { %2115 = vadd.xlane.f32.xlu1 %v2114_v37 }
 0xc7d   : > { %v2232_v40 = vpop.f32.mrb[16].mxu1 }
 0xc7e   : > { %v5361_v41 = vpop.f32.mrb[17].mxu1  ;;  %v2238_v54 = vadd.f32 %v2232_v40, %v2177_v50 }
 0xc7f   : > { %v2235_v46 = vpop.f32.mrb[18].mxu1 }
 0xc80   : > { %v5362_v49 = vpop.f32.mrb[19].mxu1 }
 0xca3   : > { %v2482_v57 = vpop.f32.mrb[8].mxu0 }
 0xca4   : > { %v5690_v61 = vadd.f32 %v2482_v57, %v2238_v54  ;;  %v5393_v38 = vpop.f32.mrb[9].mxu0 }
 0xca5   : > { %v2485_v16 = vpop.f32.mrb[10].mxu0 }
 0xca6   : > { %v2493_v59 = vpack.c.bf16 %v5690_v61, %v5690_v61  ;;  %v5394_v63 = vpop.f32.mrb[11].mxu0  ;;  %v2754_v16 = vld [vmem:[%s7361_s16 + $0x10] sm:$0xff] }
 0xca8   : > { %5400 = vmatmul.mubr.msk.bf16.vlgmr.msra.gmra.mrb[20].mxu1 %vm820_vm0, %v2493_v59  ;;  %v2755_v59 = vld [vmem:[%s7361_s16 + $0x18] sm:$0xff] }
 0xca9   : > { %5404 = vmatpush3.bf16.msra.mxu1 %v5782_v45  ;;  %v5665_v63 = vpack.c.bf16 %v2755_v59, %v2754_v16 }
 0xcaa   : > { %5405 = vmatprep.subr.bf16.mxu1 %v5783_v36 }
 0xcad   : > { %5406 = vmatpush3.bf16.msra.mxu1 %v5783_v36 }
 0xcae   : > { %5415 = vmatprep.subr.bf16.mxu1 %v5784_v1 }
 0xcd9   : > { %v2098_v2 = vpop.xlane.xlu1 %2097 }
 0xcda   : > { %v2118_v28 = vmul.f32 0.03125, %v2098_v2 }
 0xcdc   : > { %v2126_v4 = vadd.f32 1e-05, %v2118_v28 }
 0xcdd   : > { %v2101_v8 = vpop.xlane.xlu0 %2100 }
 0xcde   : > { %5929 = vrsqrt.f32 %v2126_v4  ;;  %v2119_v56 = vmul.f32 0.03125, %v2101_v8  ;;  %v2740_v4 = vlaneseq }
 0xce0   : > { %v2127_v53 = vadd.f32 1e-05, %v2119_v56  ;;  %v6921_v8 = vshrl.u32 %v2740_v4, 7  ;;  %v2494_v56 = vld [vmem:[%s7360_s15] sm:$0x1] }
 0xce1   : > { %v2104_v26 = vpop.xlane.xlu1 %2103  ;;  %v2107_v9 = vpop.xlane.xlu0 %2106 }
 0xce2   : > { %5931 = vrsqrt.f32 %v2127_v53  ;;  %v2120_v39 = vmul.f32 0.03125, %v2104_v26  ;;  %v2121_v6 = vmul.f32 0.03125, %v2107_v9  ;;  %v2742_v26 = vsub.s32 0, %v6921_v8  ;;  %v4958_v9 = vld [vmem:[%s7360_s15 + $0x1] ss:$0 sm:$0xff] }
 0xce4   : > { %v2128_v5 = vadd.f32 1e-05, %v2120_v39  ;;  %v2129_v11 = vadd.f32 1e-05, %v2121_v6 }
 0xce5   : > { %v2110_v44 = vpop.xlane.xlu1 %2109 }
 0xce6   : > { %5933 = vrsqrt.f32 %v2128_v5  ;;  %v2122_v12 = vmul.f32 0.03125, %v2110_v44 }
 0xce7   : > { %5935 = vrsqrt.f32 %v2129_v11 }
 0xce8   : > { %v5930_v42 = vpop.eup %5929  ;;  %v2130_v51 = vadd.f32 1e-05, %v2122_v12 }
 0xce9   : > { %v2142_v21 = vmul.f32 %v5930_v42, %v6806_v52  ;;  %v2113_v23 = vpop.xlane.xlu0 %2112 }
 0xcea   : > { %5937 = vrsqrt.f32 %v2130_v51  ;;  %v2123_v13 = vmul.f32 0.03125, %v2113_v23 }
 0xceb   : > { %v2156_v58 = vmul.f32 %v6689_v14, %v2142_v21 }
 0xcec   : > { %v5932_v0 = vpop.eup %5931  ;;  %v2131_v62 = vadd.f32 1e-05, %v2123_v13 }
 0xced   : > { %v2143_v47 = vmul.f32 %v5932_v0, %v6810_v17  ;;  %v2116_v29 = vpop.xlane.xlu1 %2115  ;;  %v6858_v10 = vadd.f32 %v6697_v32, %v2156_v58 }
 0xcee   : > { %5939 = vrsqrt.f32 %v2131_v62  ;;  %v2124_v3 = vmul.f32 0.03125, %v2116_v29 }
 0xcef   : > { %v2555_v20 = vpack.c.bf16 %v6858_v10, %v6707_v43  ;;  %v2157_v25 = vmul.f32 %v6689_v14, %v2143_v47 }
 0xcf0   : > { %v5934_v31 = vpop.eup %5933  ;;  %v2132_v52 = vadd.f32 1e-05, %v2124_v3 }
 0xcf1   : > { %v5936_v60 = vpop.eup %5935  ;;  %v2144_v18 = vmul.f32 %v5934_v31, %v6817_v27  ;;  %5407 = vmatprep.mubr.msk.bf16.mxu1 %vm820_vm0, %v2555_v20  ;;  %v6869_v48 = vadd.f32 %v6697_v32, %v2157_v25 }
 0xcf2   : > { %v2145_v17 = vmul.f32 %v5936_v60, %v6815_v24  ;;  %5941 = vrsqrt.f32 %v2132_v52  ;;  %v5785_v24 = vld [vmem:[%s7359_s14 + $0x28] sm:$0xff]  }
 0xcf3   : > { %v2158_v19 = vmul.f32 %v6689_v14, %v2144_v18 }
 0xcf4   : > { %v5938_v15 = vpop.eup %5937  ;;  %v2159_v34 = vmul.f32 %v6689_v14, %v2145_v17 }
 0xcf5   : > { %v2146_v30 = vmul.f32 %v5938_v15, %v6824_v7  ;;  %v6872_v55 = vadd.f32 %v6697_v32, %v2158_v19 }
 0xcf6   : > { %v6884_v40 = vadd.f32 %v6697_v32, %v2159_v34 }
 0xcf7   : > { %v2556_v27 = vpack.c.bf16 %v6872_v55, %v6869_v48  ;;  %v2160_v37 = vmul.f32 %v6689_v14, %v2146_v30 }
 0xcf8   : > { %v5940_v45 = vpop.eup %5939 }
 0xcf9   : > { %v2147_v7 = vmul.f32 %v5940_v45, %v6830_v33  ;;  %5408 = vmatmul.mubr.msk.bf16.vlgmr.msra.gmra.mrb[24].mxu1 %vm820_vm0, %v2556_v27  ;;  %v6887_v41 = vadd.f32 %v6697_v32, %v2160_v37 }
 0xcfa   : > { %5416 = vmatpush3.bf16.msra.mxu1 %v5784_v1 }
 0xcfb   : > { %v2557_v46 = vpack.c.bf16 %v6887_v41, %v6884_v40  ;;  %5417 = vmatprep.subr.bf16.mxu1 %v5785_v24  ;;  %v2161_v33 = vmul.f32 %v6689_v14, %v2147_v7 }
 0xcfc   : > { %v5942_v49 = vpop.eup %5941 }
 0xcfd   : > { %v2148_v50 = vmul.f32 %v5942_v49, %v6835_v35  ;;  %5411 = vmatprep.mubr.msk.bf16.mxu1 %vm820_vm0, %v2557_v46  ;;  %v6896_v57 = vadd.f32 %v6697_v32, %v2161_v33 }
 0xcfe   : > { %5418 = vmatpush3.bf16.msra.mxu1 %v5785_v24 }
 0xcff   : > { %v2162_v54 = vmul.f32 %v6689_v14, %v2148_v50  ;;  %v2752_v14 = vld [vmem:[%s7361_s16] sm:$0xff] }
 0xd01   : > { %v6899_v61 = vadd.f32 %v6697_v32, %v2162_v54  ;;  %v2753_v32 = vld [vmem:[%s7361_s16 + $0x8] sm:$0xff] }
 0xd02   : > { %v5661_v35 = vpack.c.bf16 %v2753_v32, %v2752_v14 }
 0xd03   : > { %v2558_v38 = vpack.c.bf16 %v6899_v61, %v6896_v57 }
 0xd04   : > { %5662 = vmatprep.subr.bf16.mxu0 %v5661_v35 }
 0xd05   : > { %5412 = vmatmul.mubr.msk.bf16.gmra.mrb[28].mxu1 %vm820_vm0, %v2558_v38  ;;  %5664 = vmatpush3.bf16.msra.mxu0 %v5661_v35 }
 0xd06   : > { %5419 = vmatprep.mubr.msk.bf16.mxu1 %vm820_vm0, %v2555_v20  ;;  %5666 = vmatprep.subr.bf16.mxu0 %v5665_v63 }
 0xd09   : > { %5668 = vmatpush3.bf16.msra.mxu0 %v5665_v63 }
 0xd0a   : > { %5461 = vmatprep.subr.bf16.mxu0 %v5990_v22 }
 0xd0d   : > { %5420 = vmatmul.mubr.msk.bf16.vlgmr.msra.gmra.mrb[32].mxu1 %vm820_vm0, %v2556_v27 }
 0xd0e   : > { %5423 = vmatprep.mubr.msk.bf16.mxu1 %vm820_vm0, %v2557_v46  ;;  %v2969_v46 = vld [vmem:[%s7362_s17] sm:$0xf] }
 0xd0f   : > { %5447 = vmatprep.subr.msk.mxu1 %vm2994_vm3, %v2969_v46 }
 0xd10   : > { %5448 = vmatpush3.msk.msra.mxu1 %vm2994_vm3, %v2969_v46 }
 0xd15   : > { %5424 = vmatmul.mubr.msk.bf16.gmra.mrb[36].mxu1 %vm820_vm0, %v2558_v38 }
 0xd7b   : > { %v2544_v36 = vpop.f32.mrb[20].mxu1 }
 0xd7c   : > { %v5401_v1 = vpop.f32.mrb[21].mxu1  ;;  %v2545_v53 = vadd.f32 %v2544_v36, %v2494_v56 }
 0xd7d   : > { %v2547_v2 = vpop.f32.mrb[22].mxu1 }
 0xd7e   : > { %v5402_v28 = vpop.f32.mrb[23].mxu1  ;;  %v2743_v6 = vrot.slane %v2545_v53, %v2742_v26 }
 0xdcc   : > { %v5409_v39 = vpop.f32.mrb[24].mxu1 }
 0xdcd   : > { %v2631_v5 = vadd.f32 %v5409_v39, %v4958_v9  ;;  %v2622_v11 = vpop.f32.mrb[25].mxu1 }
 0xdce   : > { %v2623_v44 = vadd.f32 %v4958_v9, %v2622_v11  ;;  %v5410_v12 = vpop.f32.mrb[26].mxu1 }
 0xdcf   : > { %v2746_v42 = vmul.f32 %v2743_v6, %v2631_v5  ;;  %v2634_v51 = vadd.f32 %v5410_v12, %v4958_v9  ;;  %v2625_v21 = vpop.f32.mrb[27].mxu1 }
 0xdd0   : > { %v2744_v23 = vmul.f32 %v2743_v6, %v2623_v44  ;;  %v2626_v13 = vadd.f32 %v4958_v9, %v2625_v21 }
 0xdd1   : > { %v2747_v58 = vmul.f32 %v2743_v6, %v2634_v51 }
 0xdd2   : > { %v2745_v0 = vmul.f32 %v2743_v6, %v2626_v13  ;;  %5435 = vmatprep.mubr.msk.f32.mxu0 %vm820_vm0, %v2744_v23 }
 0xdd4   : > { %5436 = vmatmul.mubr.msk.f32.vlgmr.msra.gmra.mrb[12].mxu0 %vm820_vm0, %v2745_v0 }
 0xdd5   : > { %5438 = vmatprep.mubr.msk.f32.mxu0 %vm820_vm0, %v2746_v42 }
 0xdd8   : > { %v5413_v62 = vpop.f32.mrb[28].mxu1  ;;  %5439 = vmatmul.mubr.msk.f32.gmra.mrb[14].mxu0 %vm820_vm0, %v2747_v58 }
 0xdd9   : > { %v2647_v47 = vadd.f32 %v5413_v62, %v4958_v9  ;;  %v2638_v29 = vpop.f32.mrb[29].mxu1 }
 0xdda   : > { %v2639_v3 = vadd.f32 %v4958_v9, %v2638_v29  ;;  %v5414_v20 = vpop.f32.mrb[30].mxu1 }
 0xddb   : > { %v2750_v31 = vmul.f32 %v2743_v6, %v2647_v47  ;;  %v2650_v52 = vadd.f32 %v5414_v20, %v4958_v9  ;;  %v2641_v60 = vpop.f32.mrb[31].mxu1 }
 0xddc   : > { %v2748_v25 = vmul.f32 %v2743_v6, %v2639_v3  ;;  %v2642_v18 = vadd.f32 %v4958_v9, %v2641_v60 }
 0xddd   : > { %v2751_v17 = vmul.f32 %v2743_v6, %v2650_v52 }
 0xdde   : > { %v2749_v19 = vmul.f32 %v2743_v6, %v2642_v18  ;;  %5441 = vmatprep.mubr.msk.f32.mxu0 %vm820_vm0, %v2748_v25 }
 0xde0   : > { %v6937_v15 = vpop.f32.mrb[32].mxu1  ;;  %5442 = vmatmul.mubr.msk.f32.gmra.mrb[16].mxu0 %vm820_vm0, %v2749_v19 }
 0xde1   : > { %v6940_v30 = vpop.f32.mrb[33].mxu1  ;;  %5444 = vmatprep.mubr.msk.f32.mxu0 %vm820_vm0, %v2750_v31 }
 0xde2   : > { %v6943_v34 = vpop.f32.mrb[34].mxu1 }
 0xde3   : > { %v6945_v27 = vpop.f32.mrb[35].mxu1 }
 0xde4   : > { %5445 = vmatmul.mubr.msk.f32.gmra.mrb[18].mxu0 %vm820_vm0, %v2751_v17 }
 0xde5   : > { %5465 = vmatprep.mubr.msk.bf16.mxu0 %vm5991_vm2, %v5990_v22 }
 0xde8   : > { %v6950_v37 = vpop.f32.mrb[36].mxu1 }
 0xde9   : > { %v6952_v24 = vpop.f32.mrb[37].mxu1 }
 0xdea   : > { %v6954_v45 = vpop.f32.mrb[38].mxu1 }
 0xdeb   : > { %v6956_v7 = vpop.f32.mrb[39].mxu1 }
 0xea7   : > { %v5437_v49 = vpop.f32.mrb[12].mxu0 }
 0xea8   : > { %v2846_v50 = vpop.f32.mrb[13].mxu0  ;;  %v2886_v38 = vmul.f32 0.35355338, %v5437_v49 }
 0xea9   : > { %v2885_v14 = vmul.f32 0.35355338, %v2846_v50 }
 0xeaa   : > { %v2895_v63 = vsel %vm2893_vm4, %v2886_v38, -inf }
 0xeab   : > { %v5440_v33 = vpop.f32.mrb[14].mxu0  ;;  %v2894_v2 = vsel %vm2893_vm4, %v2885_v14, -inf }
 0xeac   : > { %v2856_v54 = vpop.f32.mrb[15].mxu0  ;;  %v2888_v36 = vmul.f32 0.35355338, %v5440_v33 }
 0xead   : > { %v2887_v28 = vmul.f32 0.35355338, %v2856_v54 }
 0xeae   : > { %v2897_v11 = vsel %vm2893_vm4, %v2888_v36, -inf }
 0xeaf   : > { %v2896_v42 = vsel %vm2893_vm4, %v2887_v28, -inf }
 0xeb3   : > { %v5443_v32 = vpop.f32.mrb[16].mxu0 }
 0xeb4   : > { %v2890_v35 = vmul.f32 0.35355338, %v5443_v32  ;;  %v2866_v16 = vpop.f32.mrb[17].mxu0 }
 0xeb5   : > { %v2889_v59 = vmul.f32 0.35355338, %v2866_v16 }
 0xeb6   : > { %v2900_v1 = vsel %vm2893_vm4, %v2890_v35, -inf }
 0xeb7   : > { %v2901_v4 = vmax.f32 %v2895_v63, %v2900_v1  ;;  %v2898_v56 = vsel %vm2893_vm4, %v2889_v59, -inf  ;;  %v5446_v53 = vpop.f32.mrb[18].mxu0 }
 0xeb8   : > { %v2899_v9 = vmax.f32 %v2894_v2, %v2898_v56  ;;  %v2892_v39 = vmul.f32 0.35355338, %v5446_v53  ;;  %v2876_v6 = vpop.f32.mrb[19].mxu0 }
 0xeb9   : > { %v2891_v5 = vmul.f32 0.35355338, %v2876_v6 }
 0xeba   : > { %v2906_v44 = vmax.f32 %v2899_v9, %v2901_v4  ;;  %v2904_v12 = vsel %vm2893_vm4, %v2892_v39, -inf }
 0xebb   : > { %v2905_v51 = vmax.f32 %v2897_v11, %v2904_v12  ;;  %v2902_v21 = vsel %vm2893_vm4, %v2891_v5, -inf }
 0xebc   : > { %v2903_v23 = vmax.f32 %v2896_v42, %v2902_v21 }
 0xebe   : > { %v2907_v13 = vmax.f32 %v2903_v23, %v2905_v51 }
 0xec0   : > { %v2908_v58 = vmax.f32 %v2906_v44, %v2907_v13 }
 0xec2   : > { %v2909_v0 = vrot.slane %v2908_v58, 4 }
 0xec4   : > { %v2910_v62 = vmax.f32 %v2908_v58, %v2909_v0 }
 0xec6   : > { %v2911_v47 = vrot.slane %v2910_v62, 2 }
 0xec8   : > { %v2912_v29 = vmax.f32 %v2910_v62, %v2911_v47 }
 0xeca   : > { %v2913_v3 = vrot.slane %v2912_v29, 1 }
 0xecc   : > { %v2914_v20 = vmax.f32 %v2912_v29, %v2913_v3 }
 0xece   : > { %v2915_v31 = vsub.f32 %v2885_v14, %v2914_v20  ;;  %v2916_v52 = vsub.f32 %v2886_v38, %v2914_v20  ;;  %v2917_v60 = vsub.f32 %v2887_v28, %v2914_v20  ;;  %v2918_v25 = vsub.f32 %v2888_v36, %v2914_v20 }
 0xecf   : > { %v2919_v18 = vsub.f32 %v2889_v59, %v2914_v20  ;;  %v2920_v17 = vsub.f32 %v2890_v35, %v2914_v20  ;;  %v2921_v19 = vsub.f32 %v2891_v5, %v2914_v20  ;;  %v2922_v46 = vsub.f32 %v2892_v39, %v2914_v20 }
 0xed0   : > { %v2923_v49 = vmul.f32 1.442695, %v2915_v31  ;;  %v2925_v50 = vmul.f32 1.442695, %v2916_v52  ;;  %v2927_v33 = vmul.f32 1.442695, %v2917_v60 }
 0xed1   : > { %v2929_v54 = vmul.f32 1.442695, %v2918_v25  ;;  %v2931_v32 = vmul.f32 1.442695, %v2919_v18  ;;  %v2933_v16 = vmul.f32 1.442695, %v2920_v17 }
 0xed2   : > { %5943 = vpow2.f32 %v2923_v49  ;;  %v2935_v63 = vmul.f32 1.442695, %v2921_v19  ;;  %v2937_v38 = vmul.f32 1.442695, %v2922_v46 }
 0xed3   : > { %5945 = vpow2.f32 %v2925_v50  ;;  %v5786_v50 = vld [vmem:[%s7359_s14 + $0x30] sm:$0xff]  }
 0xed4   : > { %5947 = vpow2.f32 %v2927_v33  ;;  %5462 = vmatpush3.bf16.msra.mxu0 %v5786_v50  ;;  %v5787_v33 = vld [vmem:[%s7359_s14 + $0x38] sm:$0xff]   ;;  %v5792_v50 = vld [vmem:[%s7363_s18 + $0x10] sm:$0xff]  }
 0xed5   : > { %5949 = vpow2.f32 %v2929_v54  ;;  %5463 = vmatprep.subr.bf16.mxu0 %v5990_v22  ;;  %v4969_v54 = vld [vmem:[%s7360_s15 + $0x2] ss:$0 sm:$0xff] }
 0xed6   : > { %5951 = vpow2.f32 %v2931_v32  ;;  %v2713_v32 = vadd.f32 %v4969_v54, %v6945_v27  ;;  %v2729_v27 = vadd.f32 %v4969_v54, %v6956_v7 }
 0xed7   : > { %5953 = vpow2.f32 %v2933_v16  ;;  %v2710_v16 = vadd.f32 %v4969_v54, %v6940_v30  ;;  %v2726_v30 = vadd.f32 %v4969_v54, %v6952_v24 }
 0xed8   : > { %5955 = vpow2.f32 %v2935_v63  ;;  %5464 = vmatpush3.bf16.msra.mxu0 %v5787_v33  ;;  %v5793_v33 = vld [vmem:[%s7363_s18 + $0x30] sm:$0xff]  }
 0xed9   : > { %5957 = vpow2.f32 %v2937_v38 }
 0xedc   : > { %v5944_v14 = vpop.eup %5943 }
 0xedd   : > { %v5946_v59 = vpop.eup %5945  ;;  %v2939_v35 = vsel %vm2893_vm4, %v5944_v14, 0.0 }
 0xede   : > { %v5948_v36 = vpop.eup %5947  ;;  %v2940_v1 = vsel %vm2893_vm4, %v5946_v59, 0.0 }
 0xedf   : > { %v5950_v2 = vpop.eup %5949  ;;  %v2941_v28 = vadd.f32 %v2940_v1, %v2939_v35  ;;  %v2942_v4 = vsel %vm2893_vm4, %v5948_v36, 0.0  ;;  %v2721_v35 = vadd.f32 %v6943_v34, %v4969_v54  ;;  %v2718_v1 = vadd.f32 %v6937_v15, %v4969_v54 }
 0xee0   : > { %v5952_v56 = vpop.eup %5951  ;;  %v2944_v9 = vsel %vm2893_vm4, %v5950_v2, 0.0 }
 0xee1   : > { %v2943_v53 = vadd.f32 %v2942_v4, %v2941_v28  ;;  %v5954_v39 = vpop.eup %5953  ;;  %v2946_v5 = vsel %vm2893_vm4, %v5952_v56, 0.0 }
 0xee2   : > { %v5956_v11 = vpop.eup %5955  ;;  %v2948_v12 = vsel %vm2893_vm4, %v5954_v39, 0.0 }
 0xee3   : > { %v2945_v6 = vadd.f32 %v2944_v9, %v2943_v53  ;;  %v5958_v42 = vpop.eup %5957  ;;  %v2950_v21 = vsel %vm2893_vm4, %v5956_v11, 0.0 }
 0xee4   : > { %v2952_v13 = vsel %vm2893_vm4, %v5958_v42, 0.0 }
 0xee5   : > { %v2947_v44 = vadd.f32 %v2946_v5, %v2945_v6 }
 0xee7   : > { %v2949_v51 = vadd.f32 %v2948_v12, %v2947_v44  ;;  %v2737_v12 = vadd.f32 %v6954_v45, %v4969_v54 }
 0xee9   : > { %v2951_v23 = vadd.f32 %v2950_v21, %v2949_v51  ;;  %v2734_v51 = vadd.f32 %v6950_v37, %v4969_v54  ;;  %v5794_v54 = vld [vmem:[%s7363_s18 + $0x18] sm:$0xff]  }
 0xeeb   : > { %v2953_v58 = vadd.f32 %v2952_v13, %v2951_v23 }
 0xeed   : > { %v2954_v0 = vrot.slane %v2953_v58, 4 }
 0xeef   : > { %v2955_v62 = vadd.f32 %v2954_v0, %v2953_v58 }
 0xef1   : > { %v2956_v47 = vrot.slane %v2955_v62, 2 }
 0xef3   : > { %v2957_v29 = vadd.f32 %v2956_v47, %v2955_v62 }
 0xef5   : > { %v2958_v3 = vrot.slane %v2957_v29, 1 }
 0xef7   : > { %v2959_v20 = vadd.f32 %v2958_v3, %v2957_v29 }
 0xef9   : > { %5959 = vrcp.f32 %v2959_v20 }
 0xf03   : > { %v5960_v31 = vpop.eup %5959 }
 0xf04   : > { %v2961_v52 = vmul.f32 %v5960_v31, %v5944_v14  ;;  %v2962_v60 = vmul.f32 %v5960_v31, %v5946_v59  ;;  %v2963_v25 = vmul.f32 %v5960_v31, %v5948_v36  ;;  %v2964_v18 = vmul.f32 %v5960_v31, %v5950_v2 }
 0xf05   : > { %v2965_v17 = vmul.f32 %v5960_v31, %v5952_v56  ;;  %v2966_v19 = vmul.f32 %v5960_v31, %v5954_v39  ;;  %v2967_v46 = vmul.f32 %v5960_v31, %v5956_v11  ;;  %v2968_v49 = vmul.f32 %v5960_v31, %v5958_v42 }
 0xf06   : > { %5449 = vmatprep.mubr.msk.f32.mxu1 %vm2893_vm4, %v2961_v52 }
 0xf07   : > { %5450 = vmatmul.mubr.msk.f32.vlgmr.msra.gmra.mrb[40].mxu1 %vm2893_vm4, %v2962_v60 }
 0xf08   : > { %5452 = vmatprep.mubr.msk.f32.mxu1 %vm2893_vm4, %v2963_v25 }
 0xf0b   : > { %5453 = vmatmul.mubr.msk.f32.gmra.mrb[42].mxu1 %vm2893_vm4, %v2964_v18 }
 0xf0c   : > { %5455 = vmatprep.mubr.msk.f32.mxu1 %vm2893_vm4, %v2965_v17  ;;  %v5788_v17 = vld [vmem:[%s7363_s18] sm:$0xff]  }
 0xf0d   : > { %5469 = vmatprep.subr.bf16.mxu1 %v5788_v17 }
 0xf0e   : > { %5470 = vmatpush3.bf16.msra.mxu1 %v5788_v17 }
 0xf0f   : > { %5456 = vmatmul.mubr.msk.f32.gmra.mrb[44].mxu1 %vm2893_vm4, %v2966_v19  ;;  %v5789_v19 = vld [vmem:[%s7363_s18 + $0x20] sm:$0xff]  }
 0xf10   : > { %5458 = vmatprep.mubr.msk.f32.mxu1 %vm2893_vm4, %v2967_v46  ;;  %v5790_v46 = vld [vmem:[%s7363_s18 + $0x8] sm:$0xff]   ;;  %5481 = vmatprep.subr.bf16.mxu0 %v5789_v19 }
 0xf11   : > { %5471 = vmatprep.subr.bf16.mxu1 %v5790_v46 }
 0xf12   : > { %5472 = vmatpush3.bf16.msra.mxu1 %v5790_v46 }
 0xf13   : > { %5459 = vmatmul.mubr.msk.f32.gmra.mrb[46].mxu1 %vm2893_vm4, %v2968_v49  ;;  %v5791_v49 = vld [vmem:[%s7363_s18 + $0x28] sm:$0xff]   ;;  %5473 = vmatprep.subr.bf16.mxu1 %v5792_v50 }
 0xf16   : > { %5474 = vmatpush3.bf16.msra.mxu1 %v5792_v50 }
 0xf17   : > { %5475 = vmatprep.subr.bf16.mxu1 %v5794_v54 }
 0xf1a   : > { %5476 = vmatpush3.bf16.msra.mxu1 %v5794_v54 }
 0xfda   : > { %v5451_v63 = vpop.f32.mrb[40].mxu1 }
 0xfdb   : > { %v3104_v38 = vmul.f32 %v5451_v63, %v2713_v32  ;;  %v3064_v14 = vpop.f32.mrb[41].mxu1  ;;  %v5795_v32 = vld [vmem:[%s7363_s18 + $0x38] sm:$0xff]  }
 0xfdc   : > { %v3103_v59 = vmul.f32 %v3064_v14, %v2710_v16  ;;  %v5796_v16 = vld [vmem:[%s7363_s18 + $0x40] sm:$0xff]  }
 0xfdd   : > { %v3112_v36 = vsel %vm820_vm0, %v3104_v38, 0.0  ;;  %5493 = vmatprep.subr.bf16.mxu1 %v5796_v16 }
 0xfde   : > { %v3111_v2 = vsel %vm820_vm0, %v3103_v59, 0.0  ;;  %v5454_v28 = vpop.f32.mrb[42].mxu1 }
 0xfdf   : > { %v3113_v4 = vadd.f32 %v3112_v36, %v3111_v2  ;;  %v3106_v56 = vmul.f32 %v5454_v28, %v2721_v35  ;;  %v3074_v53 = vpop.f32.mrb[43].mxu1  ;;  %v5000_v35 = vld [vmem:[%s7360_s15 + $0x3] ss:$0 sm:$0xff] }
 0xfe0   : > { %v3105_v9 = vmul.f32 %v3074_v53, %v2718_v1 }
 0xfe1   : > { %v3116_v44 = vsel %vm820_vm0, %v3106_v56, 0.0 }
 0xfe2   : > { %v3114_v39 = vsel %vm820_vm0, %v3105_v9, 0.0  ;;  %v5457_v6 = vpop.f32.mrb[44].mxu1 }
 0xfe3   : > { %v3115_v5 = vadd.f32 %v3114_v39, %v3113_v4  ;;  %v3108_v34 = vmul.f32 %v5457_v6, %v2729_v27  ;;  %v3084_v11 = vpop.f32.mrb[45].mxu1 }
 0xfe4   : > { %v3107_v15 = vmul.f32 %v3084_v11, %v2726_v30  ;;  %v5797_v11 = vld [vmem:[%s7363_s18 + $0x48] sm:$0xff]  }
 0xfe5   : > { %v3117_v42 = vadd.f32 %v3116_v44, %v3115_v5  ;;  %v3120_v58 = vsel %vm820_vm0, %v3108_v34, 0.0 }
 0xfe6   : > { %v3118_v21 = vsel %vm820_vm0, %v3107_v15, 0.0  ;;  %v5460_v23 = vpop.f32.mrb[46].mxu1  ;;  %v5798_v15 = vld [vmem:[%s7363_s18 + $0x50] sm:$0xff]  }
 0xfe7   : > { %v3119_v7 = vadd.f32 %v3118_v21, %v3117_v42  ;;  %v3110_v13 = vmul.f32 %v5460_v23, %v2737_v12  ;;  %v3094_v24 = vpop.f32.mrb[47].mxu1  ;;  %v5799_v12 = vld [vmem:[%s7363_s18 + $0x58] sm:$0xff]   ;;  %v5001_v42 = vld [vmem:[%s7364_s19] ss:$0 sm:$0xff]  ;;  %v5016_v23 = vld [vmem:[%s7364_s19 + $0x1] ss:$0 sm:$0xff] }
 0xfe8   : > { %v3109_v0 = vmul.f32 %v3094_v24, %v2734_v51 }
 0xfe9   : > { %v3121_v62 = vadd.f32 %v3120_v58, %v3119_v7  ;;  %v3124_v3 = vsel %vm820_vm0, %v3110_v13, 0.0 }
 0xfea   : > { %v3122_v47 = vsel %vm820_vm0, %v3109_v0, 0.0 }
 0xfeb   : > { %v3123_v29 = vadd.f32 %v3122_v47, %v3121_v62 }
 0xfed   : > { %v3125_v20 = vadd.f32 %v3124_v3, %v3123_v29 }
 0xfef   : > { %v3126_v45 = vrot.slane %v3125_v20, 4 }
 0xff1   : > { %v3127_v31 = vadd.f32 %v3126_v45, %v3125_v20 }
 0xff3   : > { %v3128_v52 = vrot.slane %v3127_v31, 2 }
 0xff5   : > { %v3129_v37 = vadd.f32 %v3128_v52, %v3127_v31 }
 0xff7   : > { %v3130_v60 = vrot.slane %v3129_v37, 1 }
 0xff9   : > { %v3131_v25 = vadd.f32 %v3130_v60, %v3129_v37  ;;  %v5031_v60 = vld [vmem:[%s7364_s19 + $0x2] ss:$0 sm:$0xff] }
 0xffb   : > { %v3137_v18 = vpack.c.bf16 %v3131_v25, %v3131_v25 }
 0xffd   : > { %5466 = vmatmul.mubr.msk.bf16.vlgmr.msra.gmra.mrb[20].mxu0 %vm820_vm0, %v3137_v18 }
 0xffe   : > { %5482 = vmatpush3.bf16.msra.mxu0 %v5789_v19 }
 0xfff   : > { %5483 = vmatprep.subr.bf16.mxu0 %v5791_v49 }
0x1002   : > { %5484 = vmatpush3.bf16.msra.mxu0 %v5791_v49 }
0x1003   : > { %5485 = vmatprep.subr.bf16.mxu0 %v5793_v33 }
0x1006   : > { %5486 = vmatpush3.bf16.msra.mxu0 %v5793_v33 }
0x1007   : > { %5487 = vmatprep.subr.bf16.mxu0 %v5795_v32 }
0x100a   : > { %5488 = vmatpush3.bf16.msra.mxu0 %v5795_v32 }
0x10d0   : > { %v3187_v63 = vpop.f32.mrb[20].mxu0 }
0x10d1   : > { %v3196_v38 = vrot.slane %v3187_v63, %v2742_v26  ;;  %v5467_v14 = vpop.f32.mrb[21].mxu0 }
0x10d2   : > { %v3190_v59 = vpop.f32.mrb[22].mxu0 }
0x10d3   : > { %v5468_v36 = vpop.f32.mrb[23].mxu0  ;;  %v3197_v1 = vadd.f32 %v3196_v38, %v6707_v43  ;;  %v3198_v2 = vadd.f32 %v3196_v38, %v6858_v10  ;;  %v3199_v28 = vadd.f32 %v3196_v38, %v6869_v48  ;;  %v3200_v4 = vadd.f32 %v3196_v38, %v6872_v55 }
0x10d4   : > { %v3201_v8 = vadd.f32 %v3196_v38, %v6884_v40  ;;  %v3202_v43 = vadd.f32 %v3196_v38, %v6887_v41  ;;  %v3203_v10 = vadd.f32 %v3196_v38, %v6896_v57  ;;  %v3204_v40 = vadd.f32 %v3196_v38, %v6899_v61  ;;  %v3883_v57 = vld [vmem:[%s7365_s20 + $0x18] sm:$0xff]  ;;  %v3886_v61 = vld [vmem:[%s7365_s20 + $0x30] sm:$0xff] }
0x10d5   : > { %v7048_v56 = vadd.f32 %v5000_v35, %v3197_v1  ;;  %v7050_v53 = vadd.f32 %v5000_v35, %v3198_v2  ;;  %v7055_v9 = vadd.f32 %v5000_v35, %v3199_v28  ;;  %v7057_v27 = vadd.f32 %v5000_v35, %v3200_v4 }
0x10d6   : > { %v7063_v55 = vadd.f32 %v5000_v35, %v3201_v8  ;;  %v7065_v30 = vadd.f32 %v5000_v35, %v3202_v43  ;;  %v7070_v6 = vadd.f32 %v5000_v35, %v3203_v10  ;;  %v7072_v5 = vadd.f32 %v5000_v35, %v3204_v40 }
0x10d7   : > { %v3226_v26 = vpack.c.bf16 %v7050_v53, %v7048_v56  ;;  %v3227_v48 = vpack.c.bf16 %v7057_v27, %v7055_v9 }
0x10d8   : > { %v3228_v39 = vpack.c.bf16 %v7065_v30, %v7063_v55  ;;  %v3229_v41 = vpack.c.bf16 %v7072_v5, %v7070_v6 }
0x10d9   : > { %3235 = vxpose.xlu0.c.b16.start [1/4] (short) (narrow) %v3226_v26, 32 }
0x10dd   : > { %3236 = vxpose.xlu0.c.b16.cont [2/4] (short) (narrow) %v3227_v48, 32 }
0x10e1   : > { %3237 = vxpose.xlu0.c.b16.cont [3/4] (short) (narrow) %v3228_v39, 32 }
0x10e5   : > { %3238 = vxpose.xlu0.c.b16.end [4/4] (short) (narrow) %v3229_v41, 32 }
0x10ee   : > { %3905 = vperm.xlu0 %5752, %v3883_v57  }
0x10f2   : > { %3920 = vperm.xlu0 %5752, %v3886_v61  }
0x113f   : > { %v3243_v34 = vpop.trf.xlu0 }
0x1140   : > { %5477 = vmatprep.mubr.msk.bf16.mxu1 %vm1021_vm1, %v3243_v34  ;;  %5489 = vmatprep.mubr.msk.bf16.mxu0 %vm1021_vm1, %v3243_v34 }
0x1143   : > { %v3244_v44 = vpop.trf.xlu0 }
0x1144   : > { %5478 = vmatmul.mubr.msk.bf16.vlgmr.msra.gmra.mrb[48].mxu1 %vm1021_vm1, %v3244_v44  ;;  %5490 = vmatmul.mubr.msk.bf16.vlgmr.msra.gmra.mrb[24].mxu0 %vm1021_vm1, %v3244_v44 }
0x1145   : > { %5494 = vmatpush3.bf16.msra.mxu1 %v5796_v16  ;;  %5501 = vmatprep.mubr.msk.bf16.mxu1 %vm1021_vm1, %v3243_v34 }
0x1146   : > { %5495 = vmatprep.subr.bf16.mxu1 %v5797_v11 }
0x1149   : > { %5496 = vmatpush3.bf16.msra.mxu1 %v5797_v11 }
0x114a   : > { %5497 = vmatprep.subr.bf16.mxu1 %v5798_v15 }
0x114d   : > { %5498 = vmatpush3.bf16.msra.mxu1 %v5798_v15 }
0x114e   : > { %5499 = vmatprep.subr.bf16.mxu1 %v5799_v12 }
0x1151   : > { %5500 = vmatpush3.bf16.msra.mxu1 %v5799_v12 }
0x1154   : > { %5502 = vmatmul.mubr.msk.bf16.vlgmr.msra.gmra.mrb[52].mxu1 %vm1021_vm1, %v3244_v44 }
0x1217   : > { %v5479_v51 = vpop.f32.mrb[48].mxu1  ;;  %v5491_v21 = vpop.f32.mrb[24].mxu0 }
0x1218   : > { %v3315_v7 = vpop.f32.mrb[49].mxu1  ;;  %v3402_v13 = vpop.f32.mrb[25].mxu0  ;;  %v3411_v62 = vadd.f32 %v5491_v21, %v5016_v23  ;;  %v3324_v16 = vadd.f32 %v5479_v51, %v5001_v42 }
0x1219   : > { %v3316_v24 = vadd.f32 %v5001_v42, %v3315_v7  ;;  %v5480_v58 = vpop.f32.mrb[50].mxu1  ;;  %v5492_v0 = vpop.f32.mrb[26].mxu0  ;;  %v3403_v20 = vadd.f32 %v5016_v23, %v3402_v13 }
0x121a   : > { %v3414_v47 = vadd.f32 %v5492_v0, %v5016_v23  ;;  %v3318_v29 = vpop.f32.mrb[51].mxu1  ;;  %v3405_v3 = vpop.f32.mrb[27].mxu0  ;;  %v3327_v63 = vadd.f32 %v5480_v58, %v5001_v42  ;;  %v3880_v0 = vld [vmem:[%s7365_s20] sm:$0xff] }
0x121b   : > { %v3406_v45 = vadd.f32 %v5016_v23, %v3405_v3  ;;  %5513 = vmatprep.mubr.msk.f32.mxu0 %vm1021_vm1, %v3316_v24  ;;  %v3319_v54 = vadd.f32 %v5001_v42, %v3318_v29  ;;  %v3884_v29 = vld [vmem:[%s7365_s20 + $0x20] sm:$0xff]  ;;  %v3885_v3 = vld [vmem:[%s7365_s20 + $0x28] sm:$0xff] }
0x121c   : > { %v5675_v31 = vpack.c.bf16 %v3414_v47, %v3411_v62  ;;  %v3881_v62 = vld [vmem:[%s7365_s20 + $0x8] sm:$0xff]  ;;  %v3882_v47 = vld [vmem:[%s7365_s20 + $0x10] sm:$0xff] }
0x121d   : > { %v5669_v52 = vpack.c.bf16 %v3406_v45, %v3403_v20  ;;  %v3887_v20 = vld [vmem:[%s7365_s20 + $0x38] sm:$0xff] }
0x121f   : > { %5671 = vmatprep.subr.msk.bf16.mxu0 %vm5670_vm5, %v5669_v52 }
0x1220   : > { %5674 = vmatpush3.bf16.xpose.msk.msra.mxu0 %vm5670_vm5, %v5669_v52 }
0x1221   : > { %5677 = vmatprep.subr.msk.bf16.mxu0 %vm5670_vm5, %v5675_v31 }
0x1227   : > { %v5503_v37 = vpop.f32.mrb[52].mxu1 }
0x1228   : > { %v3489_v25 = vpop.f32.mrb[53].mxu1  ;;  %5680 = vmatpush3.bf16.xpose.msk.msra.mxu0 %vm5670_vm5, %v5675_v31  ;;  %v3498_v17 = vadd.f32 %v5503_v37, %v5031_v60 }
0x1229   : > { %v5504_v18 = vpop.f32.mrb[54].mxu1  ;;  %v3490_v49 = vadd.f32 %v5031_v60, %v3489_v25 }
0x122a   : > { %v3501_v19 = vadd.f32 %v5504_v18, %v5031_v60  ;;  %v3492_v46 = vpop.f32.mrb[55].mxu1 }
0x122b   : > { %v3493_v50 = vadd.f32 %v5031_v60, %v3492_v46 }
0x122c   : > { %v5685_v33 = vpack.c.bf16 %v3501_v19, %v3498_v17 }
0x122d   : > { %v5681_v32 = vpack.c.bf16 %v3493_v50, %v3490_v49 }
0x122f   : > { %5682 = vmatprep.subr.bf16.mxu1 %v5681_v32  ;;  %5514 = vmatmul.mubr.msk.f32.vlgmr.msra.gmra.mrb[28].mxu0 %vm1021_vm1, %v3319_v54 }
0x1230   : > { %5684 = vmatpush3.bf16.msra.mxu1 %v5681_v32  ;;  %5516 = vmatprep.mubr.msk.f32.mxu0 %vm1021_vm1, %v3324_v16 }
0x1231   : > { %5686 = vmatprep.subr.bf16.mxu1 %v5685_v33 }
0x1233   : > { %5517 = vmatmul.mubr.msk.f32.gmra.mrb[30].mxu0 %vm1021_vm1, %v3327_v63 }
0x1234   : > { %5688 = vmatpush3.bf16.msra.mxu1 %v5685_v33  ;;  %v5800_v33 = vld [vmem:[%s7363_s18 + $0x60] sm:$0xff]  }
0x1235   : > { %5545 = vmatprep.subr.bf16.mxu1 %v5990_v22  ;;  %5537 = vmatprep.mubr.msk.bf16.mxu0 %vm1021_vm1, %v5800_v33 }
0x1302   : > { %v5515_v38 = vpop.f32.mrb[28].mxu0 }
0x1303   : > { %v3594_v14 = vpop.f32.mrb[29].mxu0  ;;  %v3614_v35 = vmul.f32 0.125, %v5515_v38 }
0x1304   : > { %v3613_v59 = vmul.f32 0.125, %v3594_v14 }
0x1305   : > { %v3620_v4 = vsel %vm820_vm0, %v3614_v35, -inf }
0x1306   : > { %v5518_v36 = vpop.f32.mrb[30].mxu0  ;;  %v3617_v1 = vsel %vm820_vm0, %v3613_v59, -inf }
0x1307   : > { %3618 = vmax.xlane.f32.xlu1 %v3617_v1  ;;  %v3604_v2 = vpop.f32.mrb[31].mxu0  ;;  %v3616_v8 = vmul.f32 0.125, %v5518_v36  ;;  %v5801_v36 = vld [vmem:[%s7363_s18 + $0x68] sm:$0xff]   ;;  %v5802_v1 = vld [vmem:[%s7363_s18 + $0x70] sm:$0xff]  }
0x1308   : > { %v3615_v28 = vmul.f32 0.125, %v3604_v2  ;;  %v5803_v2 = vld [vmem:[%s7363_s18 + $0x78] sm:$0xff]  }
0x1309   : > { %v3626_v43 = vsel %vm820_vm0, %v3616_v8, -inf }
0x130a   : > { %v3623_v26 = vsel %vm820_vm0, %v3615_v28, -inf }
0x130b   : > { %3621 = vmax.xlane.f32.xlu1 %v3620_v4 }
0x130f   : > { %3624 = vmax.xlane.f32.xlu1 %v3623_v26 }
0x1313   : > { %3627 = vmax.xlane.f32.xlu1 %v3626_v43 }
0x1394   : > { %v3619_v10 = vpop.xlane.xlu1 %3618 }
0x1395   : > { %v3629_v48 = vsub.f32 %v3613_v59, %v3619_v10 }
0x1397   : > { %v3633_v40 = vmul.f32 1.442695, %v3629_v48 }
0x1398   : > { %v3622_v39 = vpop.xlane.xlu1 %3621 }
0x1399   : > { %5961 = vpow2.f32 %v3633_v40  ;;  %v3630_v41 = vsub.f32 %v3614_v35, %v3622_v39 }
0x139b   : > { %v3635_v57 = vmul.f32 1.442695, %v3630_v41 }
0x139c   : > { %v3625_v61 = vpop.xlane.xlu1 %3624 }
0x139d   : > { %5963 = vpow2.f32 %v3635_v57  ;;  %v3631_v34 = vsub.f32 %v3615_v28, %v3625_v61  ;;  %v5813_v28 = vld [vmem:[%s7366_s21 + $0x10] sm:$0xff]  }
0x139f   : > { %v3637_v11 = vmul.f32 1.442695, %v3631_v34  ;;  %v3906_v34 = vpop.permute.xlu0 %3905 }
0x13a0   : > { %v3628_v44 = vpop.xlane.xlu1 %3627 }
0x13a1   : > { %5965 = vpow2.f32 %v3637_v11  ;;  %v3632_v15 = vsub.f32 %v3616_v8, %v3628_v44 }
0x13a3   : > { %v5962_v12 = vpop.eup %5961  ;;  %v3639_v42 = vmul.f32 1.442695, %v3632_v15 }
0x13a4   : > { %v3641_v51 = vsel %vm820_vm0, %v5962_v12, 0.0 }
0x13a5   : > { %5967 = vpow2.f32 %v3639_v42  ;;  %3642 = vadd.xlane.f32.xlu1 %v3641_v51 }
0x13a7   : > { %v5964_v21 = vpop.eup %5963 }
0x13a8   : > { %v3644_v23 = vsel %vm820_vm0, %v5964_v21, 0.0 }
0x13a9   : > { %3645 = vadd.xlane.f32.xlu1 %v3644_v23 }
0x13ab   : > { %v5966_v7 = vpop.eup %5965 }
0x13ac   : > { %v3647_v13 = vsel %vm820_vm0, %v5966_v7, 0.0 }
0x13ad   : > { %3648 = vadd.xlane.f32.xlu1 %v3647_v13 }
0x13af   : > { %v5968_v24 = vpop.eup %5967 }
0x13b0   : > { %v3650_v58 = vsel %vm820_vm0, %v5968_v24, 0.0 }
0x13b1   : > { %3651 = vadd.xlane.f32.xlu1 %v3650_v58 }
0x13c2   : > { %3890 = vperm.xlu1 %5753, %v3880_v0  }
0x13c6   : > { %3895 = vperm.xlu1 %5753, %v3881_v62  }
0x13ca   : > { %3900 = vperm.xlu1 %5753, %v3882_v47  }
0x13ce   : > { %3910 = vperm.xlu1 %5753, %v3884_v29  }
0x13d2   : > { %3915 = vperm.xlu1 %5753, %v3885_v3  }
0x13d6   : > { %3925 = vperm.xlu1 %5753, %v3887_v20  }
0x1432   : > { %v3643_v45 = vpop.xlane.xlu1 %3642 }
0x1433   : > { %5969 = vrcp.f32 %v3643_v45  ;;  %v5806_v45 = vld [vmem:[%s7367_s22 + $0x10] sm:$0xff]  }
0x1436   : > { %v3646_v31 = vpop.xlane.xlu1 %3645 }
0x1437   : > { %5971 = vrcp.f32 %v3646_v31  ;;  %v5807_v31 = vld [vmem:[%s7367_s22 + $0x18] sm:$0xff]  }
0x143a   : > { %v3649_v52 = vpop.xlane.xlu1 %3648 }
0x143b   : > { %5973 = vrcp.f32 %v3649_v52  ;;  %v5808_v52 = vld [vmem:[%s7367_s22 + $0x20] sm:$0xff]  }
0x143d   : > { %v5970_v37 = vpop.eup %5969 }
0x143e   : > { %v3652_v60 = vpop.xlane.xlu1 %3651  ;;  %v3654_v25 = vmul.f32 %v5970_v37, %v5962_v12  ;;  %v5809_v37 = vld [vmem:[%s7367_s22 + $0x28] sm:$0xff]  }
0x143f   : > { %5975 = vrcp.f32 %v3652_v60  ;;  %v5810_v60 = vld [vmem:[%s7367_s22 + $0x30] sm:$0xff]  }
0x1440   : > { %5527 = vmatprep.mubr.msk.f32.mxu1 %vm820_vm0, %v3654_v25  ;;  %v5811_v25 = vld [vmem:[%s7367_s22 + $0x38] sm:$0xff]  }
0x1441   : > { %v5972_v18 = vpop.eup %5971 }
0x1442   : > { %v3656_v17 = vmul.f32 %v5972_v18, %v5964_v21  ;;  %v3891_v4 = vpop.permute.xlu1 %3890  ;;  %v5812_v18 = vld [vmem:[%s7367_s22 + $0x40] sm:$0xff]  }
0x1444   : > { %5528 = vmatmul.mubr.msk.f32.vlgmr.msra.gmra.mrb[56].mxu1 %vm820_vm0, %v3656_v17  ;;  %v5814_v17 = vld [vmem:[%s7366_s21 + $0x18] sm:$0xff]  }
0x1445   : > { %v5974_v19 = vpop.eup %5973 }
0x1446   : > { %v3658_v46 = vmul.f32 %v5974_v19, %v5966_v7  ;;  %v3896_v8 = vpop.permute.xlu1 %3895 }
0x1448   : > { %5530 = vmatprep.mubr.msk.f32.mxu1 %vm820_vm0, %v3658_v46 }
0x1449   : > { %v5976_v49 = vpop.eup %5975 }
0x144a   : > { %v3660_v50 = vmul.f32 %v5976_v49, %v5968_v24  ;;  %v3901_v26 = vpop.permute.xlu1 %3900 }
0x144c   : > { %5531 = vmatmul.mubr.msk.f32.gmra.mrb[58].mxu1 %vm820_vm0, %v3660_v50 }
0x144d   : > { %5553 = vmatprep.mubr.msk.bf16.mxu1 %vm5991_vm2, %v5990_v22 }
0x144e   : > { %v3911_v43 = vpop.permute.xlu1 %3910 }
0x1452   : > { %v3916_v12 = vpop.permute.xlu1 %3915 }
0x1456   : > { %v3926_v0 = vpop.permute.xlu1 %3925 }
0x1517   : > { %v5529_v54 = vpop.f32.mrb[56].mxu1 }
0x1518   : > { %v3739_v32 = vpop.f32.mrb[57].mxu1 }
0x1519   : > { %v3767_v16 = vpack.c.bf16 %v5529_v54, %v3739_v32 }
0x151b   : > { %v3802_v63 = vsel %vm1021_vm1, %v3767_v16, 0  ;;  %5739 = vmatprep.subr.msk.bf16.mxu0 %vm1021_vm1, %v3767_v16 }
0x151c   : > { %5534 = vmatpush3.bf16.xpose.msra.mxu0 %v3802_v63  ;;  %v5815_v63 = vld [vmem:[%s7366_s21] sm:$0xff]  }
0x151f   : > { %v5532_v38 = vpop.f32.mrb[58].mxu1 }
0x1520   : > { %v3749_v14 = vpop.f32.mrb[59].mxu1 }
0x1521   : > { %v3768_v59 = vpack.c.bf16 %v5532_v38, %v3749_v14 }
0x1523   : > { %v3805_v35 = vsel %vm1021_vm1, %v3768_v59, 0  ;;  %5740 = vmatprep.subr.msk.bf16.mxu0 %vm1021_vm1, %v3768_v59  ;;  %v5816_v59 = vld [vmem:[%s7366_s21 + $0x8] sm:$0xff]  }
0x1524   : > { %5536 = vmatpush3.bf16.xpose.msra.mxu0 %v3805_v35 }
0x1525   : > { %5589 = vmatprep.subr.bf16.mxu0 %v5990_v22 }
0x152b   : > { %5538 = vmatmul.mubr.msk.bf16.vlgmr.msra.gmra.mrb[32].mxu0 %vm1021_vm1, %v5801_v36 }
0x152c   : > { %5541 = vmatprep.mubr.msk.bf16.mxu0 %vm1021_vm1, %v5802_v1  ;;  %5590 = vmatpush3.bf16.msra.mxu0 %v5813_v28 }
0x152d   : > { %5591 = vmatprep.subr.bf16.mxu0 %v5990_v22 }
0x1530   : > { %5592 = vmatpush3.bf16.msra.mxu0 %v5814_v17 }
0x1531   : > { %5597 = vmatprep.subr.bf16.mxu0 %v5990_v22 }
0x1533   : > { %5542 = vmatmul.mubr.msk.bf16.gmra.mrb[36].mxu0 %vm1021_vm1, %v5803_v2 }
0x1534   : > { %5593 = vmatprep.mubr.msk.bf16.mxu0 %vm5991_vm2, %v5990_v22 }
0x15fe   : > { %v5539_v10 = vpop.f32.mrb[32].mxu0 }
0x15ff   : > { %v3874_v48 = vadd.f32 %v5539_v10, %v7055_v9  ;;  %v3841_v40 = vpop.f32.mrb[33].mxu0 }
0x1600   : > { %v3872_v39 = vadd.f32 %v3841_v40, %v7048_v56  ;;  %v5540_v41 = vpop.f32.mrb[34].mxu0 }
0x1601   : > { %v3875_v57 = vadd.f32 %v5540_v41, %v7057_v27  ;;  %v3844_v61 = vpop.f32.mrb[35].mxu0  ;;  %v3930_v44 = vadd.f32 %v3901_v26, %v3874_v48 }
0x1602   : > { %v3873_v11 = vadd.f32 %v3844_v61, %v7050_v53  ;;  %v3928_v42 = vadd.f32 %v3891_v4, %v3872_v39  ;;  %v3921_v53 = vpop.permute.xlu0 %3920  ;;  %v5817_v4 = vld [vmem:[%s7366_s21 + $0x20] sm:$0xff]  }
0x1603   : > { %v3931_v15 = vadd.f32 %v3906_v34, %v3875_v57  ;;  %v5819_v57 = vld [vmem:[%s7366_s21 + $0x30] sm:$0xff]  }
0x1604   : > { %v3929_v51 = vadd.f32 %v3896_v8, %v3873_v11 }
0x1605   : > { %v3955_v21 = vpack.c.bf16 %v3931_v15, %v3930_v44  ;;  %v5820_v44 = vld [vmem:[%s7366_s21 + $0x38] sm:$0xff]  }
0x1606   : > { %v3954_v23 = vpack.c.bf16 %v3929_v51, %v3928_v42  ;;  %v5543_v7 = vpop.f32.mrb[36].mxu0 }
0x1607   : > { %v3878_v9 = vadd.f32 %v5543_v7, %v7070_v6  ;;  %v3857_v13 = vpop.f32.mrb[37].mxu0 }
0x1608   : > { %v3876_v56 = vadd.f32 %v3857_v13, %v7063_v55  ;;  %v5544_v24 = vpop.f32.mrb[38].mxu0  ;;  %5546 = vmatpush3.bf16.msra.mxu1 %v3954_v23  ;;  %v5821_v23 = vld [vmem:[%s7366_s21 + $0x40] sm:$0xff]   ;;  %v5822_v13 = vld [vmem:[%s7366_s21 + $0x48] sm:$0xff]  }
0x1609   : > { %v3879_v27 = vadd.f32 %v5544_v24, %v7072_v5  ;;  %v3860_v58 = vpop.f32.mrb[39].mxu0  ;;  %5547 = vmatprep.subr.bf16.mxu1 %v5990_v22  ;;  %v3934_v47 = vadd.f32 %v3921_v53, %v3878_v9  ;;  %v5804_v5 = vld [vmem:[%s7367_s22] sm:$0xff]  }
0x160a   : > { %v3877_v62 = vadd.f32 %v3860_v58, %v7065_v30  ;;  %v3932_v3 = vadd.f32 %v3911_v43, %v3876_v56  ;;  %v5805_v30 = vld [vmem:[%s7367_s22 + $0x8] sm:$0xff]  }
0x160b   : > { %v3935_v29 = vadd.f32 %v3926_v0, %v3879_v27  ;;  %v5818_v43 = vld [vmem:[%s7366_s21 + $0x28] sm:$0xff]   ;;  %v5823_v0 = vld [vmem:[%s7366_s21 + $0x50] sm:$0xff]  }
0x160c   : > { %v3933_v20 = vadd.f32 %v3916_v12, %v3877_v62  ;;  %5548 = vmatpush3.bf16.msra.mxu1 %v3955_v21 }
0x160d   : > { %v3957_v6 = vpack.c.bf16 %v3935_v29, %v3934_v47  ;;  %5549 = vmatprep.subr.bf16.mxu1 %v5990_v22 }
0x160e   : > { %v3956_v55 = vpack.c.bf16 %v3933_v20, %v3932_v3  ;;  %v5824_v3 = vld [vmem:[%s7366_s21 + $0x58] sm:$0xff]  }
0x1610   : > { %5550 = vmatpush3.bf16.msra.mxu1 %v3956_v55 }
0x1611   : > { %5551 = vmatprep.subr.bf16.mxu1 %v5990_v22 }
0x1614   : > { %5552 = vmatpush3.bf16.msra.mxu1 %v3957_v6 }
0x1617   : > { %5554 = vmatmul.mubr.msk.bf16.vlgmr.msra.gmra.mrb[60].mxu1 %vm1021_vm1, %v5804_v5 }
0x1618   : > { %5557 = vmatprep.mubr.msk.bf16.mxu1 %vm5991_vm2, %v5990_v22 }
0x161f   : > { %5558 = vmatmul.mubr.msk.bf16.gmra.mrb[64].mxu1 %vm1021_vm1, %v5805_v30 }
0x1620   : > { %5561 = vmatprep.mubr.msk.bf16.mxu1 %vm5991_vm2, %v5990_v22 }
0x1627   : > { %5562 = vmatmul.mubr.msk.bf16.gmra.mrb[68].mxu1 %vm1021_vm1, %v5806_v45  ;;  %v5825_v45 = vld [vmem:[%s7366_s21 + $0x60] sm:$0xff]  }
0x1628   : > { %5565 = vmatprep.mubr.msk.bf16.mxu1 %vm5991_vm2, %v5990_v22 }
0x162f   : > { %5566 = vmatmul.mubr.msk.bf16.gmra.mrb[72].mxu1 %vm1021_vm1, %v5807_v31  ;;  %v5826_v31 = vld [vmem:[%s7366_s21 + $0x68] sm:$0xff]  }
0x1630   : > { %5569 = vmatprep.mubr.msk.bf16.mxu1 %vm5991_vm2, %v5990_v22 }
0x1637   : > { %5570 = vmatmul.mubr.msk.bf16.gmra.mrb[76].mxu1 %vm1021_vm1, %v5808_v52  ;;  %v5827_v52 = vld [vmem:[%s7366_s21 + $0x70] sm:$0xff]  }
0x1638   : > { %5573 = vmatprep.mubr.msk.bf16.mxu1 %vm5991_vm2, %v5990_v22 }
0x163f   : > { %5574 = vmatmul.mubr.msk.bf16.gmra.mrb[80].mxu1 %vm1021_vm1, %v5809_v37  ;;  %v5828_v37 = vld [vmem:[%s7366_s21 + $0x78] sm:$0xff]  }
0x1640   : > { %5577 = vmatprep.mubr.msk.bf16.mxu1 %vm5991_vm2, %v5990_v22 }
0x1647   : > { %5578 = vmatmul.mubr.msk.bf16.gmra.mrb[84].mxu1 %vm1021_vm1, %v5810_v60  ;;  %v5829_v60 = vld [vmem:[%s7366_s21 + $0x80] sm:$0xff]  }
0x1648   : > { %5581 = vmatprep.mubr.msk.bf16.mxu1 %vm5991_vm2, %v5990_v22 }
0x164f   : > { %5582 = vmatmul.mubr.msk.bf16.gmra.mrb[88].mxu1 %vm1021_vm1, %v5811_v25  ;;  %v5830_v25 = vld [vmem:[%s7366_s21 + $0x88] sm:$0xff]  }
0x1650   : > { %5585 = vmatprep.mubr.msk.bf16.mxu1 %vm5991_vm2, %v5990_v22 }
0x1657   : > { %5586 = vmatmul.mubr.msk.bf16.gmra.mrb[92].mxu1 %vm1021_vm1, %v5812_v18 }
0x16ea   : > { %v4064_v19 = vpop.f32.mrb[60].mxu1 }
0x16eb   : > { %v5555_v46 = vpop.f32.mrb[61].mxu1 }
0x16ec   : > { %v4067_v49 = vpop.f32.mrb[62].mxu1 }
0x16ed   : > { %v4139_v50 = vpack.c.bf16 %v4067_v49, %v4064_v19  ;;  %v5556_v33 = vpop.f32.mrb[63].mxu1 }
0x16f2   : > { %v4072_v54 = vpop.f32.mrb[64].mxu1 }
0x16f3   : > { %v5559_v32 = vpop.f32.mrb[65].mxu1 }
0x16f4   : > { %v4075_v16 = vpop.f32.mrb[66].mxu1 }
0x16f5   : > { %v4145_v38 = vpack.c.bf16 %v4075_v16, %v4072_v54  ;;  %v5560_v14 = vpop.f32.mrb[67].mxu1 }
0x16f7   : > { %5594 = vmatmul.mubr.msk.bf16.vlgmr.msra.gmra.mrb[40].mxu0 %vm820_vm0, %v4145_v38 }
0x16f8   : > { %5598 = vmatpush3.bf16.msra.mxu0 %v5815_v63  ;;  %5601 = vmatprep.mubr.msk.bf16.mxu0 %vm5991_vm2, %v5990_v22 }
0x16f9   : > { %5599 = vmatprep.subr.bf16.mxu0 %v5990_v22 }
0x16fa   : > { %v4080_v35 = vpop.f32.mrb[68].mxu1 }
0x16fb   : > { %v5563_v36 = vpop.f32.mrb[69].mxu1 }
0x16fc   : > { %5600 = vmatpush3.bf16.msra.mxu0 %v5816_v59  ;;  %v4083_v1 = vpop.f32.mrb[70].mxu1 }
0x16fd   : > { %5605 = vmatprep.subr.bf16.mxu0 %v5990_v22  ;;  %v4263_v2 = vpack.c.bf16 %v4083_v1, %v4080_v35  ;;  %v5564_v28 = vpop.f32.mrb[71].mxu1 }
0x1702   : > { %v4088_v8 = vpop.f32.mrb[72].mxu1 }
0x1703   : > { %5602 = vmatmul.mubr.msk.bf16.vlgmr.msra.gmra.mrb[40].mxu0 %vm820_vm0, %v4139_v50  ;;  %v5567_v26 = vpop.f32.mrb[73].mxu1 }
0x1704   : > { %5606 = vmatpush3.bf16.msra.mxu0 %v5817_v4  ;;  %5609 = vmatprep.mubr.msk.bf16.mxu0 %vm5991_vm2, %v5990_v22  ;;  %v4091_v10 = vpop.f32.mrb[74].mxu1 }
0x1705   : > { %5607 = vmatprep.subr.bf16.mxu0 %v5990_v22  ;;  %v4327_v48 = vpack.c.bf16 %v4091_v10, %v4088_v8  ;;  %v5568_v40 = vpop.f32.mrb[75].mxu1 }
0x1708   : > { %5608 = vmatpush3.bf16.msra.mxu0 %v5818_v43  ;;  %v5143_v43 = vld [vmem:[%s7368_s23] ss:$0 sm:$0xff] }
0x1709   : > { %5613 = vmatprep.subr.bf16.mxu0 %v5990_v22 }
0x170a   : > { %v4096_v39 = vpop.f32.mrb[76].mxu1 }
0x170b   : > { %v5571_v41 = vpop.f32.mrb[77].mxu1 }
0x170c   : > { %v4099_v61 = vpop.f32.mrb[78].mxu1 }
0x170d   : > { %v4391_v34 = vpack.c.bf16 %v4099_v61, %v4096_v39  ;;  %v5572_v11 = vpop.f32.mrb[79].mxu1 }
0x170f   : > { %5610 = vmatmul.mubr.msk.bf16.vlgmr.msra.gmra.mrb[40].mxu0 %vm820_vm0, %v4263_v2 }
0x1710   : > { %5614 = vmatpush3.bf16.msra.mxu0 %v5819_v57  ;;  %5617 = vmatprep.mubr.msk.bf16.mxu0 %vm5991_vm2, %v5990_v22 }
0x1711   : > { %5615 = vmatprep.subr.bf16.mxu0 %v5990_v22 }
0x1712   : > { %v4104_v15 = vpop.f32.mrb[80].mxu1 }
0x1713   : > { %v5575_v12 = vpop.f32.mrb[81].mxu1 }
0x1714   : > { %5616 = vmatpush3.bf16.msra.mxu0 %v5820_v44  ;;  %v4107_v42 = vpop.f32.mrb[82].mxu1 }
0x1715   : > { %5621 = vmatprep.subr.bf16.mxu0 %v5990_v22  ;;  %v4455_v51 = vpack.c.bf16 %v4107_v42, %v4104_v15  ;;  %v5576_v21 = vpop.f32.mrb[83].mxu1 }
0x171a   : > { %v4112_v7 = vpop.f32.mrb[84].mxu1 }
0x171b   : > { %5618 = vmatmul.mubr.msk.bf16.vlgmr.msra.gmra.mrb[40].mxu0 %vm820_vm0, %v4327_v48  ;;  %v5579_v9 = vpop.f32.mrb[85].mxu1  ;;  %v5144_v48 = vld [vmem:[%s7408_s24] ss:$0 sm:$0xff] }
0x171c   : > { %5622 = vmatpush3.bf16.msra.mxu0 %v5821_v23  ;;  %5625 = vmatprep.mubr.msk.bf16.mxu0 %vm5991_vm2, %v5990_v22  ;;  %v4115_v56 = vpop.f32.mrb[86].mxu1 }
0x171d   : > { %5623 = vmatprep.subr.bf16.mxu0 %v5990_v22  ;;  %v4519_v24 = vpack.c.bf16 %v4115_v56, %v4112_v7  ;;  %v5580_v27 = vpop.f32.mrb[87].mxu1 }
0x1720   : > { %5624 = vmatpush3.bf16.msra.mxu0 %v5822_v13 }
0x1721   : > { %5629 = vmatprep.subr.bf16.mxu0 %v5990_v22 }
0x1722   : > { %v4120_v58 = vpop.f32.mrb[88].mxu1 }
0x1723   : > { %v5583_v53 = vpop.f32.mrb[89].mxu1 }
0x1724   : > { %v4123_v62 = vpop.f32.mrb[90].mxu1 }
0x1725   : > { %v4583_v47 = vpack.c.bf16 %v4123_v62, %v4120_v58  ;;  %v5584_v29 = vpop.f32.mrb[91].mxu1 }
0x1727   : > { %5626 = vmatmul.mubr.msk.bf16.vlgmr.msra.gmra.mrb[40].mxu0 %vm820_vm0, %v4391_v34 }
0x1728   : > { %5630 = vmatpush3.bf16.msra.mxu0 %v5823_v0  ;;  %5633 = vmatprep.mubr.msk.bf16.mxu0 %vm5991_vm2, %v5990_v22 }
0x1729   : > { %5631 = vmatprep.subr.bf16.mxu0 %v5990_v22 }
0x172a   : > { %v4128_v20 = vpop.f32.mrb[92].mxu1 }
0x172b   : > { %v5587_v6 = vpop.f32.mrb[93].mxu1 }
0x172c   : > { %5632 = vmatpush3.bf16.msra.mxu0 %v5824_v3  ;;  %v4131_v55 = vpop.f32.mrb[94].mxu1 }
0x172d   : > { %5637 = vmatprep.subr.bf16.mxu0 %v5990_v22  ;;  %v4647_v5 = vpack.c.bf16 %v4131_v55, %v4128_v20  ;;  %v5588_v30 = vpop.f32.mrb[95].mxu1 }
0x1733   : > { %5634 = vmatmul.mubr.msk.bf16.vlgmr.msra.gmra.mrb[40].mxu0 %vm820_vm0, %v4455_v51 }
0x1734   : > { %5638 = vmatpush3.bf16.msra.mxu0 %v5825_v45  ;;  %5641 = vmatprep.mubr.msk.bf16.mxu0 %vm5991_vm2, %v5990_v22 }
0x1735   : > { %5639 = vmatprep.subr.bf16.mxu0 %v5990_v22 }
0x1738   : > { %5640 = vmatpush3.bf16.msra.mxu0 %v5826_v31 }
0x1739   : > { %5645 = vmatprep.subr.bf16.mxu0 %v5990_v22 }
0x173f   : > { %5642 = vmatmul.mubr.msk.bf16.vlgmr.msra.gmra.mrb[40].mxu0 %vm820_vm0, %v4519_v24 }
0x1740   : > { %5646 = vmatpush3.bf16.msra.mxu0 %v5827_v52  ;;  %5649 = vmatprep.mubr.msk.bf16.mxu0 %vm5991_vm2, %v5990_v22 }
0x1741   : > { %5647 = vmatprep.subr.bf16.mxu0 %v5990_v22 }
0x1744   : > { %5648 = vmatpush3.bf16.msra.mxu0 %v5828_v37 }
0x1745   : > { %5653 = vmatprep.subr.bf16.mxu0 %v5990_v22 }
0x174b   : > { %5650 = vmatmul.mubr.msk.bf16.vlgmr.msra.gmra.mrb[40].mxu0 %vm820_vm0, %v4583_v47 }
0x174c   : > { %5654 = vmatpush3.bf16.msra.mxu0 %v5829_v60  ;;  %5657 = vmatprep.mubr.msk.bf16.mxu0 %vm5991_vm2, %v5990_v22 }
0x174d   : > { %5655 = vmatprep.subr.bf16.mxu0 %v5990_v22 }
0x1750   : > { %5656 = vmatpush3.bf16.msra.mxu0 %v5830_v25 }
0x1757   : > { %5658 = vmatmul.mubr.msk.bf16.vlgmr.msra.gmra.mrb[40].mxu0 %vm820_vm0, %v4647_v5 }
0x182a   : > { %v4697_v18 = vpop.f32.mrb[40].mxu0 }
0x182b   : > { %v5659_v17 = vpop.f32.mrb[41].mxu0  ;;  %v4708_v19 = vsel %vm820_vm0, %v4697_v18, 0.0 }
0x182c   : > { %4709 = vadd.xlane.f32.xlu0 %v4708_v19  ;;  %v4700_v46 = vpop.f32.mrb[42].mxu0 }
0x182d   : > { %v5660_v49 = vpop.f32.mrb[43].mxu0  ;;  %v4711_v50 = vsel %vm820_vm0, %v4700_v46, 0.0 }
0x182e   : > { %4712 = vadd.xlane.f32.xlu1 %v4711_v50 }
0x18b9   : > { %v4710_v33 = vpop.xlane.xlu0 %4709 }
0x18ba   : > { %v4714_v54 = vmul.f32 0.03125, %v4710_v33 }
0x18bb   : > { %v4713_v32 = vpop.xlane.xlu1 %4712 }
0x18bc   : > { %v4716_v16 = vsub.f32 %v4697_v18, %v4714_v54  ;;  %v4715_v63 = vmul.f32 0.03125, %v4713_v32 }
0x18be   : > { %v4717_v38 = vsub.f32 %v4700_v46, %v4715_v63  ;;  %v4718_v22 = vmul.f32 %v4716_v16, %v4716_v16 }
0x18c0   : > { %v4720_v14 = vsel %vm820_vm0, %v4718_v22, 0.0  ;;  %v4719_v59 = vmul.f32 %v4717_v38, %v4717_v38 }
0x18c1   : > { %4721 = vadd.xlane.f32.xlu0 %v4720_v14 }
0x18c2   : > { %v4723_v35 = vsel %vm820_vm0, %v4719_v59, 0.0 }
0x18c5   : > { %4724 = vadd.xlane.f32.xlu0 %v4723_v35 }
0x194e   : > { %v4722_v36 = vpop.xlane.xlu0 %4721 }
0x194f   : > { %v4726_v1 = vmul.f32 0.03125, %v4722_v36 }
0x1951   : > { %v4728_v2 = vadd.f32 1e-05, %v4726_v1 }
0x1952   : > { %v4725_v28 = vpop.xlane.xlu0 %4724 }
0x1953   : > { %5977 = vrsqrt.f32 %v4728_v2  ;;  %v4727_v4 = vmul.f32 0.03125, %v4725_v28 }
0x1955   : > { %v4729_v8 = vadd.f32 1e-05, %v4727_v4 }
0x1957   : > { %5979 = vrsqrt.f32 %v4729_v8 }
0x195d   : > { %v5978_v26 = vpop.eup %5977 }
0x195e   : > { %v4732_v10 = vmul.f32 %v5978_v26, %v4716_v16 }
0x1960   : > { %v4740_v40 = vmul.f32 %v5143_v43, %v4732_v10 }
0x1961   : > { %v5980_v39 = vpop.eup %5979 }
0x1962   : > { %v4733_v41 = vmul.f32 %v5980_v39, %v4717_v38  ;;  %v4748_v57 = vadd.f32 %v5144_v48, %v4740_v40 }
0x1964   : > { %v4741_v61 = vmul.f32 %v5143_v43, %v4733_v41  ;;  %4750 = vxpose.xlu1.b32.start [1/2] (short) (narrow) %v4748_v57, 32 }
0x1966   : > { %v4749_v34 = vadd.f32 %v5144_v48, %v4741_v61 }
0x1968   : > { %4751 = vxpose.xlu1.b32.end [2/2] (short) (narrow) %v4749_v34, 32 }
0x19e4   : > { %v4766_v11 = vpop.trf.xlu1 }
0x19e5   : > { %4783 = vst.msk [vmem:[%s764_s4] sm:$0xff] %vm4782_vm6, %v4766_v11 }
0x19e8   : > { %v4767_v44 = vpop.trf.xlu1 }
0x19e9   : > { %4784 = vst.msk [vmem:[%s764_s4 + $0x8] sm:$0xff] %vm4782_vm6, %v4767_v44 }
0x19ec   : > { %v4768_v15 = vpop.trf.xlu1 }
0x19ed   : > { %4785 = vst.msk [vmem:[%s764_s4 + $0x10] sm:$0xff] %vm4782_vm6, %v4768_v15 }
0x19f0   : > { %v4769_v12 = vpop.trf.xlu1 }
0x19f1   : > { %4786 = vst.msk [vmem:[%s764_s4 + $0x18] sm:$0xff] %vm4782_vm6, %v4769_v12 }
0x19f2 PF: > { %s7411_s6 = sld [smem:[#allocation2_spill]] }
0x19f8   : > { %s35_s29 = sadd.s32 1, %s7411_s6  }
0x19f9   : > { %p32_p4 = scmp.ge.s32.totalorder %s35_s29, 4  }
0x19fb   :  { %34 = sbr.rel (!%p32_p4) target bundleno = 13 (0xd), region = 176 }

</bundles_post_ra>
